<compile_context>
chip_gen: v7x
topology: tpu7x:2x2x1
jax: 0.10.0
libtpu: 0.0.40
codegen_flags: <defaults>
</compile_context>

<pallas_src>
import functools

import jax
import jax.numpy as jnp
from jax.experimental import pallas as pl
from jax.experimental.pallas import tpu as pltpu


# ------------------------------ fused kernel --------------------------------

def _make_resblk_kernel(cin, cout, catt, same_ch, H, W, ext, pw):
    """Builds the fused AAD_ResBlk kernel body for one batch sample."""
    Hp, Wp = H + 2, W + 2
    P = Hp * Wp                       # padded-flat spatial length
    inv_hw = 1.0 / float(H * W)
    eps = 1e-5
    cmax = max(cin, cout)
    # Per-stage channel counts & row offsets into the concatenated
    # gamma/beta slabs (stage order: AAD_1, AAD_2[, AAD_3]).
    cs = [cin, cout] + ([] if same_ch else [cin])
    offs = [2 * sum(cs[:s]) for s in range(len(cs))]
    # Lane offset (inside the zero-extended buffer) of each 3x3 tap,
    # tap order t = ky*3 + kx matches the (C_out, 9*C_in) weight repack.
    starts = [ext - Wp - 1 + ky * Wp + kx for ky in range(3) for kx in range(3)]

    def kernel(hin_ref, za_ref, zid_ref, vmask_ref,
               wgb_ref, bgb_ref, wid_ref, bid_ref,
               wm_ref, bm_ref, wrc_ref, brc_ref,
               out_ref, scr, tap, gba):
        # Zero ONLY the two reachable margin strips of the staging buffer
        # (the data window is fully overwritten before every read).  This is
        # done unconditionally each step: under dimension_semantics=
        # ("parallel",) each TensorCore owns its own scratch, so a
        # program_id == 0 guard would be unsafe.
        zeros_m = jnp.zeros((cmax, Wp + 1), jnp.float32)
        scr[:, ext - Wp - 1:ext] = zeros_m
        scr[:, ext + pw:ext + pw + Wp + 1] = zeros_m

        vmask = vmask_ref[...]        # (1, PW): 1 on the HxW interior, 0 ring/tail
        zid = zid_ref[...]            # (1, 512)

        def build_taps(src_ref, c):
            # In-kernel im2col: 9 shifted lane slices stacked along sublanes
            # -> one (9c, PW) operand; taps live in the MXU contraction dim.
            for t in range(9):
                tap[t * c:(t + 1) * c, :] = src_ref[0:c, pl.ds(starts[t], pw)]
            return tap[0:9 * c, :].astype(jnp.bfloat16)

        # ---------- prologue: work shared by every AAD stage -----------------
        # gamma/beta from Z_att for ALL stages: one im2col + ONE matmul.
        za_taps = build_taps(za_ref, catt)
        gba[...] = (jnp.dot(wgb_ref[...], za_taps,
                            preferred_element_type=jnp.float32) + bgb_ref[...])
        # gamma/beta from Z_id for ALL stages: one multiply + one lane reduce.
        gb_id = jnp.sum(wid_ref[...] * zid, axis=-1, keepdims=True) + bid_ref[...]

        def aad_relu(xv, s):
            # xv: (c, PW), zero on ring/tail.  Returns ReLU(AAD(xv)) * vmask.
            c, off = cs[s], offs[s]
            # InstanceNorm2d (affine=False, eps=1e-5, biased variance).
            mean = jnp.sum(xv, axis=-1, keepdims=True) * inv_hw
            xc = (xv - mean) * vmask
            var = jnp.sum(xc * xc, axis=-1, keepdims=True) * inv_hw
            hk = xc * jax.lax.rsqrt(var + eps)                     # (c, PW)
            # sigmoid-gate conv: a single c_out=1 row of a tap-stacked matmul.
            scr[0:c, ext:ext + pw] = hk
            hk_taps = build_taps(scr, c)
            logit = (jnp.dot(wm_ref[s:s + 1, 0:9 * c], hk_taps,
                             preferred_element_type=jnp.float32)
                     + bm_ref[s:s + 1, :])
            gate = jax.nn.sigmoid(logit)                           # (1, PW)
            g_att = gba[off:off + c, :]
            b_att = gba[off + c:off + 2 * c, :]
            g_id = gb_id[off:off + c]                              # (c, 1)
            b_id = gb_id[off + c:off + 2 * c]
            a_att = hk * g_att + b_att
            a_id = hk * g_id + b_id
            out = (1.0 - gate) * a_att + gate * a_id
            return jnp.maximum(out, 0.0) * vmask                   # zero ring/tail

        def relu_conv(act, s):
            c = cs[s]
            scr[0:c, ext:ext + pw] = act
            a_taps = build_taps(scr, c)
            return (jnp.dot(wrc_ref[s * cout:(s + 1) * cout, 0:9 * c], a_taps,
                            preferred_element_type=jnp.float32)
                    + brc_ref[s * cout:(s + 1) * cout, :])

        h1 = hin_ref[0:cin, pl.ds(ext, pw)]                        # (cin, PW)
        x1 = relu_conv(aad_relu(h1, 0), 0) * vmask                 # feeds AAD_2
        x2 = relu_conv(aad_relu(x1, 1), 1)
        res = h1 if same_ch else relu_conv(aad_relu(h1, 2), 2)
        # Ring/tail lanes carry conv garbage; the wrapper crops to HxW.
        out_ref[...] = x2 + res

    return kernel


# ------------------------- parameter / input repack --------------------------

def _conv_flat(w):
    """(Cout, Cin, 3, 3) -> (Cout, 9*Cin), column index = (ky*3+kx)*Cin + ci."""
    co, ci = w.shape[0], w.shape[1]
    return jnp.transpose(w, (0, 2, 3, 1)).reshape(co, 9 * ci)


def _pad_cols(w, ncols):
    return jnp.pad(w, ((0, 0), (0, ncols - w.shape[1])))


def _assemble_weights(params, cin, cout, catt, same_ch):
    """Pack all weights into 8 dense slabs (bf16 for MXU operands)."""
    cmax = max(cin, cout)
    stage_keys = ["AAD_1", "AAD_2"] + ([] if same_ch else ["AAD_3"])
    rc_keys = [("rc1_w", "rc1_b"), ("rc2_w", "rc2_b")] + \
              ([] if same_ch else [("rc3_w", "rc3_b")])
    wgb, bgb, wid, bid, wm, bm = [], [], [], [], [], []
    for k in stage_keys:
        p = params[k]
        wgb += [_conv_flat(p["conv1_w"]), _conv_flat(p["conv2_w"])]
        bgb += [p["conv1_b"], p["conv2_b"]]
        wid += [p["lin1_w"], p["lin2_w"]]
        bid += [p["lin1_b"], p["lin2_b"]]
        wm.append(_pad_cols(_conv_flat(p["convs_w"]), 9 * cmax))
        bm.append(p["convs_b"])
    wrc = [_pad_cols(_conv_flat(params[kw]), 9 * cmax) for kw, _ in rc_keys]
    brc = [params[kb] for _, kb in rc_keys]
    W_gb = jnp.concatenate(wgb, axis=0).astype(jnp.bfloat16)   # (C_all, 9*catt)
    b_gb = jnp.concatenate(bgb).reshape(-1, 1)                 # (C_all, 1)
    W_id = jnp.concatenate(wid, axis=0)                        # (C_all, 512) f32
    b_id = jnp.concatenate(bid).reshape(-1, 1)
    W_m = jnp.concatenate(wm, axis=0).astype(jnp.bfloat16)     # (n_stage, 9*cmax)
    b_m = jnp.concatenate(bm).reshape(-1, 1)
    W_rc = jnp.concatenate(wrc, axis=0).astype(jnp.bfloat16)   # (n_stage*cout, 9*cmax)
    b_rc = jnp.concatenate(brc).reshape(-1, 1)
    return [W_gb, b_gb, W_id, b_id, W_m, b_m, W_rc, b_rc]


def _pad_ext(x, ext, pe):
    """NCHW -> (N, C, PE): spatial zero-pad by 1, flatten, zero-extend lanes."""
    n, c, h, w = x.shape
    xp = jnp.pad(x, ((0, 0), (0, 0), (1, 1), (1, 1)))
    xf = xp.reshape(n, c, (h + 2) * (w + 2))
    return jnp.pad(xf, ((0, 0), (0, 0), (ext, pe - ext - xf.shape[-1])))


# ---------------------------------- forward ----------------------------------

def aad_resblk_forward(H_in, Z_aat, Z_id, params, in_channels, out_channels):
    N, cin, H, W = H_in.shape
    catt = Z_aat.shape[1]
    cout = out_channels
    same_ch = (in_channels == out_channels)
    cmax = max(cin, cout)
    Hp, Wp = H + 2, W + 2
    P = Hp * Wp
    PW = -(-P // 128) * 128            # lane-dense compute/store width (384)
    EXT = 32                           # small zero margin, must be >= Wp+1
    assert EXT >= Wp + 1
    PE = -(-(EXT + Wp + 1 + PW) // 128) * 128   # extended input lane length
    assert PE >= EXT + Wp + 1 + PW

    hin_ext = _pad_ext(H_in.astype(jnp.float32), EXT, PE)        # (N, cin, PE)
    za_ext = _pad_ext(Z_aat.astype(jnp.float32), EXT, PE)        # (N, catt, PE)
    zid = Z_id.reshape(N, 1, 512).astype(jnp.float32)            # (N, 1, 512)
    vmask = jnp.pad(
        jnp.pad(jnp.ones((H, W), jnp.float32), ((1, 1), (1, 1))).reshape(1, P),
        ((0, 0), (0, PW - P)))                                   # (1, PW)

    wargs = _assemble_weights(params, cin, cout, catt, same_ch)
    C_all = wargs[0].shape[0]

    def _bc(a):
        shp = tuple(a.shape)
        return pl.BlockSpec(shp, lambda n, shp=shp: (0,) * len(shp))

    in_specs = ([pl.BlockSpec((None, cin, PE), lambda n: (n, 0, 0)),
                 pl.BlockSpec((None, catt, PE), lambda n: (n, 0, 0)),
                 pl.BlockSpec((None, 1, 512), lambda n: (n, 0, 0)),
                 _bc(vmask)]
                + [_bc(w) for w in wargs])

    kernel = _make_resblk_kernel(cin, cout, catt, same_ch, H, W, EXT, PW)

    out_flat = pl.pallas_call(
        kernel,
        grid=(N,),
        in_specs=in_specs,
        out_specs=pl.BlockSpec((None, cout, PW), lambda n: (n, 0, 0)),
        out_shape=jax.ShapeDtypeStruct((N, cout, PW), jnp.float32),
        scratch_shapes=[
            pltpu.VMEM((cmax, PE), jnp.float32),        # zero-margin staging
            pltpu.VMEM((9 * cmax, PW), jnp.float32),    # im2col tap stack
            pltpu.VMEM((C_all, PW), jnp.float32),       # all-stage gamma/beta(att)
        ],
        compiler_params=pltpu.CompilerParams(
            dimension_semantics=("parallel",)),          # batch across TCs on v7x
    )(hin_ext, za_ext, zid, vmask, *wargs)
    return out_flat[:, :, :P].reshape(N, cout, Hp, Wp)[:, :, 1:Hp - 1, 1:Wp - 1]


# --------------------------- parameter construction --------------------------

def _init(key, shape, scale=0.05):
    return scale * jax.random.normal(key, shape, dtype=jnp.float32)


def make_aad_params(key, in_channels, att_channels):
    ks = jax.random.split(key, 10)
    return {
        "conv1_w": _init(ks[0], (in_channels, att_channels, 3, 3)),
        "conv1_b": _init(ks[1], (in_channels,)),
        "conv2_w": _init(ks[2], (in_channels, att_channels, 3, 3)),
        "conv2_b": _init(ks[3], (in_channels,)),
        "lin1_w": _init(ks[4], (in_channels, 512)),
        "lin1_b": _init(ks[5], (in_channels,)),
        "lin2_w": _init(ks[6], (in_channels, 512)),
        "lin2_b": _init(ks[7], (in_channels,)),
        "convs_w": _init(ks[8], (1, in_channels, 3, 3)),
        "convs_b": _init(ks[9], (1,)),
    }


def make_resblk_params(key, in_channels, out_channels, att_channels):
    ks = jax.random.split(key, 9)
    return {
        "AAD_1": make_aad_params(ks[0], in_channels, att_channels),
        "AAD_2": make_aad_params(ks[1], out_channels, att_channels),
        "AAD_3": make_aad_params(ks[2], in_channels, att_channels),
        "rc1_w": _init(ks[3], (out_channels, in_channels, 3, 3)),
        "rc1_b": _init(ks[4], (out_channels,)),
        "rc2_w": _init(ks[5], (out_channels, out_channels, 3, 3)),
        "rc2_b": _init(ks[6], (out_channels,)),
        "rc3_w": _init(ks[7], (out_channels, in_channels, 3, 3)),
        "rc3_b": _init(ks[8], (out_channels,)),
    }


# ----------------------------- pure-JAX reference ----------------------------

def _ref_conv3x3(x, w, b):
    y = jax.lax.conv_general_dilated(
        x, w, window_strides=(1, 1), padding=((1, 1), (1, 1)),
        dimension_numbers=("NCHW", "OIHW", "NCHW"),
        precision=jax.lax.Precision.HIGHEST)
    return y + b.reshape(1, -1, 1, 1)


def _ref_instnorm(x):
    mean = jnp.mean(x, axis=(2, 3), keepdims=True)
    var = jnp.mean((x - mean) ** 2, axis=(2, 3), keepdims=True)
    return (x - mean) / jnp.sqrt(var + 1e-5)


def _ref_aad(h, za, zid, p):
    hk = _ref_instnorm(h)
    g_att = _ref_conv3x3(za, p["conv1_w"], p["conv1_b"])
    b_att = _ref_conv3x3(za, p["conv2_w"], p["conv2_b"])
    a = hk * g_att + b_att
    m = jax.nn.sigmoid(_ref_conv3x3(hk, p["convs_w"], p["convs_b"]))
    z = zid.reshape(zid.shape[0], -1)
    hi = jax.lax.Precision.HIGHEST
    g_id = (jnp.dot(z, p["lin1_w"].T, precision=hi) + p["lin1_b"])[:, :, None, None]
    b_id = (jnp.dot(z, p["lin2_w"].T, precision=hi) + p["lin2_b"])[:, :, None, None]
    i = hk * g_id + b_id
    return (1.0 - m) * a + m * i


def _ref_resblk(h, za, zid, p, cin, cout):
    x1 = _ref_conv3x3(jax.nn.relu(_ref_aad(h, za, zid, p["AAD_1"])),
                      p["rc1_w"], p["rc1_b"])
    x2 = _ref_conv3x3(jax.nn.relu(_ref_aad(x1, za, zid, p["AAD_2"])),
                      p["rc2_w"], p["rc2_b"])
    if cin != cout:
        x3 = _ref_conv3x3(jax.nn.relu(_ref_aad(h, za, zid, p["AAD_3"])),
                          p["rc3_w"], p["rc3_b"])
        return x3 + x2
    return h + x2


# ------------------------------------ main -----------------------------------

if __name__ == "__main__":
    in_channels, out_channels, att_channels = 4, 8, 4
    N, H, W = 2, 16, 16

    key = jax.random.PRNGKey(0)
    k_p, k_h, k_a, k_z = jax.random.split(key, 4)

    params = make_resblk_params(k_p, in_channels, out_channels, att_channels)

    H_in = jax.random.normal(k_h, (N, in_channels, H, W), dtype=jnp.float32)
    Z_aat = jax.random.normal(k_a, (N, att_channels, H, W), dtype=jnp.float32)
    Z_id = jax.random.normal(k_z, (N, 512, 1, 1), dtype=jnp.float32)

    fwd = jax.jit(functools.partial(aad_resblk_forward,
                                    in_channels=in_channels,
                                    out_channels=out_channels))
    out = jax.block_until_ready(fwd(H_in, Z_aat, Z_id, params))
    assert out.shape == (N, out_channels, H, W)

    ref = _ref_resblk(H_in, Z_aat, Z_id, params, in_channels, out_channels)
    max_err = float(jnp.max(jnp.abs(out - ref)))
    # bf16 MXU operands (f32 accumulation) -> slightly looser tolerance.
    assert jnp.allclose(out, ref, atol=3e-2, rtol=3e-2), max_err

    print("KERNEL_OK")
</pallas_src>

<mosaic_0001>
module attributes {stable_mosaic.version = 11 : i64} {
  func.func @kernel(%arg0: i32, %arg1: memref<1x4x512xf32, #tpu.memory_space<vmem>>, %arg2: memref<1x4x512xf32, #tpu.memory_space<vmem>>, %arg3: memref<1x1x512xf32, #tpu.memory_space<vmem>>, %arg4: memref<1x384xf32, #tpu.memory_space<vmem>>, %arg5: memref<32x36xbf16, #tpu.memory_space<vmem>>, %arg6: memref<32x1xf32, #tpu.memory_space<vmem>>, %arg7: memref<32x512xf32, #tpu.memory_space<vmem>>, %arg8: memref<32x1xf32, #tpu.memory_space<vmem>>, %arg9: memref<3x72xbf16, #tpu.memory_space<vmem>>, %arg10: memref<3x1xf32, #tpu.memory_space<vmem>>, %arg11: memref<24x72xbf16, #tpu.memory_space<vmem>>, %arg12: memref<24x1xf32, #tpu.memory_space<vmem>>, %arg13: memref<1x8x384xf32, #tpu.memory_space<vmem>>, %arg14: memref<8x512xf32, #tpu.memory_space<vmem>>, %arg15: memref<72x384xf32, #tpu.memory_space<vmem>>, %arg16: memref<32x384xf32, #tpu.memory_space<vmem>>) attributes {dimension_semantics = [#tpu.dimension_semantics<parallel>], iteration_bounds = array<i64: 2>, scalar_prefetch = 0 : i64, scratch_operands = 3 : i64, tpu.core_type = #tpu.core_type<tc>, window_params = [{transform_indices = @transform_0, window_bounds = array<i64: 1, 4, 512>}, {transform_indices = @transform_1, window_bounds = array<i64: 1, 4, 512>}, {transform_indices = @transform_2, window_bounds = array<i64: 1, 1, 512>}, {pipeline_mode = #tpu.pipeline_mode<synchronous>, transform_indices = @transform_3, window_bounds = array<i64: 1, 384>}, {pipeline_mode = #tpu.pipeline_mode<synchronous>, transform_indices = @transform_4, window_bounds = array<i64: 32, 36>}, {pipeline_mode = #tpu.pipeline_mode<synchronous>, transform_indices = @transform_5, window_bounds = array<i64: 32, 1>}, {pipeline_mode = #tpu.pipeline_mode<synchronous>, transform_indices = @transform_6, window_bounds = array<i64: 32, 512>}, {pipeline_mode = #tpu.pipeline_mode<synchronous>, transform_indices = @transform_7, window_bounds = array<i64: 32, 1>}, {pipeline_mode = #tpu.pipeline_mode<synchronous>, transform_indices = @transform_8, window_bounds = array<i64: 3, 72>}, {pipeline_mode = #tpu.pipeline_mode<synchronous>, transform_indices = @transform_9, window_bounds = array<i64: 3, 1>}, {pipeline_mode = #tpu.pipeline_mode<synchronous>, transform_indices = @transform_10, window_bounds = array<i64: 24, 72>}, {pipeline_mode = #tpu.pipeline_mode<synchronous>, transform_indices = @transform_11, window_bounds = array<i64: 24, 1>}, {transform_indices = @transform_12, window_bounds = array<i64: 1, 8, 384>}]} {
    %cst = arith.constant 0.000000e+00 : f32
    %0 = vector.broadcast %cst : f32 to vector<8x19xf32>
    %c0 = arith.constant 0 : index
    %c13 = arith.constant 13 : index
    %1 = vector.load %arg14[%c0, %c13] : memref<8x512xf32, #tpu.memory_space<vmem>>, vector<8x19xf32>
    tpu.vector_store %arg14[%c0, %c13], %0 {strides = array<i32>} : memref<8x512xf32, #tpu.memory_space<vmem>>, vector<8x19xf32>,
    %c0_0 = arith.constant 0 : index
    %c416 = arith.constant 416 : index
    %2 = vector.load %arg14[%c0_0, %c416] : memref<8x512xf32, #tpu.memory_space<vmem>>, vector<8x19xf32>
    tpu.vector_store %arg14[%c0_0, %c416], %0 {strides = array<i32>} : memref<8x512xf32, #tpu.memory_space<vmem>>, vector<8x19xf32>,
    %c0_1 = arith.constant 0 : index
    %c0_2 = arith.constant 0 : index
    %3 = vector.load %arg4[%c0_1, %c0_2] : memref<1x384xf32, #tpu.memory_space<vmem>>, vector<1x384xf32>
    %c0_3 = arith.constant 0 : index
    %c0_4 = arith.constant 0 : index
    %c0_5 = arith.constant 0 : index
    %4 = vector.load %arg3[%c0_3, %c0_4, %c0_5] : memref<1x1x512xf32, #tpu.memory_space<vmem>>, vector<1x1x512xf32>
    %5 = vector.shape_cast %4 : vector<1x1x512xf32> to vector<1x512xf32>
    %c0_6 = arith.constant 0 : index
    %c0_7 = arith.constant 0 : index
    %c13_8 = arith.constant 13 : index
    %6 = vector.load %arg2[%c0_6, %c0_7, %c13_8] : memref<1x4x512xf32, #tpu.memory_space<vmem>>, vector<1x4x384xf32>
    %7 = vector.shape_cast %6 : vector<1x4x384xf32> to vector<4x384xf32>
    %c0_9 = arith.constant 0 : index
    %c0_10 = arith.constant 0 : index
    %8 = vector.load %arg15[%c0_9, %c0_10] : memref<72x384xf32, #tpu.memory_space<vmem>>, vector<4x384xf32>
    tpu.vector_store %arg15[%c0_9, %c0_10], %7 {strides = array<i32>} : memref<72x384xf32, #tpu.memory_space<vmem>>, vector<4x384xf32>,
    %c0_11 = arith.constant 0 : index
    %c0_12 = arith.constant 0 : index
    %c14 = arith.constant 14 : index
    %9 = vector.load %arg2[%c0_11, %c0_12, %c14] : memref<1x4x512xf32, #tpu.memory_space<vmem>>, vector<1x4x384xf32>
    %10 = vector.shape_cast %9 : vector<1x4x384xf32> to vector<4x384xf32>
    %c4 = arith.constant 4 : index
    %c0_13 = arith.constant 0 : index
    %11 = vector.load %arg15[%c4, %c0_13] : memref<72x384xf32, #tpu.memory_space<vmem>>, vector<4x384xf32>
    tpu.vector_store %arg15[%c4, %c0_13], %10 {strides = array<i32>} : memref<72x384xf32, #tpu.memory_space<vmem>>, vector<4x384xf32>,
    %c0_14 = arith.constant 0 : index
    %c0_15 = arith.constant 0 : index
    %c15 = arith.constant 15 : index
    %12 = vector.load %arg2[%c0_14, %c0_15, %c15] : memref<1x4x512xf32, #tpu.memory_space<vmem>>, vector<1x4x384xf32>
    %13 = vector.shape_cast %12 : vector<1x4x384xf32> to vector<4x384xf32>
    %c8 = arith.constant 8 : index
    %c0_16 = arith.constant 0 : index
    %14 = vector.load %arg15[%c8, %c0_16] : memref<72x384xf32, #tpu.memory_space<vmem>>, vector<4x384xf32>
    tpu.vector_store %arg15[%c8, %c0_16], %13 {strides = array<i32>} : memref<72x384xf32, #tpu.memory_space<vmem>>, vector<4x384xf32>,
    %c0_17 = arith.constant 0 : index
    %c0_18 = arith.constant 0 : index
    %c31 = arith.constant 31 : index
    %15 = vector.load %arg2[%c0_17, %c0_18, %c31] : memref<1x4x512xf32, #tpu.memory_space<vmem>>, vector<1x4x384xf32>
    %16 = vector.shape_cast %15 : vector<1x4x384xf32> to vector<4x384xf32>
    %c12 = arith.constant 12 : index
    %c0_19 = arith.constant 0 : index
    %17 = vector.load %arg15[%c12, %c0_19] : memref<72x384xf32, #tpu.memory_space<vmem>>, vector<4x384xf32>
    tpu.vector_store %arg15[%c12, %c0_19], %16 {strides = array<i32>} : memref<72x384xf32, #tpu.memory_space<vmem>>, vector<4x384xf32>,
    %c0_20 = arith.constant 0 : index
    %c0_21 = arith.constant 0 : index
    %c32 = arith.constant 32 : index
    %18 = vector.load %arg2[%c0_20, %c0_21, %c32] : memref<1x4x512xf32, #tpu.memory_space<vmem>>, vector<1x4x384xf32>
    %19 = vector.shape_cast %18 : vector<1x4x384xf32> to vector<4x384xf32>
    %c16 = arith.constant 16 : index
    %c0_22 = arith.constant 0 : index
    %20 = vector.load %arg15[%c16, %c0_22] : memref<72x384xf32, #tpu.memory_space<vmem>>, vector<4x384xf32>
    tpu.vector_store %arg15[%c16, %c0_22], %19 {strides = array<i32>} : memref<72x384xf32, #tpu.memory_space<vmem>>, vector<4x384xf32>,
    %c0_23 = arith.constant 0 : index
    %c0_24 = arith.constant 0 : index
    %c33 = arith.constant 33 : index
    %21 = vector.load %arg2[%c0_23, %c0_24, %c33] : memref<1x4x512xf32, #tpu.memory_space<vmem>>, vector<1x4x384xf32>
    %22 = vector.shape_cast %21 : vector<1x4x384xf32> to vector<4x384xf32>
    %c20 = arith.constant 20 : index
    %c0_25 = arith.constant 0 : index
    %23 = vector.load %arg15[%c20, %c0_25] : memref<72x384xf32, #tpu.memory_space<vmem>>, vector<4x384xf32>
    tpu.vector_store %arg15[%c20, %c0_25], %22 {strides = array<i32>} : memref<72x384xf32, #tpu.memory_space<vmem>>, vector<4x384xf32>,
    %c0_26 = arith.constant 0 : index
    %c0_27 = arith.constant 0 : index
    %c49 = arith.constant 49 : index
    %24 = vector.load %arg2[%c0_26, %c0_27, %c49] : memref<1x4x512xf32, #tpu.memory_space<vmem>>, vector<1x4x384xf32>
    %25 = vector.shape_cast %24 : vector<1x4x384xf32> to vector<4x384xf32>
    %c24 = arith.constant 24 : index
    %c0_28 = arith.constant 0 : index
    %26 = vector.load %arg15[%c24, %c0_28] : memref<72x384xf32, #tpu.memory_space<vmem>>, vector<4x384xf32>
    tpu.vector_store %arg15[%c24, %c0_28], %25 {strides = array<i32>} : memref<72x384xf32, #tpu.memory_space<vmem>>, vector<4x384xf32>,
    %c0_29 = arith.constant 0 : index
    %c0_30 = arith.constant 0 : index
    %c50 = arith.constant 50 : index
    %27 = vector.load %arg2[%c0_29, %c0_30, %c50] : memref<1x4x512xf32, #tpu.memory_space<vmem>>, vector<1x4x384xf32>
    %28 = vector.shape_cast %27 : vector<1x4x384xf32> to vector<4x384xf32>
    %c28 = arith.constant 28 : index
    %c0_31 = arith.constant 0 : index
    %29 = vector.load %arg15[%c28, %c0_31] : memref<72x384xf32, #tpu.memory_space<vmem>>, vector<4x384xf32>
    tpu.vector_store %arg15[%c28, %c0_31], %28 {strides = array<i32>} : memref<72x384xf32, #tpu.memory_space<vmem>>, vector<4x384xf32>,
    %c0_32 = arith.constant 0 : index
    %c0_33 = arith.constant 0 : index
    %c51 = arith.constant 51 : index
    %30 = vector.load %arg2[%c0_32, %c0_33, %c51] : memref<1x4x512xf32, #tpu.memory_space<vmem>>, vector<1x4x384xf32>
    %31 = vector.shape_cast %30 : vector<1x4x384xf32> to vector<4x384xf32>
    %c32_34 = arith.constant 32 : index
    %c0_35 = arith.constant 0 : index
    %32 = vector.load %arg15[%c32_34, %c0_35] : memref<72x384xf32, #tpu.memory_space<vmem>>, vector<4x384xf32>
    tpu.vector_store %arg15[%c32_34, %c0_35], %31 {strides = array<i32>} : memref<72x384xf32, #tpu.memory_space<vmem>>, vector<4x384xf32>,
    %c0_36 = arith.constant 0 : index
    %c0_37 = arith.constant 0 : index
    %33 = vector.load %arg15[%c0_36, %c0_37] : memref<72x384xf32, #tpu.memory_space<vmem>>, vector<36x384xf32>
    %34 = arith.truncf %33 : vector<36x384xf32> to vector<36x384xbf16>
    %c0_38 = arith.constant 0 : index
    %c0_39 = arith.constant 0 : index
    %35 = vector.load %arg5[%c0_38, %c0_39] : memref<32x36xbf16, #tpu.memory_space<vmem>>, vector<32x36xbf16>
    %cst_40 = arith.constant dense<0.000000e+00> : vector<32x384xf32>
    %36 = tpu.matmul %35, %34, %cst_40 {dimension_numbers = #tpu.dot_dimension_numbers<[1], [0], [0], [1], [0, 0, 1, 1], [], []>} : vector<32x36xbf16>, vector<36x384xbf16>, vector<32x384xf32> -> vector<32x384xf32>
    %c0_41 = arith.constant 0 : index
    %c0_42 = arith.constant 0 : index
    %37 = vector.load %arg6[%c0_41, %c0_42] : memref<32x1xf32, #tpu.memory_space<vmem>>, vector<32x1xf32>
    %38 = vector.broadcast %37 : vector<32x1xf32> to vector<32x384xf32>
    %39 = arith.addf %36, %38 : vector<32x384xf32>
    %c0_43 = arith.constant 0 : index
    %c0_44 = arith.constant 0 : index
    %40 = vector.load %arg16[%c0_43, %c0_44] : memref<32x384xf32, #tpu.memory_space<vmem>>, vector<32x384xf32>
    tpu.vector_store %arg16[%c0_43, %c0_44], %39 {strides = array<i32>} : memref<32x384xf32, #tpu.memory_space<vmem>>, vector<32x384xf32>,
    %c0_45 = arith.constant 0 : index
    %c0_46 = arith.constant 0 : index
    %41 = vector.load %arg7[%c0_45, %c0_46] : memref<32x512xf32, #tpu.memory_space<vmem>>, vector<32x512xf32>
    %42 = vector.broadcast %5 : vector<1x512xf32> to vector<32x512xf32>
    %43 = arith.mulf %41, %42 : vector<32x512xf32>
    %cst_47 = arith.constant dense<0.000000e+00> : vector<32xf32>
    %44 = vector.multi_reduction <add>, %43, %cst_47 [1] : vector<32x512xf32> to vector<32xf32>
    %45 = vector.shape_cast %44 : vector<32xf32> to vector<32x1xf32>
    %c0_48 = arith.constant 0 : index
    %c0_49 = arith.constant 0 : index
    %46 = vector.load %arg8[%c0_48, %c0_49] : memref<32x1xf32, #tpu.memory_space<vmem>>, vector<32x1xf32>
    %47 = arith.addf %45, %46 : vector<32x1xf32>
    %c0_50 = arith.constant 0 : index
    %c0_51 = arith.constant 0 : index
    %c32_52 = arith.constant 32 : index
    %48 = vector.load %arg1[%c0_50, %c0_51, %c32_52] : memref<1x4x512xf32, #tpu.memory_space<vmem>>, vector<1x4x384xf32>
    %49 = vector.shape_cast %48 : vector<1x4x384xf32> to vector<4x384xf32>
    %cst_53 = arith.constant dense<0.000000e+00> : vector<4xf32>
    %50 = vector.multi_reduction <add>, %49, %cst_53 [1] : vector<4x384xf32> to vector<4xf32>
    %51 = vector.shape_cast %50 : vector<4xf32> to vector<4x1xf32>
    %cst_54 = arith.constant 3.906250e-03 : f32
    %52 = vector.broadcast %cst_54 : f32 to vector<4x1xf32>
    %53 = arith.mulf %51, %52 : vector<4x1xf32>
    %54 = vector.broadcast %53 : vector<4x1xf32> to vector<4x384xf32>
    %55 = arith.subf %49, %54 : vector<4x384xf32>
    %56 = vector.broadcast %3 : vector<1x384xf32> to vector<4x384xf32>
    %57 = arith.mulf %55, %56 : vector<4x384xf32>
    %58 = arith.mulf %57, %57 : vector<4x384xf32>
    %cst_55 = arith.constant dense<0.000000e+00> : vector<4xf32>
    %59 = vector.multi_reduction <add>, %58, %cst_55 [1] : vector<4x384xf32> to vector<4xf32>
    %60 = vector.shape_cast %59 : vector<4xf32> to vector<4x1xf32>
    %cst_56 = arith.constant 3.906250e-03 : f32
    %61 = vector.broadcast %cst_56 : f32 to vector<4x1xf32>
    %62 = arith.mulf %60, %61 : vector<4x1xf32>
    %cst_57 = arith.constant 9.99999974E-6 : f32
    %63 = vector.broadcast %cst_57 : f32 to vector<4x1xf32>
    %64 = arith.addf %62, %63 : vector<4x1xf32>
    %65 = math.rsqrt %64 : vector<4x1xf32>
    %66 = vector.broadcast %65 : vector<4x1xf32> to vector<4x384xf32>
    %67 = arith.mulf %57, %66 : vector<4x384xf32>
    %c0_58 = arith.constant 0 : index
    %c32_59 = arith.constant 32 : index
    %68 = vector.load %arg14[%c0_58, %c32_59] : memref<8x512xf32, #tpu.memory_space<vmem>>, vector<4x384xf32>
    tpu.vector_store %arg14[%c0_58, %c32_59], %67 {strides = array<i32>} : memref<8x512xf32, #tpu.memory_space<vmem>>, vector<4x384xf32>,
    %c0_60 = arith.constant 0 : index
    %c13_61 = arith.constant 13 : index
    %69 = vector.load %arg14[%c0_60, %c13_61] : memref<8x512xf32, #tpu.memory_space<vmem>>, vector<4x384xf32>
    %c0_62 = arith.constant 0 : index
    %c0_63 = arith.constant 0 : index
    %70 = vector.load %arg15[%c0_62, %c0_63] : memref<72x384xf32, #tpu.memory_space<vmem>>, vector<4x384xf32>
    tpu.vector_store %arg15[%c0_62, %c0_63], %69 {strides = array<i32>} : memref<72x384xf32, #tpu.memory_space<vmem>>, vector<4x384xf32>,
    %c0_64 = arith.constant 0 : index
    %c14_65 = arith.constant 14 : index
    %71 = vector.load %arg14[%c0_64, %c14_65] : memref<8x512xf32, #tpu.memory_space<vmem>>, vector<4x384xf32>
    %c4_66 = arith.constant 4 : index
    %c0_67 = arith.constant 0 : index
    %72 = vector.load %arg15[%c4_66, %c0_67] : memref<72x384xf32, #tpu.memory_space<vmem>>, vector<4x384xf32>
    tpu.vector_store %arg15[%c4_66, %c0_67], %71 {strides = array<i32>} : memref<72x384xf32, #tpu.memory_space<vmem>>, vector<4x384xf32>,
    %c0_68 = arith.constant 0 : index
    %c15_69 = arith.constant 15 : index
    %73 = vector.load %arg14[%c0_68, %c15_69] : memref<8x512xf32, #tpu.memory_space<vmem>>, vector<4x384xf32>
    %c8_70 = arith.constant 8 : index
    %c0_71 = arith.constant 0 : index
    %74 = vector.load %arg15[%c8_70, %c0_71] : memref<72x384xf32, #tpu.memory_space<vmem>>, vector<4x384xf32>
    tpu.vector_store %arg15[%c8_70, %c0_71], %73 {strides = array<i32>} : memref<72x384xf32, #tpu.memory_space<vmem>>, vector<4x384xf32>,
    %c0_72 = arith.constant 0 : index
    %c31_73 = arith.constant 31 : index
    %75 = vector.load %arg14[%c0_72, %c31_73] : memref<8x512xf32, #tpu.memory_space<vmem>>, vector<4x384xf32>
    %c12_74 = arith.constant 12 : index
    %c0_75 = arith.constant 0 : index
    %76 = vector.load %arg15[%c12_74, %c0_75] : memref<72x384xf32, #tpu.memory_space<vmem>>, vector<4x384xf32>
    tpu.vector_store %arg15[%c12_74, %c0_75], %75 {strides = array<i32>} : memref<72x384xf32, #tpu.memory_space<vmem>>, vector<4x384xf32>,
    %c0_76 = arith.constant 0 : index
    %c32_77 = arith.constant 32 : index
    %77 = vector.load %arg14[%c0_76, %c32_77] : memref<8x512xf32, #tpu.memory_space<vmem>>, vector<4x384xf32>
    %c16_78 = arith.constant 16 : index
    %c0_79 = arith.constant 0 : index
    %78 = vector.load %arg15[%c16_78, %c0_79] : memref<72x384xf32, #tpu.memory_space<vmem>>, vector<4x384xf32>
    tpu.vector_store %arg15[%c16_78, %c0_79], %77 {strides = array<i32>} : memref<72x384xf32, #tpu.memory_space<vmem>>, vector<4x384xf32>,
    %c0_80 = arith.constant 0 : index
    %c33_81 = arith.constant 33 : index
    %79 = vector.load %arg14[%c0_80, %c33_81] : memref<8x512xf32, #tpu.memory_space<vmem>>, vector<4x384xf32>
    %c20_82 = arith.constant 20 : index
    %c0_83 = arith.constant 0 : index
    %80 = vector.load %arg15[%c20_82, %c0_83] : memref<72x384xf32, #tpu.memory_space<vmem>>, vector<4x384xf32>
    tpu.vector_store %arg15[%c20_82, %c0_83], %79 {strides = array<i32>} : memref<72x384xf32, #tpu.memory_space<vmem>>, vector<4x384xf32>,
    %c0_84 = arith.constant 0 : index
    %c49_85 = arith.constant 49 : index
    %81 = vector.load %arg14[%c0_84, %c49_85] : memref<8x512xf32, #tpu.memory_space<vmem>>, vector<4x384xf32>
    %c24_86 = arith.constant 24 : index
    %c0_87 = arith.constant 0 : index
    %82 = vector.load %arg15[%c24_86, %c0_87] : memref<72x384xf32, #tpu.memory_space<vmem>>, vector<4x384xf32>
    tpu.vector_store %arg15[%c24_86, %c0_87], %81 {strides = array<i32>} : memref<72x384xf32, #tpu.memory_space<vmem>>, vector<4x384xf32>,
    %c0_88 = arith.constant 0 : index
    %c50_89 = arith.constant 50 : index
    %83 = vector.load %arg14[%c0_88, %c50_89] : memref<8x512xf32, #tpu.memory_space<vmem>>, vector<4x384xf32>
    %c28_90 = arith.constant 28 : index
    %c0_91 = arith.constant 0 : index
    %84 = vector.load %arg15[%c28_90, %c0_91] : memref<72x384xf32, #tpu.memory_space<vmem>>, vector<4x384xf32>
    tpu.vector_store %arg15[%c28_90, %c0_91], %83 {strides = array<i32>} : memref<72x384xf32, #tpu.memory_space<vmem>>, vector<4x384xf32>,
    %c0_92 = arith.constant 0 : index
    %c51_93 = arith.constant 51 : index
    %85 = vector.load %arg14[%c0_92, %c51_93] : memref<8x512xf32, #tpu.memory_space<vmem>>, vector<4x384xf32>
    %c32_94 = arith.constant 32 : index
    %c0_95 = arith.constant 0 : index
    %86 = vector.load %arg15[%c32_94, %c0_95] : memref<72x384xf32, #tpu.memory_space<vmem>>, vector<4x384xf32>
    tpu.vector_store %arg15[%c32_94, %c0_95], %85 {strides = array<i32>} : memref<72x384xf32, #tpu.memory_space<vmem>>, vector<4x384xf32>,
    %c0_96 = arith.constant 0 : index
    %c0_97 = arith.constant 0 : index
    %87 = vector.load %arg15[%c0_96, %c0_97] : memref<72x384xf32, #tpu.memory_space<vmem>>, vector<36x384xf32>
    %88 = arith.truncf %87 : vector<36x384xf32> to vector<36x384xbf16>
    %c0_98 = arith.constant 0 : index
    %c0_99 = arith.constant 0 : index
    %89 = vector.load %arg9[%c0_98, %c0_99] : memref<3x72xbf16, #tpu.memory_space<vmem>>, vector<1x36xbf16>
    %cst_100 = arith.constant dense<0.000000e+00> : vector<1x384xf32>
    %90 = tpu.matmul %89, %88, %cst_100 {dimension_numbers = #tpu.dot_dimension_numbers<[1], [0], [0], [1], [0, 0, 1, 1], [], []>} : vector<1x36xbf16>, vector<36x384xbf16>, vector<1x384xf32> -> vector<1x384xf32>
    %c0_101 = arith.constant 0 : index
    %c0_102 = arith.constant 0 : index
    %91 = vector.load %arg10[%c0_101, %c0_102] : memref<3x1xf32, #tpu.memory_space<vmem>>, vector<1x1xf32>
    %92 = vector.broadcast %91 : vector<1x1xf32> to vector<1x384xf32>
    %93 = arith.addf %90, %92 : vector<1x384xf32>
    %94 = arith.negf %93 : vector<1x384xf32>
    %95 = math.exp %94 : vector<1x384xf32>
    %cst_103 = arith.constant 1.000000e+00 : f32
    %96 = vector.broadcast %cst_103 : f32 to vector<1x384xf32>
    %97 = arith.addf %96, %95 : vector<1x384xf32>
    %98 = arith.divf %96, %97 : vector<1x384xf32>
    %c0_104 = arith.constant 0 : index
    %c0_105 = arith.constant 0 : index
    %99 = vector.load %arg16[%c0_104, %c0_105] : memref<32x384xf32, #tpu.memory_space<vmem>>, vector<4x384xf32>
    %c4_106 = arith.constant 4 : index
    %c0_107 = arith.constant 0 : index
    %100 = vector.load %arg16[%c4_106, %c0_107] : memref<32x384xf32, #tpu.memory_space<vmem>>, vector<4x384xf32>
    %101 = vector.extract_strided_slice %47 {offsets = [0, 0], sizes = [4, 1], strides = [1, 1]} : vector<32x1xf32> to vector<4x1xf32>
    %102 = vector.extract_strided_slice %47 {offsets = [4, 0], sizes = [4, 1], strides = [1, 1]} : vector<32x1xf32> to vector<4x1xf32>
    %103 = arith.mulf %67, %99 : vector<4x384xf32>
    %104 = arith.addf %103, %100 : vector<4x384xf32>
    %105 = vector.broadcast %101 : vector<4x1xf32> to vector<4x384xf32>
    %106 = arith.mulf %67, %105 : vector<4x384xf32>
    %107 = vector.broadcast %102 : vector<4x1xf32> to vector<4x384xf32>
    %108 = arith.addf %106, %107 : vector<4x384xf32>
    %cst_108 = arith.constant 1.000000e+00 : f32
    %109 = vector.broadcast %cst_108 : f32 to vector<1x384xf32>
    %110 = arith.subf %109, %98 : vector<1x384xf32>
    %111 = vector.broadcast %110 : vector<1x384xf32> to vector<4x384xf32>
    %112 = arith.mulf %111, %104 : vector<4x384xf32>
    %113 = vector.broadcast %98 : vector<1x384xf32> to vector<4x384xf32>
    %114 = arith.mulf %113, %108 : vector<4x384xf32>
    %115 = arith.addf %112, %114 : vector<4x384xf32>
    %cst_109 = arith.constant 0.000000e+00 : f32
    %116 = vector.broadcast %cst_109 : f32 to vector<4x384xf32>
    %117 = arith.maximumf %115, %116 : vector<4x384xf32>
    %118 = vector.broadcast %3 : vector<1x384xf32> to vector<4x384xf32>
    %119 = arith.mulf %117, %118 : vector<4x384xf32>
    %c0_110 = arith.constant 0 : index
    %c32_111 = arith.constant 32 : index
    %120 = vector.load %arg14[%c0_110, %c32_111] : memref<8x512xf32, #tpu.memory_space<vmem>>, vector<4x384xf32>
    tpu.vector_store %arg14[%c0_110, %c32_111], %119 {strides = array<i32>} : memref<8x512xf32, #tpu.memory_space<vmem>>, vector<4x384xf32>,
    %c0_112 = arith.constant 0 : index
    %c13_113 = arith.constant 13 : index
    %121 = vector.load %arg14[%c0_112, %c13_113] : memref<8x512xf32, #tpu.memory_space<vmem>>, vector<4x384xf32>
    %c0_114 = arith.constant 0 : index
    %c0_115 = arith.constant 0 : index
    %122 = vector.load %arg15[%c0_114, %c0_115] : memref<72x384xf32, #tpu.memory_space<vmem>>, vector<4x384xf32>
    tpu.vector_store %arg15[%c0_114, %c0_115], %121 {strides = array<i32>} : memref<72x384xf32, #tpu.memory_space<vmem>>, vector<4x384xf32>,
    %c0_116 = arith.constant 0 : index
    %c14_117 = arith.constant 14 : index
    %123 = vector.load %arg14[%c0_116, %c14_117] : memref<8x512xf32, #tpu.memory_space<vmem>>, vector<4x384xf32>
    %c4_118 = arith.constant 4 : index
    %c0_119 = arith.constant 0 : index
    %124 = vector.load %arg15[%c4_118, %c0_119] : memref<72x384xf32, #tpu.memory_space<vmem>>, vector<4x384xf32>
    tpu.vector_store %arg15[%c4_118, %c0_119], %123 {strides = array<i32>} : memref<72x384xf32, #tpu.memory_space<vmem>>, vector<4x384xf32>,
    %c0_120 = arith.constant 0 : index
    %c15_121 = arith.constant 15 : index
    %125 = vector.load %arg14[%c0_120, %c15_121] : memref<8x512xf32, #tpu.memory_space<vmem>>, vector<4x384xf32>
    %c8_122 = arith.constant 8 : index
    %c0_123 = arith.constant 0 : index
    %126 = vector.load %arg15[%c8_122, %c0_123] : memref<72x384xf32, #tpu.memory_space<vmem>>, vector<4x384xf32>
    tpu.vector_store %arg15[%c8_122, %c0_123], %125 {strides = array<i32>} : memref<72x384xf32, #tpu.memory_space<vmem>>, vector<4x384xf32>,
    %c0_124 = arith.constant 0 : index
    %c31_125 = arith.constant 31 : index
    %127 = vector.load %arg14[%c0_124, %c31_125] : memref<8x512xf32, #tpu.memory_space<vmem>>, vector<4x384xf32>
    %c12_126 = arith.constant 12 : index
    %c0_127 = arith.constant 0 : index
    %128 = vector.load %arg15[%c12_126, %c0_127] : memref<72x384xf32, #tpu.memory_space<vmem>>, vector<4x384xf32>
    tpu.vector_store %arg15[%c12_126, %c0_127], %127 {strides = array<i32>} : memref<72x384xf32, #tpu.memory_space<vmem>>, vector<4x384xf32>,
    %c0_128 = arith.constant 0 : index
    %c32_129 = arith.constant 32 : index
    %129 = vector.load %arg14[%c0_128, %c32_129] : memref<8x512xf32, #tpu.memory_space<vmem>>, vector<4x384xf32>
    %c16_130 = arith.constant 16 : index
    %c0_131 = arith.constant 0 : index
    %130 = vector.load %arg15[%c16_130, %c0_131] : memref<72x384xf32, #tpu.memory_space<vmem>>, vector<4x384xf32>
    tpu.vector_store %arg15[%c16_130, %c0_131], %129 {strides = array<i32>} : memref<72x384xf32, #tpu.memory_space<vmem>>, vector<4x384xf32>,
    %c0_132 = arith.constant 0 : index
    %c33_133 = arith.constant 33 : index
    %131 = vector.load %arg14[%c0_132, %c33_133] : memref<8x512xf32, #tpu.memory_space<vmem>>, vector<4x384xf32>
    %c20_134 = arith.constant 20 : index
    %c0_135 = arith.constant 0 : index
    %132 = vector.load %arg15[%c20_134, %c0_135] : memref<72x384xf32, #tpu.memory_space<vmem>>, vector<4x384xf32>
    tpu.vector_store %arg15[%c20_134, %c0_135], %131 {strides = array<i32>} : memref<72x384xf32, #tpu.memory_space<vmem>>, vector<4x384xf32>,
    %c0_136 = arith.constant 0 : index
    %c49_137 = arith.constant 49 : index
    %133 = vector.load %arg14[%c0_136, %c49_137] : memref<8x512xf32, #tpu.memory_space<vmem>>, vector<4x384xf32>
    %c24_138 = arith.constant 24 : index
    %c0_139 = arith.constant 0 : index
    %134 = vector.load %arg15[%c24_138, %c0_139] : memref<72x384xf32, #tpu.memory_space<vmem>>, vector<4x384xf32>
    tpu.vector_store %arg15[%c24_138, %c0_139], %133 {strides = array<i32>} : memref<72x384xf32, #tpu.memory_space<vmem>>, vector<4x384xf32>,
    %c0_140 = arith.constant 0 : index
    %c50_141 = arith.constant 50 : index
    %135 = vector.load %arg14[%c0_140, %c50_141] : memref<8x512xf32, #tpu.memory_space<vmem>>, vector<4x384xf32>
    %c28_142 = arith.constant 28 : index
    %c0_143 = arith.constant 0 : index
    %136 = vector.load %arg15[%c28_142, %c0_143] : memref<72x384xf32, #tpu.memory_space<vmem>>, vector<4x384xf32>
    tpu.vector_store %arg15[%c28_142, %c0_143], %135 {strides = array<i32>} : memref<72x384xf32, #tpu.memory_space<vmem>>, vector<4x384xf32>,
    %c0_144 = arith.constant 0 : index
    %c51_145 = arith.constant 51 : index
    %137 = vector.load %arg14[%c0_144, %c51_145] : memref<8x512xf32, #tpu.memory_space<vmem>>, vector<4x384xf32>
    %c32_146 = arith.constant 32 : index
    %c0_147 = arith.constant 0 : index
    %138 = vector.load %arg15[%c32_146, %c0_147] : memref<72x384xf32, #tpu.memory_space<vmem>>, vector<4x384xf32>
    tpu.vector_store %arg15[%c32_146, %c0_147], %137 {strides = array<i32>} : memref<72x384xf32, #tpu.memory_space<vmem>>, vector<4x384xf32>,
    %c0_148 = arith.constant 0 : index
    %c0_149 = arith.constant 0 : index
    %139 = vector.load %arg15[%c0_148, %c0_149] : memref<72x384xf32, #tpu.memory_space<vmem>>, vector<36x384xf32>
    %140 = arith.truncf %139 : vector<36x384xf32> to vector<36x384xbf16>
    %c0_150 = arith.constant 0 : index
    %c0_151 = arith.constant 0 : index
    %141 = vector.load %arg11[%c0_150, %c0_151] : memref<24x72xbf16, #tpu.memory_space<vmem>>, vector<8x36xbf16>
    %cst_152 = arith.constant dense<0.000000e+00> : vector<8x384xf32>
    %142 = tpu.matmul %141, %140, %cst_152 {dimension_numbers = #tpu.dot_dimension_numbers<[1], [0], [0], [1], [0, 0, 1, 1], [], []>} : vector<8x36xbf16>, vector<36x384xbf16>, vector<8x384xf32> -> vector<8x384xf32>
    %c0_153 = arith.constant 0 : index
    %c0_154 = arith.constant 0 : index
    %143 = vector.load %arg12[%c0_153, %c0_154] : memref<24x1xf32, #tpu.memory_space<vmem>>, vector<8x1xf32>
    %144 = vector.broadcast %143 : vector<8x1xf32> to vector<8x384xf32>
    %145 = arith.addf %142, %144 : vector<8x384xf32>
    %146 = vector.broadcast %3 : vector<1x384xf32> to vector<8x384xf32>
    %147 = arith.mulf %145, %146 : vector<8x384xf32>
    %cst_155 = arith.constant dense<0.000000e+00> : vector<8xf32>
    %148 = vector.multi_reduction <add>, %147, %cst_155 [1] : vector<8x384xf32> to vector<8xf32>
    %149 = vector.shape_cast %148 : vector<8xf32> to vector<8x1xf32>
    %cst_156 = arith.constant 3.906250e-03 : f32
    %150 = vector.broadcast %cst_156 : f32 to vector<8x1xf32>
    %151 = arith.mulf %149, %150 : vector<8x1xf32>
    %152 = vector.broadcast %151 : vector<8x1xf32> to vector<8x384xf32>
    %153 = arith.subf %147, %152 : vector<8x384xf32>
    %154 = vector.broadcast %3 : vector<1x384xf32> to vector<8x384xf32>
    %155 = arith.mulf %153, %154 : vector<8x384xf32>
    %156 = arith.mulf %155, %155 : vector<8x384xf32>
    %cst_157 = arith.constant dense<0.000000e+00> : vector<8xf32>
    %157 = vector.multi_reduction <add>, %156, %cst_157 [1] : vector<8x384xf32> to vector<8xf32>
    %158 = vector.shape_cast %157 : vector<8xf32> to vector<8x1xf32>
    %cst_158 = arith.constant 3.906250e-03 : f32
    %159 = vector.broadcast %cst_158 : f32 to vector<8x1xf32>
    %160 = arith.mulf %158, %159 : vector<8x1xf32>
    %cst_159 = arith.constant 9.99999974E-6 : f32
    %161 = vector.broadcast %cst_159 : f32 to vector<8x1xf32>
    %162 = arith.addf %160, %161 : vector<8x1xf32>
    %163 = math.rsqrt %162 : vector<8x1xf32>
    %164 = vector.broadcast %163 : vector<8x1xf32> to vector<8x384xf32>
    %165 = arith.mulf %155, %164 : vector<8x384xf32>
    %c0_160 = arith.constant 0 : index
    %c32_161 = arith.constant 32 : index
    %166 = vector.load %arg14[%c0_160, %c32_161] : memref<8x512xf32, #tpu.memory_space<vmem>>, vector<8x384xf32>
    tpu.vector_store %arg14[%c0_160, %c32_161], %165 {strides = array<i32>} : memref<8x512xf32, #tpu.memory_space<vmem>>, vector<8x384xf32>,
    %c0_162 = arith.constant 0 : index
    %c13_163 = arith.constant 13 : index
    %167 = vector.load %arg14[%c0_162, %c13_163] : memref<8x512xf32, #tpu.memory_space<vmem>>, vector<8x384xf32>
    %c0_164 = arith.constant 0 : index
    %c0_165 = arith.constant 0 : index
    %168 = vector.load %arg15[%c0_164, %c0_165] : memref<72x384xf32, #tpu.memory_space<vmem>>, vector<8x384xf32>
    tpu.vector_store %arg15[%c0_164, %c0_165], %167 {strides = array<i32>} : memref<72x384xf32, #tpu.memory_space<vmem>>, vector<8x384xf32>,
    %c0_166 = arith.constant 0 : index
    %c14_167 = arith.constant 14 : index
    %169 = vector.load %arg14[%c0_166, %c14_167] : memref<8x512xf32, #tpu.memory_space<vmem>>, vector<8x384xf32>
    %c8_168 = arith.constant 8 : index
    %c0_169 = arith.constant 0 : index
    %170 = vector.load %arg15[%c8_168, %c0_169] : memref<72x384xf32, #tpu.memory_space<vmem>>, vector<8x384xf32>
    tpu.vector_store %arg15[%c8_168, %c0_169], %169 {strides = array<i32>} : memref<72x384xf32, #tpu.memory_space<vmem>>, vector<8x384xf32>,
    %c0_170 = arith.constant 0 : index
    %c15_171 = arith.constant 15 : index
    %171 = vector.load %arg14[%c0_170, %c15_171] : memref<8x512xf32, #tpu.memory_space<vmem>>, vector<8x384xf32>
    %c16_172 = arith.constant 16 : index
    %c0_173 = arith.constant 0 : index
    %172 = vector.load %arg15[%c16_172, %c0_173] : memref<72x384xf32, #tpu.memory_space<vmem>>, vector<8x384xf32>
    tpu.vector_store %arg15[%c16_172, %c0_173], %171 {strides = array<i32>} : memref<72x384xf32, #tpu.memory_space<vmem>>, vector<8x384xf32>,
    %c0_174 = arith.constant 0 : index
    %c31_175 = arith.constant 31 : index
    %173 = vector.load %arg14[%c0_174, %c31_175] : memref<8x512xf32, #tpu.memory_space<vmem>>, vector<8x384xf32>
    %c24_176 = arith.constant 24 : index
    %c0_177 = arith.constant 0 : index
    %174 = vector.load %arg15[%c24_176, %c0_177] : memref<72x384xf32, #tpu.memory_space<vmem>>, vector<8x384xf32>
    tpu.vector_store %arg15[%c24_176, %c0_177], %173 {strides = array<i32>} : memref<72x384xf32, #tpu.memory_space<vmem>>, vector<8x384xf32>,
    %c0_178 = arith.constant 0 : index
    %c32_179 = arith.constant 32 : index
    %175 = vector.load %arg14[%c0_178, %c32_179] : memref<8x512xf32, #tpu.memory_space<vmem>>, vector<8x384xf32>
    %c32_180 = arith.constant 32 : index
    %c0_181 = arith.constant 0 : index
    %176 = vector.load %arg15[%c32_180, %c0_181] : memref<72x384xf32, #tpu.memory_space<vmem>>, vector<8x384xf32>
    tpu.vector_store %arg15[%c32_180, %c0_181], %175 {strides = array<i32>} : memref<72x384xf32, #tpu.memory_space<vmem>>, vector<8x384xf32>,
    %c0_182 = arith.constant 0 : index
    %c33_183 = arith.constant 33 : index
    %177 = vector.load %arg14[%c0_182, %c33_183] : memref<8x512xf32, #tpu.memory_space<vmem>>, vector<8x384xf32>
    %c40 = arith.constant 40 : index
    %c0_184 = arith.constant 0 : index
    %178 = vector.load %arg15[%c40, %c0_184] : memref<72x384xf32, #tpu.memory_space<vmem>>, vector<8x384xf32>
    tpu.vector_store %arg15[%c40, %c0_184], %177 {strides = array<i32>} : memref<72x384xf32, #tpu.memory_space<vmem>>, vector<8x384xf32>,
    %c0_185 = arith.constant 0 : index
    %c49_186 = arith.constant 49 : index
    %179 = vector.load %arg14[%c0_185, %c49_186] : memref<8x512xf32, #tpu.memory_space<vmem>>, vector<8x384xf32>
    %c48 = arith.constant 48 : index
    %c0_187 = arith.constant 0 : index
    %180 = vector.load %arg15[%c48, %c0_187] : memref<72x384xf32, #tpu.memory_space<vmem>>, vector<8x384xf32>
    tpu.vector_store %arg15[%c48, %c0_187], %179 {strides = array<i32>} : memref<72x384xf32, #tpu.memory_space<vmem>>, vector<8x384xf32>,
    %c0_188 = arith.constant 0 : index
    %c50_189 = arith.constant 50 : index
    %181 = vector.load %arg14[%c0_188, %c50_189] : memref<8x512xf32, #tpu.memory_space<vmem>>, vector<8x384xf32>
    %c56 = arith.constant 56 : index
    %c0_190 = arith.constant 0 : index
    %182 = vector.load %arg15[%c56, %c0_190] : memref<72x384xf32, #tpu.memory_space<vmem>>, vector<8x384xf32>
    tpu.vector_store %arg15[%c56, %c0_190], %181 {strides = array<i32>} : memref<72x384xf32, #tpu.memory_space<vmem>>, vector<8x384xf32>,
    %c0_191 = arith.constant 0 : index
    %c51_192 = arith.constant 51 : index
    %183 = vector.load %arg14[%c0_191, %c51_192] : memref<8x512xf32, #tpu.memory_space<vmem>>, vector<8x384xf32>
    %c64 = arith.constant 64 : index
    %c0_193 = arith.constant 0 : index
    %184 = vector.load %arg15[%c64, %c0_193] : memref<72x384xf32, #tpu.memory_space<vmem>>, vector<8x384xf32>
    tpu.vector_store %arg15[%c64, %c0_193], %183 {strides = array<i32>} : memref<72x384xf32, #tpu.memory_space<vmem>>, vector<8x384xf32>,
    %c0_194 = arith.constant 0 : index
    %c0_195 = arith.constant 0 : index
    %185 = vector.load %arg15[%c0_194, %c0_195] : memref<72x384xf32, #tpu.memory_space<vmem>>, vector<72x384xf32>
    %186 = arith.truncf %185 : vector<72x384xf32> to vector<72x384xbf16>
    %c1 = arith.constant 1 : index
    %c0_196 = arith.constant 0 : index
    %187 = vector.load %arg9[%c1, %c0_196] : memref<3x72xbf16, #tpu.memory_space<vmem>>, vector<1x72xbf16>
    %cst_197 = arith.constant dense<0.000000e+00> : vector<1x384xf32>
    %188 = tpu.matmul %187, %186, %cst_197 {dimension_numbers = #tpu.dot_dimension_numbers<[1], [0], [0], [1], [0, 0, 1, 1], [], []>} : vector<1x72xbf16>, vector<72x384xbf16>, vector<1x384xf32> -> vector<1x384xf32>
    %c1_198 = arith.constant 1 : index
    %c0_199 = arith.constant 0 : index
    %189 = vector.load %arg10[%c1_198, %c0_199] : memref<3x1xf32, #tpu.memory_space<vmem>>, vector<1x1xf32>
    %190 = vector.broadcast %189 : vector<1x1xf32> to vector<1x384xf32>
    %191 = arith.addf %188, %190 : vector<1x384xf32>
    %192 = arith.negf %191 : vector<1x384xf32>
    %193 = math.exp %192 : vector<1x384xf32>
    %cst_200 = arith.constant 1.000000e+00 : f32
    %194 = vector.broadcast %cst_200 : f32 to vector<1x384xf32>
    %195 = arith.addf %194, %193 : vector<1x384xf32>
    %196 = arith.divf %194, %195 : vector<1x384xf32>
    %c8_201 = arith.constant 8 : index
    %c0_202 = arith.constant 0 : index
    %197 = vector.load %arg16[%c8_201, %c0_202] : memref<32x384xf32, #tpu.memory_space<vmem>>, vector<8x384xf32>
    %c16_203 = arith.constant 16 : index
    %c0_204 = arith.constant 0 : index
    %198 = vector.load %arg16[%c16_203, %c0_204] : memref<32x384xf32, #tpu.memory_space<vmem>>, vector<8x384xf32>
    %199 = vector.extract_strided_slice %47 {offsets = [8, 0], sizes = [8, 1], strides = [1, 1]} : vector<32x1xf32> to vector<8x1xf32>
    %200 = vector.extract_strided_slice %47 {offsets = [16, 0], sizes = [8, 1], strides = [1, 1]} : vector<32x1xf32> to vector<8x1xf32>
    %201 = arith.mulf %165, %197 : vector<8x384xf32>
    %202 = arith.addf %201, %198 : vector<8x384xf32>
    %203 = vector.broadcast %199 : vector<8x1xf32> to vector<8x384xf32>
    %204 = arith.mulf %165, %203 : vector<8x384xf32>
    %205 = vector.broadcast %200 : vector<8x1xf32> to vector<8x384xf32>
    %206 = arith.addf %204, %205 : vector<8x384xf32>
    %cst_205 = arith.constant 1.000000e+00 : f32
    %207 = vector.broadcast %cst_205 : f32 to vector<1x384xf32>
    %208 = arith.subf %207, %196 : vector<1x384xf32>
    %209 = vector.broadcast %208 : vector<1x384xf32> to vector<8x384xf32>
    %210 = arith.mulf %209, %202 : vector<8x384xf32>
    %211 = vector.broadcast %196 : vector<1x384xf32> to vector<8x384xf32>
    %212 = arith.mulf %211, %206 : vector<8x384xf32>
    %213 = arith.addf %210, %212 : vector<8x384xf32>
    %cst_206 = arith.constant 0.000000e+00 : f32
    %214 = vector.broadcast %cst_206 : f32 to vector<8x384xf32>
    %215 = arith.maximumf %213, %214 : vector<8x384xf32>
    %216 = vector.broadcast %3 : vector<1x384xf32> to vector<8x384xf32>
    %217 = arith.mulf %215, %216 : vector<8x384xf32>
    %c0_207 = arith.constant 0 : index
    %c32_208 = arith.constant 32 : index
    %218 = vector.load %arg14[%c0_207, %c32_208] : memref<8x512xf32, #tpu.memory_space<vmem>>, vector<8x384xf32>
    tpu.vector_store %arg14[%c0_207, %c32_208], %217 {strides = array<i32>} : memref<8x512xf32, #tpu.memory_space<vmem>>, vector<8x384xf32>,
    %c0_209 = arith.constant 0 : index
    %c13_210 = arith.constant 13 : index
    %219 = vector.load %arg14[%c0_209, %c13_210] : memref<8x512xf32, #tpu.memory_space<vmem>>, vector<8x384xf32>
    %c0_211 = arith.constant 0 : index
    %c0_212 = arith.constant 0 : index
    %220 = vector.load %arg15[%c0_211, %c0_212] : memref<72x384xf32, #tpu.memory_space<vmem>>, vector<8x384xf32>
    tpu.vector_store %arg15[%c0_211, %c0_212], %219 {strides = array<i32>} : memref<72x384xf32, #tpu.memory_space<vmem>>, vector<8x384xf32>,
    %c0_213 = arith.constant 0 : index
    %c14_214 = arith.constant 14 : index
    %221 = vector.load %arg14[%c0_213, %c14_214] : memref<8x512xf32, #tpu.memory_space<vmem>>, vector<8x384xf32>
    %c8_215 = arith.constant 8 : index
    %c0_216 = arith.constant 0 : index
    %222 = vector.load %arg15[%c8_215, %c0_216] : memref<72x384xf32, #tpu.memory_space<vmem>>, vector<8x384xf32>
    tpu.vector_store %arg15[%c8_215, %c0_216], %221 {strides = array<i32>} : memref<72x384xf32, #tpu.memory_space<vmem>>, vector<8x384xf32>,
    %c0_217 = arith.constant 0 : index
    %c15_218 = arith.constant 15 : index
    %223 = vector.load %arg14[%c0_217, %c15_218] : memref<8x512xf32, #tpu.memory_space<vmem>>, vector<8x384xf32>
    %c16_219 = arith.constant 16 : index
    %c0_220 = arith.constant 0 : index
    %224 = vector.load %arg15[%c16_219, %c0_220] : memref<72x384xf32, #tpu.memory_space<vmem>>, vector<8x384xf32>
    tpu.vector_store %arg15[%c16_219, %c0_220], %223 {strides = array<i32>} : memref<72x384xf32, #tpu.memory_space<vmem>>, vector<8x384xf32>,
    %c0_221 = arith.constant 0 : index
    %c31_222 = arith.constant 31 : index
    %225 = vector.load %arg14[%c0_221, %c31_222] : memref<8x512xf32, #tpu.memory_space<vmem>>, vector<8x384xf32>
    %c24_223 = arith.constant 24 : index
    %c0_224 = arith.constant 0 : index
    %226 = vector.load %arg15[%c24_223, %c0_224] : memref<72x384xf32, #tpu.memory_space<vmem>>, vector<8x384xf32>
    tpu.vector_store %arg15[%c24_223, %c0_224], %225 {strides = array<i32>} : memref<72x384xf32, #tpu.memory_space<vmem>>, vector<8x384xf32>,
    %c0_225 = arith.constant 0 : index
    %c32_226 = arith.constant 32 : index
    %227 = vector.load %arg14[%c0_225, %c32_226] : memref<8x512xf32, #tpu.memory_space<vmem>>, vector<8x384xf32>
    %c32_227 = arith.constant 32 : index
    %c0_228 = arith.constant 0 : index
    %228 = vector.load %arg15[%c32_227, %c0_228] : memref<72x384xf32, #tpu.memory_space<vmem>>, vector<8x384xf32>
    tpu.vector_store %arg15[%c32_227, %c0_228], %227 {strides = array<i32>} : memref<72x384xf32, #tpu.memory_space<vmem>>, vector<8x384xf32>,
    %c0_229 = arith.constant 0 : index
    %c33_230 = arith.constant 33 : index
    %229 = vector.load %arg14[%c0_229, %c33_230] : memref<8x512xf32, #tpu.memory_space<vmem>>, vector<8x384xf32>
    %c40_231 = arith.constant 40 : index
    %c0_232 = arith.constant 0 : index
    %230 = vector.load %arg15[%c40_231, %c0_232] : memref<72x384xf32, #tpu.memory_space<vmem>>, vector<8x384xf32>
    tpu.vector_store %arg15[%c40_231, %c0_232], %229 {strides = array<i32>} : memref<72x384xf32, #tpu.memory_space<vmem>>, vector<8x384xf32>,
    %c0_233 = arith.constant 0 : index
    %c49_234 = arith.constant 49 : index
    %231 = vector.load %arg14[%c0_233, %c49_234] : memref<8x512xf32, #tpu.memory_space<vmem>>, vector<8x384xf32>
    %c48_235 = arith.constant 48 : index
    %c0_236 = arith.constant 0 : index
    %232 = vector.load %arg15[%c48_235, %c0_236] : memref<72x384xf32, #tpu.memory_space<vmem>>, vector<8x384xf32>
    tpu.vector_store %arg15[%c48_235, %c0_236], %231 {strides = array<i32>} : memref<72x384xf32, #tpu.memory_space<vmem>>, vector<8x384xf32>,
    %c0_237 = arith.constant 0 : index
    %c50_238 = arith.constant 50 : index
    %233 = vector.load %arg14[%c0_237, %c50_238] : memref<8x512xf32, #tpu.memory_space<vmem>>, vector<8x384xf32>
    %c56_239 = arith.constant 56 : index
    %c0_240 = arith.constant 0 : index
    %234 = vector.load %arg15[%c56_239, %c0_240] : memref<72x384xf32, #tpu.memory_space<vmem>>, vector<8x384xf32>
    tpu.vector_store %arg15[%c56_239, %c0_240], %233 {strides = array<i32>} : memref<72x384xf32, #tpu.memory_space<vmem>>, vector<8x384xf32>,
    %c0_241 = arith.constant 0 : index
    %c51_242 = arith.constant 51 : index
    %235 = vector.load %arg14[%c0_241, %c51_242] : memref<8x512xf32, #tpu.memory_space<vmem>>, vector<8x384xf32>
    %c64_243 = arith.constant 64 : index
    %c0_244 = arith.constant 0 : index
    %236 = vector.load %arg15[%c64_243, %c0_244] : memref<72x384xf32, #tpu.memory_space<vmem>>, vector<8x384xf32>
    tpu.vector_store %arg15[%c64_243, %c0_244], %235 {strides = array<i32>} : memref<72x384xf32, #tpu.memory_space<vmem>>, vector<8x384xf32>,
    %c0_245 = arith.constant 0 : index
    %c0_246 = arith.constant 0 : index
    %237 = vector.load %arg15[%c0_245, %c0_246] : memref<72x384xf32, #tpu.memory_space<vmem>>, vector<72x384xf32>
    %238 = arith.truncf %237 : vector<72x384xf32> to vector<72x384xbf16>
    %c8_247 = arith.constant 8 : index
    %c0_248 = arith.constant 0 : index
    %239 = vector.load %arg11[%c8_247, %c0_248] : memref<24x72xbf16, #tpu.memory_space<vmem>>, vector<8x72xbf16>
    %cst_249 = arith.constant dense<0.000000e+00> : vector<8x384xf32>
    %240 = tpu.matmul %239, %238, %cst_249 {dimension_numbers = #tpu.dot_dimension_numbers<[1], [0], [0], [1], [0, 0, 1, 1], [], []>} : vector<8x72xbf16>, vector<72x384xbf16>, vector<8x384xf32> -> vector<8x384xf32>
    %c8_250 = arith.constant 8 : index
    %c0_251 = arith.constant 0 : index
    %241 = vector.load %arg12[%c8_250, %c0_251] : memref<24x1xf32, #tpu.memory_space<vmem>>, vector<8x1xf32>
    %242 = vector.broadcast %241 : vector<8x1xf32> to vector<8x384xf32>
    %243 = arith.addf %240, %242 : vector<8x384xf32>
    %cst_252 = arith.constant dense<0.000000e+00> : vector<4xf32>
    %244 = vector.multi_reduction <add>, %49, %cst_252 [1] : vector<4x384xf32> to vector<4xf32>
    %245 = vector.shape_cast %244 : vector<4xf32> to vector<4x1xf32>
    %cst_253 = arith.constant 3.906250e-03 : f32
    %246 = vector.broadcast %cst_253 : f32 to vector<4x1xf32>
    %247 = arith.mulf %245, %246 : vector<4x1xf32>
    %248 = vector.broadcast %247 : vector<4x1xf32> to vector<4x384xf32>
    %249 = arith.subf %49, %248 : vector<4x384xf32>
    %250 = vector.broadcast %3 : vector<1x384xf32> to vector<4x384xf32>
    %251 = arith.mulf %249, %250 : vector<4x384xf32>
    %252 = arith.mulf %251, %251 : vector<4x384xf32>
    %cst_254 = arith.constant dense<0.000000e+00> : vector<4xf32>
    %253 = vector.multi_reduction <add>, %252, %cst_254 [1] : vector<4x384xf32> to vector<4xf32>
    %254 = vector.shape_cast %253 : vector<4xf32> to vector<4x1xf32>
    %cst_255 = arith.constant 3.906250e-03 : f32
    %255 = vector.broadcast %cst_255 : f32 to vector<4x1xf32>
    %256 = arith.mulf %254, %255 : vector<4x1xf32>
    %cst_256 = arith.constant 9.99999974E-6 : f32
    %257 = vector.broadcast %cst_256 : f32 to vector<4x1xf32>
    %258 = arith.addf %256, %257 : vector<4x1xf32>
    %259 = math.rsqrt %258 : vector<4x1xf32>
    %260 = vector.broadcast %259 : vector<4x1xf32> to vector<4x384xf32>
    %261 = arith.mulf %251, %260 : vector<4x384xf32>
    %c0_257 = arith.constant 0 : index
    %c32_258 = arith.constant 32 : index
    %262 = vector.load %arg14[%c0_257, %c32_258] : memref<8x512xf32, #tpu.memory_space<vmem>>, vector<4x384xf32>
    tpu.vector_store %arg14[%c0_257, %c32_258], %261 {strides = array<i32>} : memref<8x512xf32, #tpu.memory_space<vmem>>, vector<4x384xf32>,
    %c0_259 = arith.constant 0 : index
    %c13_260 = arith.constant 13 : index
    %263 = vector.load %arg14[%c0_259, %c13_260] : memref<8x512xf32, #tpu.memory_space<vmem>>, vector<4x384xf32>
    %c0_261 = arith.constant 0 : index
    %c0_262 = arith.constant 0 : index
    %264 = vector.load %arg15[%c0_261, %c0_262] : memref<72x384xf32, #tpu.memory_space<vmem>>, vector<4x384xf32>
    tpu.vector_store %arg15[%c0_261, %c0_262], %263 {strides = array<i32>} : memref<72x384xf32, #tpu.memory_space<vmem>>, vector<4x384xf32>,
    %c0_263 = arith.constant 0 : index
    %c14_264 = arith.constant 14 : index
    %265 = vector.load %arg14[%c0_263, %c14_264] : memref<8x512xf32, #tpu.memory_space<vmem>>, vector<4x384xf32>
    %c4_265 = arith.constant 4 : index
    %c0_266 = arith.constant 0 : index
    %266 = vector.load %arg15[%c4_265, %c0_266] : memref<72x384xf32, #tpu.memory_space<vmem>>, vector<4x384xf32>
    tpu.vector_store %arg15[%c4_265, %c0_266], %265 {strides = array<i32>} : memref<72x384xf32, #tpu.memory_space<vmem>>, vector<4x384xf32>,
    %c0_267 = arith.constant 0 : index
    %c15_268 = arith.constant 15 : index
    %267 = vector.load %arg14[%c0_267, %c15_268] : memref<8x512xf32, #tpu.memory_space<vmem>>, vector<4x384xf32>
    %c8_269 = arith.constant 8 : index
    %c0_270 = arith.constant 0 : index
    %268 = vector.load %arg15[%c8_269, %c0_270] : memref<72x384xf32, #tpu.memory_space<vmem>>, vector<4x384xf32>
    tpu.vector_store %arg15[%c8_269, %c0_270], %267 {strides = array<i32>} : memref<72x384xf32, #tpu.memory_space<vmem>>, vector<4x384xf32>,
    %c0_271 = arith.constant 0 : index
    %c31_272 = arith.constant 31 : index
    %269 = vector.load %arg14[%c0_271, %c31_272] : memref<8x512xf32, #tpu.memory_space<vmem>>, vector<4x384xf32>
    %c12_273 = arith.constant 12 : index
    %c0_274 = arith.constant 0 : index
    %270 = vector.load %arg15[%c12_273, %c0_274] : memref<72x384xf32, #tpu.memory_space<vmem>>, vector<4x384xf32>
    tpu.vector_store %arg15[%c12_273, %c0_274], %269 {strides = array<i32>} : memref<72x384xf32, #tpu.memory_space<vmem>>, vector<4x384xf32>,
    %c0_275 = arith.constant 0 : index
    %c32_276 = arith.constant 32 : index
    %271 = vector.load %arg14[%c0_275, %c32_276] : memref<8x512xf32, #tpu.memory_space<vmem>>, vector<4x384xf32>
    %c16_277 = arith.constant 16 : index
    %c0_278 = arith.constant 0 : index
    %272 = vector.load %arg15[%c16_277, %c0_278] : memref<72x384xf32, #tpu.memory_space<vmem>>, vector<4x384xf32>
    tpu.vector_store %arg15[%c16_277, %c0_278], %271 {strides = array<i32>} : memref<72x384xf32, #tpu.memory_space<vmem>>, vector<4x384xf32>,
    %c0_279 = arith.constant 0 : index
    %c33_280 = arith.constant 33 : index
    %273 = vector.load %arg14[%c0_279, %c33_280] : memref<8x512xf32, #tpu.memory_space<vmem>>, vector<4x384xf32>
    %c20_281 = arith.constant 20 : index
    %c0_282 = arith.constant 0 : index
    %274 = vector.load %arg15[%c20_281, %c0_282] : memref<72x384xf32, #tpu.memory_space<vmem>>, vector<4x384xf32>
    tpu.vector_store %arg15[%c20_281, %c0_282], %273 {strides = array<i32>} : memref<72x384xf32, #tpu.memory_space<vmem>>, vector<4x384xf32>,
    %c0_283 = arith.constant 0 : index
    %c49_284 = arith.constant 49 : index
    %275 = vector.load %arg14[%c0_283, %c49_284] : memref<8x512xf32, #tpu.memory_space<vmem>>, vector<4x384xf32>
    %c24_285 = arith.constant 24 : index
    %c0_286 = arith.constant 0 : index
    %276 = vector.load %arg15[%c24_285, %c0_286] : memref<72x384xf32, #tpu.memory_space<vmem>>, vector<4x384xf32>
    tpu.vector_store %arg15[%c24_285, %c0_286], %275 {strides = array<i32>} : memref<72x384xf32, #tpu.memory_space<vmem>>, vector<4x384xf32>,
    %c0_287 = arith.constant 0 : index
    %c50_288 = arith.constant 50 : index
    %277 = vector.load %arg14[%c0_287, %c50_288] : memref<8x512xf32, #tpu.memory_space<vmem>>, vector<4x384xf32>
    %c28_289 = arith.constant 28 : index
    %c0_290 = arith.constant 0 : index
    %278 = vector.load %arg15[%c28_289, %c0_290] : memref<72x384xf32, #tpu.memory_space<vmem>>, vector<4x384xf32>
    tpu.vector_store %arg15[%c28_289, %c0_290], %277 {strides = array<i32>} : memref<72x384xf32, #tpu.memory_space<vmem>>, vector<4x384xf32>,
    %c0_291 = arith.constant 0 : index
    %c51_292 = arith.constant 51 : index
    %279 = vector.load %arg14[%c0_291, %c51_292] : memref<8x512xf32, #tpu.memory_space<vmem>>, vector<4x384xf32>
    %c32_293 = arith.constant 32 : index
    %c0_294 = arith.constant 0 : index
    %280 = vector.load %arg15[%c32_293, %c0_294] : memref<72x384xf32, #tpu.memory_space<vmem>>, vector<4x384xf32>
    tpu.vector_store %arg15[%c32_293, %c0_294], %279 {strides = array<i32>} : memref<72x384xf32, #tpu.memory_space<vmem>>, vector<4x384xf32>,
    %c0_295 = arith.constant 0 : index
    %c0_296 = arith.constant 0 : index
    %281 = vector.load %arg15[%c0_295, %c0_296] : memref<72x384xf32, #tpu.memory_space<vmem>>, vector<36x384xf32>
    %282 = arith.truncf %281 : vector<36x384xf32> to vector<36x384xbf16>
    %c2 = arith.constant 2 : index
    %c0_297 = arith.constant 0 : index
    %283 = vector.load %arg9[%c2, %c0_297] : memref<3x72xbf16, #tpu.memory_space<vmem>>, vector<1x36xbf16>
    %cst_298 = arith.constant dense<0.000000e+00> : vector<1x384xf32>
    %284 = tpu.matmul %283, %282, %cst_298 {dimension_numbers = #tpu.dot_dimension_numbers<[1], [0], [0], [1], [0, 0, 1, 1], [], []>} : vector<1x36xbf16>, vector<36x384xbf16>, vector<1x384xf32> -> vector<1x384xf32>
    %c2_299 = arith.constant 2 : index
    %c0_300 = arith.constant 0 : index
    %285 = vector.load %arg10[%c2_299, %c0_300] : memref<3x1xf32, #tpu.memory_space<vmem>>, vector<1x1xf32>
    %286 = vector.broadcast %285 : vector<1x1xf32> to vector<1x384xf32>
    %287 = arith.addf %284, %286 : vector<1x384xf32>
    %288 = arith.negf %287 : vector<1x384xf32>
    %289 = math.exp %288 : vector<1x384xf32>
    %cst_301 = arith.constant 1.000000e+00 : f32
    %290 = vector.broadcast %cst_301 : f32 to vector<1x384xf32>
    %291 = arith.addf %290, %289 : vector<1x384xf32>
    %292 = arith.divf %290, %291 : vector<1x384xf32>
    %c24_302 = arith.constant 24 : index
    %c0_303 = arith.constant 0 : index
    %293 = vector.load %arg16[%c24_302, %c0_303] : memref<32x384xf32, #tpu.memory_space<vmem>>, vector<4x384xf32>
    %c28_304 = arith.constant 28 : index
    %c0_305 = arith.constant 0 : index
    %294 = vector.load %arg16[%c28_304, %c0_305] : memref<32x384xf32, #tpu.memory_space<vmem>>, vector<4x384xf32>
    %295 = vector.extract_strided_slice %47 {offsets = [24, 0], sizes = [4, 1], strides = [1, 1]} : vector<32x1xf32> to vector<4x1xf32>
    %296 = vector.extract_strided_slice %47 {offsets = [28, 0], sizes = [4, 1], strides = [1, 1]} : vector<32x1xf32> to vector<4x1xf32>
    %297 = arith.mulf %261, %293 : vector<4x384xf32>
    %298 = arith.addf %297, %294 : vector<4x384xf32>
    %299 = vector.broadcast %295 : vector<4x1xf32> to vector<4x384xf32>
    %300 = arith.mulf %261, %299 : vector<4x384xf32>
    %301 = vector.broadcast %296 : vector<4x1xf32> to vector<4x384xf32>
    %302 = arith.addf %300, %301 : vector<4x384xf32>
    %cst_306 = arith.constant 1.000000e+00 : f32
    %303 = vector.broadcast %cst_306 : f32 to vector<1x384xf32>
    %304 = arith.subf %303, %292 : vector<1x384xf32>
    %305 = vector.broadcast %304 : vector<1x384xf32> to vector<4x384xf32>
    %306 = arith.mulf %305, %298 : vector<4x384xf32>
    %307 = vector.broadcast %292 : vector<1x384xf32> to vector<4x384xf32>
    %308 = arith.mulf %307, %302 : vector<4x384xf32>
    %309 = arith.addf %306, %308 : vector<4x384xf32>
    %cst_307 = arith.constant 0.000000e+00 : f32
    %310 = vector.broadcast %cst_307 : f32 to vector<4x384xf32>
    %311 = arith.maximumf %309, %310 : vector<4x384xf32>
    %312 = vector.broadcast %3 : vector<1x384xf32> to vector<4x384xf32>
    %313 = arith.mulf %311, %312 : vector<4x384xf32>
    %c0_308 = arith.constant 0 : index
    %c32_309 = arith.constant 32 : index
    %314 = vector.load %arg14[%c0_308, %c32_309] : memref<8x512xf32, #tpu.memory_space<vmem>>, vector<4x384xf32>
    tpu.vector_store %arg14[%c0_308, %c32_309], %313 {strides = array<i32>} : memref<8x512xf32, #tpu.memory_space<vmem>>, vector<4x384xf32>,
    %c0_310 = arith.constant 0 : index
    %c13_311 = arith.constant 13 : index
    %315 = vector.load %arg14[%c0_310, %c13_311] : memref<8x512xf32, #tpu.memory_space<vmem>>, vector<4x384xf32>
    %c0_312 = arith.constant 0 : index
    %c0_313 = arith.constant 0 : index
    %316 = vector.load %arg15[%c0_312, %c0_313] : memref<72x384xf32, #tpu.memory_space<vmem>>, vector<4x384xf32>
    tpu.vector_store %arg15[%c0_312, %c0_313], %315 {strides = array<i32>} : memref<72x384xf32, #tpu.memory_space<vmem>>, vector<4x384xf32>,
    %c0_314 = arith.constant 0 : index
    %c14_315 = arith.constant 14 : index
    %317 = vector.load %arg14[%c0_314, %c14_315] : memref<8x512xf32, #tpu.memory_space<vmem>>, vector<4x384xf32>
    %c4_316 = arith.constant 4 : index
    %c0_317 = arith.constant 0 : index
    %318 = vector.load %arg15[%c4_316, %c0_317] : memref<72x384xf32, #tpu.memory_space<vmem>>, vector<4x384xf32>
    tpu.vector_store %arg15[%c4_316, %c0_317], %317 {strides = array<i32>} : memref<72x384xf32, #tpu.memory_space<vmem>>, vector<4x384xf32>,
    %c0_318 = arith.constant 0 : index
    %c15_319 = arith.constant 15 : index
    %319 = vector.load %arg14[%c0_318, %c15_319] : memref<8x512xf32, #tpu.memory_space<vmem>>, vector<4x384xf32>
    %c8_320 = arith.constant 8 : index
    %c0_321 = arith.constant 0 : index
    %320 = vector.load %arg15[%c8_320, %c0_321] : memref<72x384xf32, #tpu.memory_space<vmem>>, vector<4x384xf32>
    tpu.vector_store %arg15[%c8_320, %c0_321], %319 {strides = array<i32>} : memref<72x384xf32, #tpu.memory_space<vmem>>, vector<4x384xf32>,
    %c0_322 = arith.constant 0 : index
    %c31_323 = arith.constant 31 : index
    %321 = vector.load %arg14[%c0_322, %c31_323] : memref<8x512xf32, #tpu.memory_space<vmem>>, vector<4x384xf32>
    %c12_324 = arith.constant 12 : index
    %c0_325 = arith.constant 0 : index
    %322 = vector.load %arg15[%c12_324, %c0_325] : memref<72x384xf32, #tpu.memory_space<vmem>>, vector<4x384xf32>
    tpu.vector_store %arg15[%c12_324, %c0_325], %321 {strides = array<i32>} : memref<72x384xf32, #tpu.memory_space<vmem>>, vector<4x384xf32>,
    %c0_326 = arith.constant 0 : index
    %c32_327 = arith.constant 32 : index
    %323 = vector.load %arg14[%c0_326, %c32_327] : memref<8x512xf32, #tpu.memory_space<vmem>>, vector<4x384xf32>
    %c16_328 = arith.constant 16 : index
    %c0_329 = arith.constant 0 : index
    %324 = vector.load %arg15[%c16_328, %c0_329] : memref<72x384xf32, #tpu.memory_space<vmem>>, vector<4x384xf32>
    tpu.vector_store %arg15[%c16_328, %c0_329], %323 {strides = array<i32>} : memref<72x384xf32, #tpu.memory_space<vmem>>, vector<4x384xf32>,
    %c0_330 = arith.constant 0 : index
    %c33_331 = arith.constant 33 : index
    %325 = vector.load %arg14[%c0_330, %c33_331] : memref<8x512xf32, #tpu.memory_space<vmem>>, vector<4x384xf32>
    %c20_332 = arith.constant 20 : index
    %c0_333 = arith.constant 0 : index
    %326 = vector.load %arg15[%c20_332, %c0_333] : memref<72x384xf32, #tpu.memory_space<vmem>>, vector<4x384xf32>
    tpu.vector_store %arg15[%c20_332, %c0_333], %325 {strides = array<i32>} : memref<72x384xf32, #tpu.memory_space<vmem>>, vector<4x384xf32>,
    %c0_334 = arith.constant 0 : index
    %c49_335 = arith.constant 49 : index
    %327 = vector.load %arg14[%c0_334, %c49_335] : memref<8x512xf32, #tpu.memory_space<vmem>>, vector<4x384xf32>
    %c24_336 = arith.constant 24 : index
    %c0_337 = arith.constant 0 : index
    %328 = vector.load %arg15[%c24_336, %c0_337] : memref<72x384xf32, #tpu.memory_space<vmem>>, vector<4x384xf32>
    tpu.vector_store %arg15[%c24_336, %c0_337], %327 {strides = array<i32>} : memref<72x384xf32, #tpu.memory_space<vmem>>, vector<4x384xf32>,
    %c0_338 = arith.constant 0 : index
    %c50_339 = arith.constant 50 : index
    %329 = vector.load %arg14[%c0_338, %c50_339] : memref<8x512xf32, #tpu.memory_space<vmem>>, vector<4x384xf32>
    %c28_340 = arith.constant 28 : index
    %c0_341 = arith.constant 0 : index
    %330 = vector.load %arg15[%c28_340, %c0_341] : memref<72x384xf32, #tpu.memory_space<vmem>>, vector<4x384xf32>
    tpu.vector_store %arg15[%c28_340, %c0_341], %329 {strides = array<i32>} : memref<72x384xf32, #tpu.memory_space<vmem>>, vector<4x384xf32>,
    %c0_342 = arith.constant 0 : index
    %c51_343 = arith.constant 51 : index
    %331 = vector.load %arg14[%c0_342, %c51_343] : memref<8x512xf32, #tpu.memory_space<vmem>>, vector<4x384xf32>
    %c32_344 = arith.constant 32 : index
    %c0_345 = arith.constant 0 : index
    %332 = vector.load %arg15[%c32_344, %c0_345] : memref<72x384xf32, #tpu.memory_space<vmem>>, vector<4x384xf32>
    tpu.vector_store %arg15[%c32_344, %c0_345], %331 {strides = array<i32>} : memref<72x384xf32, #tpu.memory_space<vmem>>, vector<4x384xf32>,
    %c0_346 = arith.constant 0 : index
    %c0_347 = arith.constant 0 : index
    %333 = vector.load %arg15[%c0_346, %c0_347] : memref<72x384xf32, #tpu.memory_space<vmem>>, vector<36x384xf32>
    %334 = arith.truncf %333 : vector<36x384xf32> to vector<36x384xbf16>
    %c16_348 = arith.constant 16 : index
    %c0_349 = arith.constant 0 : index
    %335 = vector.load %arg11[%c16_348, %c0_349] : memref<24x72xbf16, #tpu.memory_space<vmem>>, vector<8x36xbf16>
    %cst_350 = arith.constant dense<0.000000e+00> : vector<8x384xf32>
    %336 = tpu.matmul %335, %334, %cst_350 {dimension_numbers = #tpu.dot_dimension_numbers<[1], [0], [0], [1], [0, 0, 1, 1], [], []>} : vector<8x36xbf16>, vector<36x384xbf16>, vector<8x384xf32> -> vector<8x384xf32>
    %c16_351 = arith.constant 16 : index
    %c0_352 = arith.constant 0 : index
    %337 = vector.load %arg12[%c16_351, %c0_352] : memref<24x1xf32, #tpu.memory_space<vmem>>, vector<8x1xf32>
    %338 = vector.broadcast %337 : vector<8x1xf32> to vector<8x384xf32>
    %339 = arith.addf %336, %338 : vector<8x384xf32>
    %340 = arith.addf %243, %339 : vector<8x384xf32>
    %c0_353 = arith.constant 0 : index
    %c0_354 = arith.constant 0 : index
    %c0_355 = arith.constant 0 : index
    %341 = vector.load %arg13[%c0_353, %c0_354, %c0_355] : memref<1x8x384xf32, #tpu.memory_space<vmem>>, vector<1x8x384xf32>
    %342 = vector.shape_cast %341 : vector<1x8x384xf32> to vector<8x384xf32>
    %343 = vector.shape_cast %340 : vector<8x384xf32> to vector<1x8x384xf32>
    tpu.vector_store %arg13[%c0_353, %c0_354, %c0_355], %343 {strides = array<i32>} : memref<1x8x384xf32, #tpu.memory_space<vmem>>, vector<1x8x384xf32>,
    return
  }
  func.func @transform_0(%arg0: i32) -> (i32, i32, i32) {
    %c0_i32 = arith.constant 0 : i32
    %c0_i32_0 = arith.constant 0 : i32
    %c0_i32_1 = arith.constant 0 : i32
    return %arg0, %c0_i32, %c0_i32_0 : i32, i32, i32
  }
  func.func @transform_1(%arg0: i32) -> (i32, i32, i32) {
    %c0_i32 = arith.constant 0 : i32
    %c0_i32_0 = arith.constant 0 : i32
    %c0_i32_1 = arith.constant 0 : i32
    return %arg0, %c0_i32, %c0_i32_0 : i32, i32, i32
  }
  func.func @transform_2(%arg0: i32) -> (i32, i32, i32) {
    %c0_i32 = arith.constant 0 : i32
    %c0_i32_0 = arith.constant 0 : i32
    %c0_i32_1 = arith.constant 0 : i32
    return %arg0, %c0_i32, %c0_i32_0 : i32, i32, i32
  }
  func.func @transform_3(%arg0: i32) -> (i32, i32) {
    %c0_i32 = arith.constant 0 : i32
    %c0_i32_0 = arith.constant 0 : i32
    %c0_i32_1 = arith.constant 0 : i32
    return %c0_i32, %c0_i32_0 : i32, i32
  }
  func.func @transform_4(%arg0: i32) -> (i32, i32) {
    %c0_i32 = arith.constant 0 : i32
    %c0_i32_0 = arith.constant 0 : i32
    %c0_i32_1 = arith.constant 0 : i32
    return %c0_i32, %c0_i32_0 : i32, i32
  }
  func.func @transform_5(%arg0: i32) -> (i32, i32) {
    %c0_i32 = arith.constant 0 : i32
    %c0_i32_0 = arith.constant 0 : i32
    %c0_i32_1 = arith.constant 0 : i32
    return %c0_i32, %c0_i32_0 : i32, i32
  }
  func.func @transform_6(%arg0: i32) -> (i32, i32) {
    %c0_i32 = arith.constant 0 : i32
    %c0_i32_0 = arith.constant 0 : i32
    %c0_i32_1 = arith.constant 0 : i32
    return %c0_i32, %c0_i32_0 : i32, i32
  }
  func.func @transform_7(%arg0: i32) -> (i32, i32) {
    %c0_i32 = arith.constant 0 : i32
    %c0_i32_0 = arith.constant 0 : i32
    %c0_i32_1 = arith.constant 0 : i32
    return %c0_i32, %c0_i32_0 : i32, i32
  }
  func.func @transform_8(%arg0: i32) -> (i32, i32) {
    %c0_i32 = arith.constant 0 : i32
    %c0_i32_0 = arith.constant 0 : i32
    %c0_i32_1 = arith.constant 0 : i32
    return %c0_i32, %c0_i32_0 : i32, i32
  }
  func.func @transform_9(%arg0: i32) -> (i32, i32) {
    %c0_i32 = arith.constant 0 : i32
    %c0_i32_0 = arith.constant 0 : i32
    %c0_i32_1 = arith.constant 0 : i32
    return %c0_i32, %c0_i32_0 : i32, i32
  }
  func.func @transform_10(%arg0: i32) -> (i32, i32) {
    %c0_i32 = arith.constant 0 : i32
    %c0_i32_0 = arith.constant 0 : i32
    %c0_i32_1 = arith.constant 0 : i32
    return %c0_i32, %c0_i32_0 : i32, i32
  }
  func.func @transform_11(%arg0: i32) -> (i32, i32) {
    %c0_i32 = arith.constant 0 : i32
    %c0_i32_0 = arith.constant 0 : i32
    %c0_i32_1 = arith.constant 0 : i32
    return %c0_i32, %c0_i32_0 : i32, i32
  }
  func.func @transform_12(%arg0: i32) -> (i32, i32, i32) {
    %c0_i32 = arith.constant 0 : i32
    %c0_i32_0 = arith.constant 0 : i32
    %c0_i32_1 = arith.constant 0 : i32
    return %arg0, %c0_i32, %c0_i32_0 : i32, i32, i32
  }
}

</mosaic_0001>

<bundles_post_ra>
// kernel: aad_resblk_forward.1
= control target key start
LH: loop header
LB: loop body
LE: loop exit
PB: predicated region body
PF: predicated region fallthrough
CT: control target
= control target key end

     0   :  { %s4235_s21 = smov 0   ;;  %s5343_s0 = inlined_call_operand.vmem [shape: f32[2,4,512], index: 0, kind: input, shape index: {}]   ;;  %s5344_s1 = inlined_call_operand.vmem [shape: f32[2,4,512], index: 1, kind: input, shape index: {}]   ;;  %s5345_s2 = inlined_call_operand.vmem [shape: f32[2,1,512], index: 2, kind: input, shape index: {}]   ;;  %s5346_s3 = inlined_call_operand.vmem [shape: f32[1,384], index: 3, kind: input, shape index: {}]   ;;  %s5347_s4 = inlined_call_operand.vmem [shape: bf16[32,36], index: 4, kind: input, shape index: {}]   ;;  %s5348_s5 = inlined_call_operand.vmem [shape: f32[32,1], index: 5, kind: input, shape index: {}]   ;;  %s5349_s6 = inlined_call_operand.vmem [shape: f32[32,512], index: 6, kind: input, shape index: {}]   ;;  %s5350_s7 = inlined_call_operand.vmem [shape: f32[32,1], index: 7, kind: input, shape index: {}]   ;;  %s5351_s8 = inlined_call_operand.vmem [shape: bf16[3,72], index: 8, kind: input, shape index: {}]   ;;  %s5352_s9 = inlined_call_operand.vmem [shape: f32[3,1], index: 9, kind: input, shape index: {}]   ;;  %s5353_s10 = inlined_call_operand.vmem [shape: bf16[24,72], index: 10, kind: input, shape index: {}]   ;;  %s5354_s11 = inlined_call_operand.vmem [shape: f32[24,1], index: 11, kind: input, shape index: {}]   ;;  %s5355_s12 = inlined_call_operand.vmem [shape: f32[2,8,384], index: 12, kind: output, shape index: {}]  }
   0x1 LB: > { %s3890_s22 = sadd.s32 4294967295, %s4153_s21   ;;  %p3894_p0 = scmp.ge.s32.totalorder %s4153_s21, 1  ;;  %s4153_s21 = sphi %s4235_s21, %s22_s21  }
   0x2   : > { %p381_p1 = scmp.lt.s32.totalorder %s4153_s21, 3 }
   0x4   : > { %p382_p2 = pnand %p3894_p0, %p381_p1 }
   0x5   : > { %p432_p3 = scmp.lt.s32.totalorder (!%p382_p2), %s3890_s22, 1  ;;  %v884_v0 = vlaneseq (!%p382_p2)  ;;  %s5365_s27 = smov (!%p382_p2), 96   ;;  %v456_v6 = vld [vmem:[%s5346_s3] sm:$0x7] (!%p382_p2)  ;;  %vm568_vm0 = vcmask (!%p382_p2), 785408   ;;  %vm968_vm1 = vcmask (!%p382_p2), 1043456  }
   0x6   : > { %385 = sbr.rel (%p382_p2) target bundleno = 3824 (0xef0), region = 68  ;;  %s4156_s15 = smov (!%p382_p2), 32   ;;  %vm472_vm2 = vcmask (!%p382_p2), 941056   ;;  %vm520_vm3 = vcmask (!%p382_p2), 924672   ;;  %vm544_vm4 = vcmask (!%p382_p2), 793600   ;;  %vm496_vm5 = vcmask (!%p382_p2), 932864  }
   0x7   : > { %v4253_v3 = vshrl.u32 (!%p382_p2), %v884_v0, 7  ;;  %s4157_s16 = smov (!%p382_p2), 115   ;;  %s4158_s17 = smov (!%p382_p2), 114   ;;  %v4164_v52 = vmov (!%p382_p2), 839922192   ;;  %vm1011_vm6 = vcmask (!%p382_p2), 261120  }
   0x8   : > { %s4159_s18 = smov (!%p382_p2), 113   ;;  %s5367_s19 = smov (!%p382_p2), 97   ;;  %v979_v53 = vunpack.c.l.s4 (!%p382_p2), %v4164_v52  ;;  %vm5372_vm7 = vcmask (!%p382_p2), 777216   ;;  %vm616_vm8 = vcmask (!%p382_p2), 646144   ;;  %vm5371_vm9 = vcmask (!%p382_p2), 637952  }
   0x9   : > { %v4267_v7 = vsub.s32 (!%p382_p2), 0, %v4253_v3  ;;  %v890_v8 = vsub.s32 (!%p382_p2), 1, %v4253_v3  ;;  %v894_v11 = vsub.s32 (!%p382_p2), 2, %v4253_v3  ;;  %s5363_s20 = smov (!%p382_p2), 95   ;;  %s5358_s24 = smov (!%p382_p2), 78   ;;  %vm452_vm10 = vcmask (!%p382_p2), 261224  }
   0xa   : > { %v980_v54 = vunpack.c.0.s8 (!%p382_p2), %v979_v53  ;;  %s5356_s25 = smov (!%p382_p2), 77   ;;  %vm454_vm11 = vcmask (!%p382_p2), 417024   ;;  %vm5370_vm12 = vcmask (!%p382_p2), 629760   ;;  %vm5360_vm13 = vcmask (!%p382_p2), 293888   ;;  %s5375_s13 = smov (!%p382_p2), 97  }
   0xb   : > { %v4271_v9 = vrot.slane (!%p382_p2), %v456_v6, %v4267_v7  ;;  %v4275_v10 = vrot.slane (!%p382_p2), %v456_v6, %v890_v8  ;;  %v4288_v13 = vrot.slane (!%p382_p2), %v456_v6, %v894_v11  ;;  %vm5369_vm14 = vcmask (!%p382_p2), 1041408   ;;  %s5378_s28 = smov (!%p382_p2), 79  }
   0xc   : > { %v4379_v55 = vsub.s32 (!%p382_p2), %v980_v54, %v4253_v3  ;;  %vm1066_vm15 = vcmask (!%p382_p2), 1043712  }
   0xd   : > { %s5399_s22 = smov (!%p432_p3, %s3890_s22), 1  ;;  %v1004_v12 = vcombine.low %v4271_v9, %v4275_v10 }
   0xe   : > { %s3939_s23 = sshll.u32 %s5399_s22, 4 }
   0xf   : > { %s436_s26 = scalar_lea.vmem %s5343_s0, %s3939_s23  ;;  %s441_s14 = scalar_lea.vmem %s5344_s1, %s3939_s23 }
  0x10   : > { %v4249_v1 = vld [vmem:[%s436_s26 + $0x8] sm:$0xff]  ;;  %v4251_v2 = vld [vmem:[%s436_s26] sm:$0xff]  ;;  %s5361_s23 = smov 79   ;;  %s3899_s26 = sshll.u32 %s5399_s22, 2 }
  0x11   : > { %958 = vrot.lane.b32.xlu1 %v4249_v1, %s5365_s27  ;;  %954 = vrot.lane.b32.xlu0 %v4251_v2, %s5365_s27  ;;  %v953_v4 = vcombine.high %v4249_v1, %v4249_v1  ;;  %v952_v5 = vcombine.high %v4251_v2, %v4251_v2  ;;  %v4290_v14 = vld [vmem:[%s441_s14] sm:$0xff]  ;;  %v4300_v16 = vld [vmem:[%s441_s14 + $0x8] sm:$0xff]  ;;  %s445_s30 = scalar_lea.vmem %s5345_s2, %s3899_s26  ;;  %s5376_s14 = smov 96  }
  0x12   : > { %v4296_v15 = vcombine.high %v4290_v14, %v4290_v14  ;;  %v487_v17 = vcombine.low %v4300_v16, %v4300_v16  ;;  %v4318_v18 = vcombine.high %v4300_v16, %v4300_v16  ;;  %v534_v31 = vcombine.low %v4290_v14, %v4290_v14  ;;  %s5377_s26 = smov 95  }
  0x15   : > { %960 = vrot.lane.b32.xlu1 %v953_v4, %s5365_s27  ;;  %956 = vrot.lane.b32.xlu0 %v952_v5, %s5365_s27 }
  0x19   : > { %1005 = vrot.lane.b32.xlu1 %v1004_v12, %s4156_s15 }
  0x1d   : > { %1007 = vrot.lane.b32.xlu1 %v4288_v13, %s4156_s15 }
  0x21   : > { %466 = vrot.lane.b32.xlu1 %v4296_v15, %s4157_s16 }
  0x25   : > { %468 = vrot.lane.b32.xlu1 %v4300_v16, %s4157_s16 }
  0x29   : > { %492 = vrot.lane.b32.xlu1 %v487_v17, %s4158_s17 }
  0x2d   : > { %514 = vrot.lane.b32.xlu1 %v4296_v15, %s4159_s18 }
  0x31   : > { %516 = vrot.lane.b32.xlu1 %v4300_v16, %s4159_s18 }
  0x35   : > { %538 = vrot.lane.b32.xlu1 %v4290_v14, %s5367_s19 }
  0x39   : > { %540 = vrot.lane.b32.xlu1 %v487_v17, %s5367_s19 }
  0x3d   : > { %464 = vrot.lane.b32.xlu1 %v4290_v14, %s4157_s16 }
  0x41   : > { %512 = vrot.lane.b32.xlu1 %v4290_v14, %s4159_s18 }
  0x45   : > { %470 = vrot.lane.b32.xlu1 %v4318_v18, %s4157_s16 }
  0x49   : > { %518 = vrot.lane.b32.xlu1 %v4318_v18, %s4159_s18 }
  0x83   : > { %v959_v19 = vpop.permute.xlu1 %958  ;;  %v955_v20 = vpop.permute.xlu0 %954 }
  0x87   : > { %v961_v21 = vpop.permute.xlu1 %960  ;;  %v957_v22 = vpop.permute.xlu0 %956 }
  0x88   : > { %v964_v23 = vsel %vm568_vm0, %v959_v19, %v961_v21  ;;  %v962_v24 = vsel %vm568_vm0, %v955_v20, %v957_v22  ;;  %v963_v25 = vsel %vm568_vm0, %v957_v22, %v959_v19 }
  0x89   : > { %v969_v26 = vsel %vm968_vm1, %v962_v24, 0.0  ;;  %v970_v27 = vsel %vm968_vm1, %v963_v25, 0.0  ;;  %v972_v29 = vsel %vm968_vm1, %v964_v23, 0.0 }
  0x8a   : > { %v971_v28 = vadd.f32 %v970_v27, %v969_v26 }
  0x8b   : > { %v4337_v32 = vpop.permute.xlu1 %1005 }
  0x8c   : > { %v973_v30 = vadd.f32 %v972_v29, %v971_v28  ;;  %v1009_v58 = vrot.slane %v4337_v32, 4 }
  0x8e   : > { %974 = vadd.xlane.f32.xlu0 %v973_v30  ;;  %v1012_v5 = vsel %vm1011_vm6, %v1009_v58, %v4337_v32 }
  0x8f   : > { %v4340_v33 = vpop.permute.xlu1 %1007 }
  0x90   : > { %v1010_v56 = vrot.slane %v4340_v33, 4 }
  0x92   : > { %v1013_v61 = vsel %vm968_vm1, %v1009_v58, %v1010_v56 }
  0x93   : > { %v467_v34 = vpop.permute.xlu1 %466  ;;  %v1014_v6 = vsel %vm1011_vm6, %v1013_v61, %v4340_v33 }
  0x97   : > { %v469_v35 = vpop.permute.xlu1 %468 }
  0x98   : > { %v474_v36 = vsel %vm472_vm2, %v467_v34, %v469_v35 }
  0x99   : > { %480 = vst [vmem:[#allocation3 + $0x8] sm:$0xf] %v474_v36 }
  0x9b   : > { %v4349_v37 = vpop.permute.xlu1 %492 }
  0x9f   : > { %v515_v38 = vpop.permute.xlu1 %514 }
  0xa3   : > { %v517_v39 = vpop.permute.xlu1 %516 }
  0xa4   : > { %490 = vrot.lane.b32.xlu0 %v4290_v14, %s4158_s17  ;;  %v522_v40 = vsel %vm520_vm3, %v515_v38, %v517_v39 }
  0xa5   : > { %528 = vst [vmem:[#allocation3 + $0x20] sm:$0xf] %v522_v40 }
  0xa7   : > { %v539_v41 = vpop.permute.xlu1 %538 }
  0xa8   : > { %488 = vrot.lane.b32.xlu0 %v534_v31, %s4158_s17 }
  0xab   : > { %v4358_v42 = vpop.permute.xlu1 %540 }
  0xac   : > { %536 = vrot.lane.b32.xlu0 %v534_v31, %s5367_s19  ;;  %v546_v43 = vsel %vm544_vm4, %v539_v41, %v4358_v42 }
  0xad   : > { %552 = vst [vmem:[#allocation3 + $0x20] sm:$0xf0] %v546_v43 }
  0xaf   : > { %v465_v44 = vpop.permute.xlu1 %464 }
  0xb0   : > { %494 = vrot.lane.b32.xlu0 %v4300_v16, %s4158_s17  ;;  %v473_v45 = vsel %vm472_vm2, %v465_v44, %v467_v34 }
  0xb1   : > { %479 = vst [vmem:[#allocation3] sm:$0xf] %v473_v45 }
  0xb3   : > { %v513_v46 = vpop.permute.xlu1 %512 }
  0xb4   : > { %542 = vrot.lane.b32.xlu0 %v4300_v16, %s5367_s19  ;;  %v521_v47 = vsel %vm520_vm3, %v513_v46, %v515_v38  ;;  %v678_v20 = vld [vmem:[#allocation3 + $0x20] sm:$0xff] }
  0xb5   : > { %527 = vst [vmem:[#allocation3 + $0x18] sm:$0xf] %v521_v47 }
  0xb7   : > { %v471_v48 = vpop.permute.xlu1 %470 }
  0xb8   : > { %564 = vrot.lane.b32.xlu0 %v4300_v16, %s5365_s27  ;;  %v475_v49 = vsel %vm472_vm2, %v469_v35, %v471_v48 }
  0xb9   : > { %481 = vst [vmem:[#allocation3 + $0x10] sm:$0xf] %v475_v49 }
  0xbb   : > { %v519_v50 = vpop.permute.xlu1 %518 }
  0xbc   : > { %588 = vrot.lane.b32.xlu0 %v487_v17, %s5363_s20  ;;  %v523_v51 = vsel %vm520_vm3, %v517_v39, %v519_v50 }
  0xbd   : > { %529 = vst [vmem:[#allocation3 + $0x28] sm:$0xf] %v523_v51 }
  0xc0   : > { %612 = vrot.lane.b32.xlu0 %v4300_v16, %s5361_s23 }
  0xc4   : > { %636 = vrot.lane.b32.xlu0 %v487_v17, %s5358_s24 }
  0xc8   : > { %560 = vrot.lane.b32.xlu0 %v4290_v14, %s5365_s27 }
  0xcc   : > { %584 = vrot.lane.b32.xlu0 %v534_v31, %s5363_s20 }
  0xd0   : > { %608 = vrot.lane.b32.xlu0 %v4290_v14, %s5361_s23 }
  0xd4   : > { %632 = vrot.lane.b32.xlu0 %v534_v31, %s5358_s24 }
  0xd8   : > { %566 = vrot.lane.b32.xlu0 %v4318_v18, %s5365_s27 }
  0xdc   : > { %590 = vrot.lane.b32.xlu0 %v4300_v16, %s5363_s20 }
  0xe0   : > { %614 = vrot.lane.b32.xlu0 %v4318_v18, %s5361_s23 }
  0xe4   : > { %638 = vrot.lane.b32.xlu0 %v4300_v16, %s5358_s24 }
  0xe8   : > { %656 = vrot.lane.b32.xlu0 %v4290_v14, %s5356_s25 }
  0xec   : > { %660 = vrot.lane.b32.xlu0 %v4300_v16, %s5356_s25 }
  0xf0   : > { %662 = vrot.lane.b32.xlu0 %v4318_v18, %s5356_s25 }
 0x11b   : > { %v975_v57 = vpop.xlane.xlu0 %974 }
 0x11c   : > { %v976_v59 = vmul.f32 0.00390625, %v975_v57 }
 0x11e   : > { %v984_v60 = vrot.slane %v976_v59, %v4379_v55 }
 0x11f   : > { %v491_v62 = vpop.permute.xlu0 %490 }
 0x120   : > { %v986_v63 = vsub.f32 %v4251_v2, %v984_v60  ;;  %v987_v0 = vsub.f32 %v4249_v1, %v984_v60  ;;  %v498_v4 = vsel %vm496_vm5, %v491_v62, %v4349_v37 }
 0x121   : > { %504 = vst [vmem:[#allocation3 + $0x8] sm:$0xf0] %v498_v4 }
 0x122   : > { %v4393_v12 = vmul.f32 %v1012_v5, %v986_v63  ;;  %v4395_v19 = vmul.f32 %v1014_v6, %v987_v0 }
 0x123   : > { %v489_v17 = vpop.permute.xlu0 %488 }
 0x124   : > { %v1019_v2 = vmul.f32 %v4393_v12, %v4393_v12  ;;  %v497_v1 = vsel %vm496_vm5, %v489_v17, %v491_v62  ;;  %v1020_v22 = vmul.f32 %v4395_v19, %v4395_v19 }
 0x125   : > { %503 = vst [vmem:[#allocation3] sm:$0xf0] %v497_v1 }
 0x126   : > { %1025 = vrot.lane.b32.xlu1 %v1019_v2, %s5365_s27  ;;  %v1023_v27 = vcombine.high %v1019_v2, %v1019_v2  ;;  %v1024_v31 = vcombine.high %v1020_v22, %v1020_v22 }
 0x127   : > { %v537_v21 = vpop.permute.xlu0 %536 }
 0x128   : > { %v545_v23 = vsel %vm544_vm4, %v537_v21, %v539_v41  ;;  %v675_v24 = vld [vmem:[#allocation3 + $0x8] sm:$0xff] }
 0x129   : > { %551 = vst [vmem:[#allocation3 + $0x18] sm:$0xf0] %v545_v23  ;;  %v690_v25 = vpack.c.bf16 %v678_v20, %v675_v24 }
 0x12a   : > { %1029 = vrot.lane.b32.xlu1 %v1020_v22, %s5365_s27 }
 0x12b   : > { %v495_v26 = vpop.permute.xlu0 %494  ;;  %753 = vmatprep.subr.bf16.mxu0 %v690_v25 }
 0x12c   : > { %v499_v28 = vsel %vm496_vm5, %v4349_v37, %v495_v26  ;;  %v674_v29 = vld [vmem:[#allocation3] sm:$0xff] }
 0x12d   : > { %505 = vst [vmem:[#allocation3 + $0x10] sm:$0xf0] %v499_v28 }
 0x12e   : > { %1027 = vrot.lane.b32.xlu1 %v1023_v27, %s5365_s27 }
 0x12f   : > { %v543_v30 = vpop.permute.xlu0 %542 }
 0x130   : > { %v547_v32 = vsel %vm544_vm4, %v4358_v42, %v543_v30  ;;  %v677_v33 = vld [vmem:[#allocation3 + $0x18] sm:$0xff] }
 0x131   : > { %553 = vst [vmem:[#allocation3 + $0x28] sm:$0xf0] %v547_v32  ;;  %v689_v34 = vpack.c.bf16 %v677_v33, %v674_v29 }
 0x132   : > { %1031 = vrot.lane.b32.xlu1 %v1024_v31, %s5365_s27 }
 0x133   : > { %754 = vmatpush1.bf16.msra.mxu0 %v689_v34  ;;  %v565_v35 = vpop.permute.xlu0 %564  ;;  %v4166_v34 = vmov 0.0  }
 0x134   : > { %v676_v36 = vld [vmem:[#allocation3 + $0x10] sm:$0xff]  ;;  %453 = vst.msk [vmem:[#allocation2] sm:$0xff] %vm452_vm10, %v4166_v34  ;;  %vm1070_vm10 = vcmask 257024  }
 0x135   : > { %455 = vst.msk [vmem:[#allocation2 + $0x18] sm:$0xff] %vm454_vm11, %v4166_v34  ;;  %vm4168_vm11 = vmmov 0  }
 0x136   : > { %562 = vrot.lane.b32.xlu1 %v4296_v15, %s5365_s27 }
 0x137   : > { %v589_v37 = vpop.permute.xlu0 %588 }
 0x138   : > { %v679_v38 = vld [vmem:[#allocation3 + $0x28] sm:$0xff] }
 0x139   : > { %v691_v39 = vpack.c.bf16 %v679_v38, %v676_v36  ;;  %v4099_v38 = vld [vmem:[%s5347_s4] sm:$0xff]  }
 0x13a   : > { %586 = vrot.lane.b32.xlu1 %v4290_v14, %s5363_s20  ;;  %3980 = vmatprep.mubr.msk.bf16.mxu1 %vm5360_vm13, %v4099_v38 }
 0x13b   : > { %3974 = vmatprep.subr.bf16.mxu1 %v691_v39  ;;  %v613_v40 = vpop.permute.xlu0 %612 }
 0x13c   : > { %3975 = vmatpush3.bf16.msra.mxu1 %v691_v39  ;;  %v4167_v39 = vmov 0  }
 0x13d   : > { %785 = vmatprep.mubr.bf16.mxu0 %v4167_v39  ;;  %4091 = vset.pattern.permute.xlu1 %v4167_v39 }
 0x13e   : > { %610 = vrot.lane.b32.xlu1 %v4296_v15, %s5361_s23  ;;  %4092 = vset.pattern.permute.xlu0 %v4167_v39 }
 0x13f   : > { %v637_v16 = vpop.permute.xlu0 %636 }
 0x142   : > { %634 = vrot.lane.b32.xlu1 %v4290_v14, %s5358_s24 }
 0x143   : > { %v561_v41 = vpop.permute.xlu0 %560 }
 0x147   : > { %v585_v42 = vpop.permute.xlu0 %584 }
 0x14b   : > { %v609_v43 = vpop.permute.xlu0 %608 }
 0x14f   : > { %v633_v44 = vpop.permute.xlu0 %632 }
 0x153   : > { %v567_v18 = vpop.permute.xlu0 %566 }
 0x154   : > { %v571_v45 = vsel %vm568_vm0, %v565_v35, %v567_v18 }
 0x155   : > { %577 = vst [vmem:[#allocation3 + $0x40] sm:$0xf] %v571_v45 }
 0x157   : > { %v591_v46 = vpop.permute.xlu0 %590 }
 0x158   : > { %v595_v47 = vsel %vm5372_vm7, %v589_v37, %v591_v46 }
 0x159   : > { %601 = vst [vmem:[#allocation3 + $0x40] sm:$0xf0] %v595_v47 }
 0x15b   : > { %v615_v48 = vpop.permute.xlu0 %614 }
 0x15c   : > { %v619_v49 = vsel %vm616_vm8, %v613_v40, %v615_v48 }
 0x15d   : > { %625 = vst [vmem:[#allocation3 + $0x58] sm:$0xf] %v619_v49 }
 0x15f   : > { %v639_v14 = vpop.permute.xlu0 %638 }
 0x160   : > { %v643_v50 = vsel %vm5371_vm9, %v637_v16, %v639_v14  ;;  %v682_v31 = vld [vmem:[#allocation3 + $0x40] sm:$0xff] }
 0x161   : > { %649 = vst [vmem:[#allocation3 + $0x58] sm:$0xf0] %v643_v50 }
 0x168   : > { %v685_v32 = vld [vmem:[#allocation3 + $0x58] sm:$0xff] }
 0x169   : > { %v694_v33 = vpack.c.bf16 %v685_v32, %v682_v31 }
 0x16b   : > { %3976 = vmatprep.subr.bf16.mxu1 %v694_v33 }
 0x16c   : > { %3977 = vmatpush3.bf16.msra.mxu1 %v694_v33 }
 0x198   : > { %v1026_v51 = vpop.permute.xlu1 %1025 }
 0x19c   : > { %v1030_v52 = vpop.permute.xlu1 %1029 }
 0x1a0   : > { %v1028_v53 = vpop.permute.xlu1 %1027 }
 0x1a1   : > { %v1033_v54 = vsel %vm568_vm0, %v1026_v51, %v1028_v53  ;;  %v1034_v56 = vsel %vm568_vm0, %v1028_v53, %v1030_v52 }
 0x1a2   : > { %v1039_v57 = vsel %vm968_vm1, %v1033_v54, 0.0  ;;  %v1040_v58 = vsel %vm968_vm1, %v1034_v56, 0.0 }
 0x1a3   : > { %v1041_v61 = vadd.f32 %v1040_v58, %v1039_v57 }
 0x1a4   : > { %v1032_v59 = vpop.permute.xlu1 %1031 }
 0x1a5   : > { %v1035_v60 = vsel %vm568_vm0, %v1030_v52, %v1032_v59 }
 0x1a6   : > { %v1042_v62 = vsel %vm968_vm1, %v1035_v60, 0.0 }
 0x1a7   : > { %v1043_v63 = vadd.f32 %v1042_v62, %v1041_v61 }
 0x1a8   : > { %v563_v0 = vpop.permute.xlu1 %562 }
 0x1a9   : > { %1044 = vadd.xlane.f32.xlu1 %v1043_v63  ;;  %v570_v4 = vsel %vm568_vm0, %v563_v0, %v565_v35  ;;  %v569_v5 = vsel %vm568_vm0, %v561_v41, %v563_v0 }
 0x1aa   : > { %576 = vst [vmem:[#allocation3 + $0x38] sm:$0xf] %v570_v4  ;;  %575 = vst [vmem:[#allocation3 + $0x30] sm:$0xf] %v569_v5 }
 0x1ac   : > { %v587_v6 = vpop.permute.xlu1 %586 }
 0x1ad   : > { %v594_v17 = vsel %vm5372_vm7, %v587_v6, %v589_v37  ;;  %v593_v2 = vsel %vm5372_vm7, %v585_v42, %v587_v6  ;;  %v4100_v42 = vld [vmem:[%s5347_s4 + $0x8] sm:$0xff]  }
 0x1ae   : > { %600 = vst [vmem:[#allocation3 + $0x38] sm:$0xf0] %v594_v17  ;;  %599 = vst [vmem:[#allocation3 + $0x30] sm:$0xf0] %v593_v2 }
 0x1b0   : > { %v611_v1 = vpop.permute.xlu1 %610 }
 0x1b1   : > { %v618_v20 = vsel %vm616_vm8, %v611_v1, %v613_v40  ;;  %v617_v21 = vsel %vm616_vm8, %v609_v43, %v611_v1 }
 0x1b2   : > { %624 = vst [vmem:[#allocation3 + $0x50] sm:$0xf] %v618_v20  ;;  %623 = vst [vmem:[#allocation3 + $0x48] sm:$0xf] %v617_v21 }
 0x1b4   : > { %v635_v22 = vpop.permute.xlu1 %634 }
 0x1b5   : > { %v642_v23 = vsel %vm5371_vm9, %v635_v22, %v637_v16  ;;  %v641_v24 = vsel %vm5371_vm9, %v633_v44, %v635_v22  ;;  %v681_v25 = vld [vmem:[#allocation3 + $0x38] sm:$0xff]  ;;  %v680_v26 = vld [vmem:[#allocation3 + $0x30] sm:$0xff] }
 0x1b6   : > { %648 = vst [vmem:[#allocation3 + $0x50] sm:$0xf0] %v642_v23  ;;  %647 = vst [vmem:[#allocation3 + $0x48] sm:$0xf0] %v641_v24 }
 0x1ba   : > { %658 = vrot.lane.b32.xlu1 %v4296_v15, %s5356_s25  ;;  %v657_v15 = vpop.permute.xlu0 %656 }
 0x1bd   : > { %v684_v27 = vld [vmem:[#allocation3 + $0x50] sm:$0xff]  ;;  %v683_v28 = vld [vmem:[#allocation3 + $0x48] sm:$0xff] }
 0x1be   : > { %v693_v29 = vpack.c.bf16 %v684_v27, %v681_v25  ;;  %v692_v30 = vpack.c.bf16 %v683_v28, %v680_v26  ;;  %v661_v35 = vpop.permute.xlu0 %660 }
 0x1c0   : > { %755 = vmatprep.subr.bf16.mxu0 %v693_v29 }
 0x1c1   : > { %756 = vmatpush1.bf16.msra.mxu0 %v692_v30 }
 0x1c2   : > { %v663_v36 = vpop.permute.xlu0 %662 }
 0x1c3   : > { %v667_v37 = vsel %vm5370_vm12, %v661_v35, %v663_v36 }
 0x1c4   : > { %673 = vst [vmem:[#allocation3 + $0x70] sm:$0xf] %v667_v37 }
 0x1cb   : > { %v688_v40 = vld [vmem:[#allocation3 + $0x70] sm:$0xf] }
 0x1cc   : > { %v697_v16 = vpack.c.bf16 %v688_v40, %v688_v40 }
 0x1ce   : > { %4066 = vmatprep.subr.msk.bf16.mxu1 %vm5369_vm14, %v697_v16  ;;  %v751_v41 = vsel %vm5369_vm14, %v697_v16, 0 }
 0x1cf   : > { %3979 = vmatpush3.bf16.msra.mxu1 %v751_v41 }
 0x1d2   : > { %3981 = vmatmul.mubr.msk.bf16.vlgmr.msra.gmra.mrb[0].mxu1 %vm5360_vm13, %v4100_v42 }
 0x1d3   : > { %1388 = vmatprep.mubr.bf16.mxu1 %v4167_v39 }
 0x236   : > { %v1045_v43 = vpop.xlane.xlu1 %1044 }
 0x237   : > { %v1046_v44 = vmul.f32 0.00390625, %v1045_v43 }
 0x239   : > { %v1047_v18 = vadd.f32 1e-05, %v1046_v44 }
 0x23a   : > { %v659_v45 = vpop.permute.xlu1 %658 }
 0x23b   : > { %4107 = vrsqrt.f32 %v1047_v18  ;;  %v665_v46 = vsel %vm5370_vm12, %v657_v15, %v659_v45  ;;  %v666_v47 = vsel %vm5370_vm12, %v659_v45, %v661_v35 }
 0x23c   : > { %671 = vst [vmem:[#allocation3 + $0x60] sm:$0xf] %v665_v46  ;;  %672 = vst [vmem:[#allocation3 + $0x68] sm:$0xf] %v666_v47 }
 0x243   : > { %v687_v48 = vld [vmem:[#allocation3 + $0x68] sm:$0xf]  ;;  %v686_v49 = vld [vmem:[#allocation3 + $0x60] sm:$0xf] }
 0x244   : > { %v696_v14 = vpack.c.bf16 %v687_v48, %v687_v48  ;;  %v695_v50 = vpack.c.bf16 %v686_v49, %v686_v49 }
 0x245   : > { %v4108_v51 = vpop.eup %4107 }
 0x246   : > { %v1056_v52 = vrot.slane %v4108_v51, %v4379_v55  ;;  %3903 = vmatprep.subr.msk.bf16.mxu0 %vm5369_vm14, %v696_v14  ;;  %v745_v53 = vsel %vm5369_vm14, %v695_v50, 0 }
 0x247   : > { %758 = vmatpush1.bf16.msra.mxu0 %v745_v53 }
 0x248   : > { %v4468_v54 = vmul.f32 %v1056_v52, %v4393_v12  ;;  %v4471_v56 = vmul.f32 %v1056_v52, %v4395_v19  ;;  %3984 = vmatprep.subr.bf16.mxu0 %v4166_v34 }
 0x24a   : > { %1069 = vst [vmem:[#allocation2 + $0x10] sm:$0xf] %v4471_v56  ;;  %1067 = vst.msk [vmem:[#allocation2] sm:$0xf] %vm1066_vm15, %v4468_v54  ;;  %v4479_v57 = vcombine.high %v4468_v54, %v4468_v54  ;;  %3904 = vmatmul.mubr.msk.bf16.vlgmr.msra.gmra.mrb[0].mxu0 %vm5360_vm13, %v4099_v38  ;;  %v4484_v12 = vcombine.high %v4471_v56, %v4471_v56 }
 0x24b   : > { %795 = vmatprep.mubr.bf16.mxu0 %v4167_v39 }
 0x24c   : > { %1068 = vst [vmem:[#allocation2 + $0x8] sm:$0xf] %v4479_v57  ;;  %1071 = vst.msk [vmem:[#allocation2 + $0x18] sm:$0xf] %vm1070_vm10, %v4484_v12 }
 0x251   : > { %v1128_v19 = vld [vmem:[#allocation2 + $0x10] sm:$0xf]  ;;  %v1072_v60 = vld [vmem:[#allocation2] sm:$0xf] }
 0x252   : > { %v1074_v58 = vld [vmem:[#allocation2 + $0x10] sm:$0xf]  ;;  %1138 = vrot.lane.b32.xlu1 %v1128_v19, %s4159_s18  ;;  %3905 = vmatmul.mubr.msk.bf16.gmra.mrb[4].mxu0 %vm5360_vm13, %v4100_v42  ;;  %v1126_v62 = vld [vmem:[#allocation2] sm:$0xf] }
 0x253   : > { %1084 = vrot.lane.b32.xlu0 %v1074_v58, %s4157_s16  ;;  %v1182_v59 = vld [vmem:[#allocation2 + $0x10] sm:$0xf]  ;;  %v1180_v4 = vld [vmem:[#allocation2] sm:$0xf]  ;;  %v1073_v23 = vld [vmem:[#allocation2 + $0x8] sm:$0xf]  ;;  %3990 = vmatprep.mubr.msk.bf16.mxu0 %vm4168_vm11, %v4166_v34 }
 0x254   : > { %v1236_v61 = vld [vmem:[#allocation2 + $0x10] sm:$0xf]  ;;  %v1234_v17 = vld [vmem:[#allocation2] sm:$0xf]  ;;  %v1127_v26 = vld [vmem:[#allocation2 + $0x8] sm:$0xf] }
 0x255   : > { %v1099_v63 = vld [vmem:[#allocation2 + $0x10] sm:$0xf]  ;;  %v1097_v2 = vld [vmem:[#allocation2] sm:$0xf]  ;;  %v1075_v29 = vld [vmem:[#allocation2 + $0x18] sm:$0xf] }
 0x256   : > { %1192 = vrot.lane.b32.xlu1 %v1182_v59, %s5365_s27  ;;  %v1107_v0 = vrot.slane %v1099_v63, 4  ;;  %v1153_v5 = vld [vmem:[#allocation2 + $0x10] sm:$0xf]  ;;  %v1105_v1 = vrot.slane %v1097_v2, 4  ;;  %v1288_v20 = vld [vmem:[#allocation2] sm:$0xf] }
 0x257   : > { %1080 = vrot.lane.b32.xlu0 %v1072_v60, %s4157_s16  ;;  %v1161_v6 = vrot.slane %v1153_v5, 4  ;;  %v1151_v21 = vld [vmem:[#allocation2] sm:$0xf]  ;;  %v1207_v24 = vld [vmem:[#allocation2 + $0x10] sm:$0xf]  ;;  %v898_v5 = vsub.s32 3, %v4253_v3 }
 0x258   : > { %v1159_v22 = vrot.slane %v1151_v21, 4  ;;  %v1215_v25 = vrot.slane %v1207_v24, 4  ;;  %v1261_v27 = vld [vmem:[#allocation2 + $0x10] sm:$0xf]  ;;  %v1205_v30 = vld [vmem:[#allocation2] sm:$0xf] }
 0x259   : > { %v1269_v28 = vrot.slane %v1261_v27, 4  ;;  %v1213_v31 = vrot.slane %v1205_v30, 4  ;;  %v1129_v32 = vld [vmem:[#allocation2 + $0x18] sm:$0xf]  ;;  %v1259_v33 = vld [vmem:[#allocation2] sm:$0xf] }
 0x25a   : > { %1246 = vrot.lane.b32.xlu1 %v1236_v61, %s5361_s23  ;;  %v1267_v15 = vrot.slane %v1259_v33, 4  ;;  %v1181_v35 = vld [vmem:[#allocation2 + $0x8] sm:$0xf]  ;;  %v1100_v38 = vld [vmem:[#allocation2 + $0x18] sm:$0xf]  ;;  %v702_v19 = vld [vmem:[%s5348_s5] sm:$0xff] }
 0x25b   : > { %1134 = vrot.lane.b32.xlu0 %v1126_v62, %s4159_s18  ;;  %v1289_v36 = vld [vmem:[#allocation2 + $0x8] sm:$0xf]  ;;  %v1108_v40 = vrot.slane %v1100_v38, 4  ;;  %v1183_v16 = vld [vmem:[#allocation2 + $0x18] sm:$0xf]  ;;  %v867_v63 = vld [vmem:[%s5349_s6] sm:$0xff] }
 0x25c   : > { %v1235_v37 = vld [vmem:[#allocation2 + $0x8] sm:$0xf]  ;;  %v1154_v41 = vld [vmem:[#allocation2 + $0x18] sm:$0xf]  ;;  %v1290_v59 = vld [vmem:[#allocation2 + $0x10] sm:$0xf] }
 0x25d   : > { %v1162_v42 = vrot.slane %v1154_v41, 4  ;;  %v1237_v43 = vld [vmem:[#allocation2 + $0x18] sm:$0xf]  ;;  %v1098_v18 = vld [vmem:[#allocation2 + $0x8] sm:$0xf] }
 0x25e   : > { %1113 = vrot.lane.b32.xlu1 %v1107_v0, %s4158_s17  ;;  %v1208_v44 = vld [vmem:[#allocation2 + $0x18] sm:$0xf]  ;;  %v1106_v46 = vrot.slane %v1098_v18, 4  ;;  %v1152_v48 = vld [vmem:[#allocation2 + $0x8] sm:$0xf] }
 0x25f   : > { %1188 = vrot.lane.b32.xlu0 %v1180_v4, %s5365_s27  ;;  %v1216_v45 = vrot.slane %v1208_v44, 4  ;;  %v1262_v47 = vld [vmem:[#allocation2 + $0x18] sm:$0xf]  ;;  %v1160_v14 = vrot.slane %v1152_v48, 4  ;;  %v1206_v50 = vld [vmem:[#allocation2 + $0x8] sm:$0xf] }
 0x260   : > { %v1270_v49 = vrot.slane %v1262_v47, 4  ;;  %v1214_v51 = vrot.slane %v1206_v50, 4  ;;  %v1291_v52 = vld [vmem:[#allocation2 + $0x18] sm:$0xf]  ;;  %v1260_v53 = vld [vmem:[#allocation2 + $0x8] sm:$0xf] }
 0x261   : > { %v1268_v58 = vrot.slane %v1260_v53, 4  ;;  %v457_v60 = vld [vmem:[%s445_s30] sm:$0xf]  ;;  %v868_v0 = vld [vmem:[%s5349_s6 + $0x8] sm:$0xff] }
 0x262   : > { %1167 = vrot.lane.b32.xlu1 %v1161_v6, %s5367_s19  ;;  %v4537_v61 = vrot.slane %v457_v60, %v4267_v7  ;;  %v4541_v62 = vrot.slane %v457_v60, %v890_v8  ;;  %v4551_v4 = vrot.slane %v457_v60, %v894_v11  ;;  %v869_v8 = vld [vmem:[%s5349_s6 + $0x10] sm:$0xff]  ;;  %v4559_v2 = vrot.slane %v457_v60, %v898_v5  ;;  %v870_v11 = vld [vmem:[%s5349_s6 + $0x18] sm:$0xff] }
 0x263   : > { %1242 = vrot.lane.b32.xlu0 %v1234_v17, %s5361_s23 }
 0x264   : > { %v904_v6 = vmul.f32 %v4537_v61, %v867_v63  ;;  %v905_v17 = vmul.f32 %v4541_v62, %v868_v0  ;;  %v907_v21 = vmul.f32 %v4559_v2, %v870_v11 }
 0x266   : > { %1109 = vrot.lane.b32.xlu1 %v1105_v1, %s4158_s17  ;;  %v906_v1 = vmul.f32 %v4551_v4, %v869_v8 }
 0x267   : > { %1296 = vrot.lane.b32.xlu0 %v1288_v20, %s5356_s25  ;;  %v920_v20 = vadd.f32 %v905_v17, %v904_v6 }
 0x26a   : > { %1163 = vrot.lane.b32.xlu1 %v1159_v22, %s5367_s19  ;;  %v921_v22 = vadd.f32 %v920_v20, %v906_v1 }
 0x26b   : > { %1082 = vrot.lane.b32.xlu0 %v1073_v23, %s4157_s16 }
 0x26c   : > { %v922_v23 = vadd.f32 %v921_v22, %v907_v21 }
 0x26e   : > { %1221 = vrot.lane.b32.xlu1 %v1215_v25, %s5363_s20 }
 0x26f   : > { %1136 = vrot.lane.b32.xlu0 %v1127_v26, %s4159_s18 }
 0x272   : > { %1275 = vrot.lane.b32.xlu1 %v1269_v28, %s5358_s24 }
 0x273   : > { %1086 = vrot.lane.b32.xlu0 %v1075_v29, %s4157_s16 }
 0x276   : > { %1217 = vrot.lane.b32.xlu1 %v1213_v31, %s5363_s20 }
 0x277   : > { %1140 = vrot.lane.b32.xlu0 %v1129_v32, %s4159_s18 }
 0x27a   : > { %1271 = vrot.lane.b32.xlu1 %v1267_v15, %s5358_s24 }
 0x27b   : > { %1190 = vrot.lane.b32.xlu0 %v1181_v35, %s5365_s27 }
 0x27e   : > { %1298 = vrot.lane.b32.xlu1 %v1289_v36, %s5356_s25 }
 0x27f   : > { %1244 = vrot.lane.b32.xlu0 %v1235_v37, %s5361_s23 }
 0x282   : > { %1115 = vrot.lane.b32.xlu1 %v1108_v40, %s4158_s17 }
 0x283   : > { %1194 = vrot.lane.b32.xlu0 %v1183_v16, %s5365_s27 }
 0x286   : > { %1169 = vrot.lane.b32.xlu1 %v1162_v42, %s5367_s19 }
 0x287   : > { %1248 = vrot.lane.b32.xlu0 %v1237_v43, %s5361_s23 }
 0x28a   : > { %1223 = vrot.lane.b32.xlu1 %v1216_v45, %s5363_s20 }
 0x28b   : > { %1111 = vrot.lane.b32.xlu0 %v1106_v46, %s4158_s17 }
 0x28e   : > { %1277 = vrot.lane.b32.xlu1 %v1270_v49, %s5358_s24 }
 0x28f   : > { %1165 = vrot.lane.b32.xlu0 %v1160_v14, %s5367_s19 }
 0x292   : > { %1302 = vrot.lane.b32.xlu1 %v1291_v52, %s5356_s25 }
 0x293   : > { %1219 = vrot.lane.b32.xlu0 %v1214_v51, %s5363_s20 }
 0x296   : > { %708 = vperm.xlu1 %4091, %v702_v19  }
 0x297   : > { %1273 = vrot.lane.b32.xlu0 %v1268_v58, %s5358_s24  ;;  %s5373_s24 = smov 78  }
 0x29b   : > { %1300 = vrot.lane.b32.xlu0 %v1290_v59, %s5356_s25  ;;  %s5374_s25 = smov 77  }
 0x2a5   : > { %v4566_v28 = vpop.f32.mrb[0].mxu1 }
 0x2a6   : > { %v4568_v29 = vpop.f32.mrb[1].mxu1 }
 0x2a7   : > { %v4570_v32 = vpop.f32.mrb[2].mxu1 }
 0x2a8   : > { %v4572_v35 = vpop.f32.mrb[3].mxu1 }
 0x2ba   : > { %923 = vadd.xlane.f32.xlu0 %v922_v23 }
 0x2c4   : > { %v1139_v24 = vpop.permute.xlu1 %1138 }
 0x2c5   : > { %v1085_v25 = vpop.permute.xlu0 %1084 }
 0x2c8   : > { %v1193_v26 = vpop.permute.xlu1 %1192 }
 0x2c9   : > { %v1081_v27 = vpop.permute.xlu0 %1080 }
 0x2cc   : > { %v1247_v30 = vpop.permute.xlu1 %1246 }
 0x2cd   : > { %v1135_v31 = vpop.permute.xlu0 %1134 }
 0x2d0   : > { %v1114_v33 = vpop.permute.xlu1 %1113 }
 0x2d1   : > { %v1189_v15 = vpop.permute.xlu0 %1188 }
 0x2d4   : > { %v4574_v36 = vpop.permute.xlu1 %1167 }
 0x2d5   : > { %v1243_v37 = vpop.permute.xlu0 %1242 }
 0x2d8   : > { %v1110_v38 = vpop.permute.xlu1 %1109 }
 0x2d9   : > { %v1297_v40 = vpop.permute.xlu0 %1296 }
 0x2dc   : > { %v1164_v16 = vpop.permute.xlu1 %1163 }
 0x2dd   : > { %v1083_v41 = vpop.permute.xlu0 %1082 }
 0x2de   : > { %v1088_v42 = vsel %vm472_vm2, %v1081_v27, %v1083_v41  ;;  %v1089_v43 = vsel %vm472_vm2, %v1083_v41, %v1085_v25 }
 0x2df   : > { %1094 = vst [vmem:[#allocation3] sm:$0xf] %v1088_v42  ;;  %1095 = vst [vmem:[#allocation3 + $0x8] sm:$0xf] %v1089_v43 }
 0x2e0   : > { %v4578_v44 = vpop.permute.xlu1 %1221 }
 0x2e1   : > { %v1137_v18 = vpop.permute.xlu0 %1136 }
 0x2e2   : > { %v1142_v45 = vsel %vm520_vm3, %v1135_v31, %v1137_v18  ;;  %v1143_v46 = vsel %vm520_vm3, %v1137_v18, %v1139_v24 }
 0x2e3   : > { %1148 = vst [vmem:[#allocation3 + $0x18] sm:$0xf] %v1142_v45  ;;  %1149 = vst [vmem:[#allocation3 + $0x20] sm:$0xf] %v1143_v46 }
 0x2e4   : > { %v4582_v47 = vpop.permute.xlu1 %1275 }
 0x2e5   : > { %v1087_v48 = vpop.permute.xlu0 %1086 }
 0x2e6   : > { %v1090_v49 = vsel %vm472_vm2, %v1085_v25, %v1087_v48 }
 0x2e7   : > { %1096 = vst [vmem:[#allocation3 + $0x10] sm:$0xf] %v1090_v49 }
 0x2e8   : > { %v1218_v14 = vpop.permute.xlu1 %1217 }
 0x2e9   : > { %v1141_v50 = vpop.permute.xlu0 %1140 }
 0x2ea   : > { %v1144_v51 = vsel %vm520_vm3, %v1139_v24, %v1141_v50 }
 0x2eb   : > { %1150 = vst [vmem:[#allocation3 + $0x28] sm:$0xf] %v1144_v51 }
 0x2ec   : > { %v1272_v52 = vpop.permute.xlu1 %1271 }
 0x2ed   : > { %v1191_v53 = vpop.permute.xlu0 %1190 }
 0x2ee   : > { %v1196_v19 = vsel %vm568_vm0, %v1189_v15, %v1191_v53  ;;  %v1197_v58 = vsel %vm568_vm0, %v1191_v53, %v1193_v26 }
 0x2ef   : > { %1202 = vst [vmem:[#allocation3 + $0x30] sm:$0xf] %v1196_v19  ;;  %1203 = vst [vmem:[#allocation3 + $0x38] sm:$0xf] %v1197_v58 }
 0x2f0   : > { %v4588_v59 = vpop.permute.xlu1 %1298 }
 0x2f1   : > { %v1245_v60 = vpop.permute.xlu0 %1244  ;;  %v1304_v63 = vsel %vm5370_vm12, %v1297_v40, %v4588_v59 }
 0x2f2   : > { %v1250_v0 = vsel %vm616_vm8, %v1243_v37, %v1245_v60  ;;  %v1251_v5 = vsel %vm616_vm8, %v1245_v60, %v1247_v30  ;;  %1310 = vst [vmem:[#allocation3 + $0x60] sm:$0xf] %v1304_v63 }
 0x2f3   : > { %1256 = vst [vmem:[#allocation3 + $0x48] sm:$0xf] %v1250_v0  ;;  %1257 = vst [vmem:[#allocation3 + $0x50] sm:$0xf] %v1251_v5 }
 0x2f4   : > { %v1116_v6 = vpop.permute.xlu1 %1115 }
 0x2f5   : > { %v1195_v17 = vpop.permute.xlu0 %1194  ;;  %v1119_v8 = vsel %vm496_vm5, %v1114_v33, %v1116_v6 }
 0x2f6   : > { %v1198_v1 = vsel %vm568_vm0, %v1193_v26, %v1195_v17  ;;  %1125 = vst [vmem:[#allocation3 + $0x10] sm:$0xf0] %v1119_v8 }
 0x2f7   : > { %1204 = vst [vmem:[#allocation3 + $0x40] sm:$0xf] %v1198_v1 }
 0x2f8   : > { %v1170_v20 = vpop.permute.xlu1 %1169 }
 0x2f9   : > { %v1249_v11 = vpop.permute.xlu0 %1248  ;;  %v1173_v21 = vsel %vm544_vm4, %v4574_v36, %v1170_v20  ;;  %v1325_v0 = vld [vmem:[#allocation3 + $0x60] sm:$0xf] }
 0x2fa   : > { %v1252_v22 = vsel %vm616_vm8, %v1247_v30, %v1249_v11  ;;  %1179 = vst [vmem:[#allocation3 + $0x28] sm:$0xf0] %v1173_v21  ;;  %v1334_v20 = vpack.c.bf16 %v1325_v0, %v1325_v0 }
 0x2fb   : > { %1258 = vst [vmem:[#allocation3 + $0x58] sm:$0xf] %v1252_v22 }
 0x2fc   : > { %v1224_v23 = vpop.permute.xlu1 %1223 }
 0x2fd   : > { %v1112_v24 = vpop.permute.xlu0 %1111  ;;  %v1227_v25 = vsel %vm5372_vm7, %v4578_v44, %v1224_v23  ;;  %v1315_v41 = vld [vmem:[#allocation3 + $0x10] sm:$0xff] }
 0x2fe   : > { %v1117_v27 = vsel %vm496_vm5, %v1110_v38, %v1112_v24  ;;  %v1118_v26 = vsel %vm496_vm5, %v1112_v24, %v1114_v33  ;;  %1233 = vst [vmem:[#allocation3 + $0x40] sm:$0xf0] %v1227_v25  ;;  %v1348_v25 = vsel %vm5369_vm14, %v1334_v20, 0 }
 0x2ff   : > { %1123 = vst [vmem:[#allocation3] sm:$0xf0] %v1117_v27  ;;  %1124 = vst [vmem:[#allocation3 + $0x8] sm:$0xf0] %v1118_v26  ;;  %v1337_v26 = vld [vmem:[%s5351_s8] sm:$0x1] }
 0x300   : > { %v1278_v31 = vpop.permute.xlu1 %1277 }
 0x301   : > { %v1166_v15 = vpop.permute.xlu0 %1165  ;;  %v1281_v37 = vsel %vm5371_vm9, %v4582_v47, %v1278_v31  ;;  %v1318_v42 = vld [vmem:[#allocation3 + $0x28] sm:$0xff] }
 0x302   : > { %v1171_v30 = vsel %vm544_vm4, %v1164_v16, %v1166_v15  ;;  %v1172_v40 = vsel %vm544_vm4, %v1166_v15, %v4574_v36  ;;  %1287 = vst [vmem:[#allocation3 + $0x58] sm:$0xf0] %v1281_v37  ;;  %v1330_v38 = vpack.c.bf16 %v1318_v42, %v1315_v41  ;;  %v940_v41 = vld [vmem:[%s5350_s7] sm:$0xff] }
 0x303   : > { %1177 = vst [vmem:[#allocation3 + $0x18] sm:$0xf0] %v1171_v30  ;;  %1178 = vst [vmem:[#allocation3 + $0x20] sm:$0xf0] %v1172_v40 }
 0x304   : > { %3985 = vmatpush3.bf16.msra.mxu0 %v1330_v38  ;;  %v1303_v58 = vpop.permute.xlu1 %1302 }
 0x305   : > { %v1220_v33 = vpop.permute.xlu0 %1219  ;;  %3986 = vmatprep.subr.bf16.mxu0 %v4166_v34  ;;  %v1321_v36 = vld [vmem:[#allocation3 + $0x40] sm:$0xff] }
 0x306   : > { %v1225_v43 = vsel %vm5372_vm7, %v1218_v14, %v1220_v33  ;;  %v1226_v18 = vsel %vm5372_vm7, %v1220_v33, %v4578_v44  ;;  %v1314_v45 = vld [vmem:[#allocation3 + $0x8] sm:$0xff]  ;;  %v1313_v46 = vld [vmem:[#allocation3] sm:$0xff] }
 0x307   : > { %1231 = vst [vmem:[#allocation3 + $0x30] sm:$0xf0] %v1225_v43  ;;  %1232 = vst [vmem:[#allocation3 + $0x38] sm:$0xf0] %v1226_v18 }
 0x309   : > { %v1274_v16 = vpop.permute.xlu0 %1273  ;;  %v1324_v51 = vld [vmem:[#allocation3 + $0x58] sm:$0xff] }
 0x30a   : > { %v1279_v48 = vsel %vm5371_vm9, %v1272_v52, %v1274_v16  ;;  %v1280_v49 = vsel %vm5371_vm9, %v1274_v16, %v4582_v47  ;;  %v1317_v50 = vld [vmem:[#allocation3 + $0x20] sm:$0xff]  ;;  %v1316_v53 = vld [vmem:[#allocation3 + $0x18] sm:$0xff]  ;;  %v1333_v44 = vpack.c.bf16 %v1324_v51, %v1321_v36 }
 0x30b   : > { %1285 = vst [vmem:[#allocation3 + $0x48] sm:$0xf0] %v1279_v48  ;;  %1286 = vst [vmem:[#allocation3 + $0x50] sm:$0xf0] %v1280_v49  ;;  %v1329_v14 = vpack.c.bf16 %v1317_v50, %v1314_v45  ;;  %v1328_v19 = vpack.c.bf16 %v1316_v53, %v1313_v46  ;;  %v1338_v45 = vld [vmem:[%s5352_s9] sm:$0x1] }
 0x30c   : > { %3987 = vmatpush3.bf16.msra.mxu0 %v1333_v44 }
 0x30d   : > { %1356 = vmatprep.subr.bf16.mxu1 %v1329_v14  ;;  %v1301_v60 = vpop.permute.xlu0 %1300  ;;  %3988 = vmatprep.subr.bf16.mxu0 %v4166_v34 }
 0x30e   : > { %v1305_v63 = vsel %vm5370_vm12, %v4588_v59, %v1301_v60  ;;  %v1306_v52 = vsel %vm5370_vm12, %v1301_v60, %v1303_v58  ;;  %1357 = vmatpush1.bf16.msra.mxu1 %v1328_v19  ;;  %v1320_v47 = vld [vmem:[#allocation3 + $0x38] sm:$0xff]  ;;  %v1319_v6 = vld [vmem:[#allocation3 + $0x30] sm:$0xff] }
 0x30f   : > { %1311 = vst [vmem:[#allocation3 + $0x68] sm:$0xf] %v1305_v63  ;;  %1312 = vst [vmem:[#allocation3 + $0x70] sm:$0xf] %v1306_v52 }
 0x312   : > { %v1323_v5 = vld [vmem:[#allocation3 + $0x50] sm:$0xff]  ;;  %v1322_v17 = vld [vmem:[#allocation3 + $0x48] sm:$0xff] }
 0x313   : > { %v1332_v8 = vpack.c.bf16 %v1323_v5, %v1320_v47  ;;  %v1331_v1 = vpack.c.bf16 %v1322_v17, %v1319_v6  ;;  %v4169_v47 = vmov 1985246804  }
 0x314   : > { %v1511_v0 = vunpack.c.l.s4 %v4169_v47 }
 0x315   : > { %1358 = vmatprep.subr.bf16.mxu1 %v1332_v8  ;;  %v709_v59 = vpop.permute.xlu1 %708 }
 0x316   : > { %1359 = vmatpush1.bf16.msra.mxu1 %v1331_v1  ;;  %v1326_v11 = vld [vmem:[#allocation3 + $0x68] sm:$0xf]  ;;  %v1327_v21 = vld [vmem:[#allocation3 + $0x70] sm:$0xf]  ;;  %v841_v24 = vadd.f32 %v4568_v29, %v709_v59 }
 0x317   : > { %v1335_v22 = vpack.c.bf16 %v1326_v11, %v1326_v11  ;;  %v1336_v23 = vpack.c.bf16 %v1327_v21, %v1327_v21  ;;  %v1512_v11 = vunpack.c.0.s8 %v1511_v0 }
 0x318   : > { %857 = vst [vmem:[#allocation4 + $0x10] sm:$0xff] %v841_v24 }
 0x319   : > { %3908 = vmatprep.subr.msk.bf16.mxu1 %vm5369_vm14, %v1335_v22  ;;  %v1354_v27 = vsel %vm5369_vm14, %v1336_v23, 0 }
 0x31a   : > { %1361 = vmatpush1.bf16.msra.mxu1 %v1348_v25  ;;  %3989 = vmatpush3.bf16.msra.mxu0 %v1354_v27  ;;  %v4666_v25 = vsub.s32 %v1512_v11, %v4253_v3 }
 0x31b   : > { %3994 = vmatprep.subr.bf16.mxu0 %v4166_v34 }
 0x31d   : > { %3909 = vmatmul.mubr.msk.bf16.vlgmr.msra.gmra.mrb[4].mxu1 %vm5360_vm13, %v1337_v26  ;;  %3991 = vmatmul.mubr.msk.bf16.vlgmr.msra.gmra.mrb[8].mxu0 %vm5360_vm13, %v1337_v26  ;;  %v787_v29 = vpop.f32.mrb[0].mxu0 }
 0x31e   : > { %1933 = vmatprep.mubr.bf16.mxu1 %v4167_v39  ;;  %4000 = vmatprep.mubr.msk.bf16.mxu0 %vm4168_vm11, %v4166_v34  ;;  %v788_v31 = vadd.f32 %v787_v29, %v709_v59  ;;  %v789_v15 = vpop.f32.mrb[1].mxu0 }
 0x31f   : > { %v790_v37 = vadd.f32 %v789_v15, %v709_v59  ;;  %v4632_v30 = vpop.f32.mrb[2].mxu0  ;;  %v1457_v43 = vld [vmem:[#allocation4 + $0x10] sm:$0xf]  ;;  %v4103_v16 = vld [vmem:[#allocation4 + $0x14] ss:$0 sps:$4 sm:$0xff]  }
 0x320   : > { %855 = vst [vmem:[#allocation4] sm:$0xff] %v788_v31  ;;  %v4634_v40 = vpop.f32.mrb[3].mxu0 }
 0x321   : > { %856 = vst [vmem:[#allocation4 + $0x8] sm:$0xff] %v790_v37 }
 0x325   : > { %v4646_v36 = vpop.f32.mrb[4].mxu0 }
 0x326   : > { %v4648_v46 = vpop.f32.mrb[5].mxu0 }
 0x327   : > { %v4650_v48 = vpop.f32.mrb[6].mxu0 }
 0x328   : > { %v4101_v33 = vld [vmem:[#allocation4] ss:$8 sps:$4 sm:$0xff]   ;;  %v4102_v18 = vld [vmem:[#allocation4 + $0x4] ss:$8 sps:$4 sm:$0xff]   ;;  %v4652_v49 = vpop.f32.mrb[7].mxu0 }
 0x347   : > { %v924_v42 = vpop.xlane.xlu0 %923 }
 0x348   : > { %v944_v38 = vadd.f32 %v940_v41, %v924_v42 }
 0x34a   : > { %1498 = vperm.xlu1 %4091, %v944_v38  }
 0x34e   : > { %1465 = vrot.lane.b32.xlu1 %v4101_v33, %s4156_s15 }
 0x352   : > { %1467 = vrot.lane.b32.xlu1 %v1457_v43, %s4156_s15 }
 0x356   : > { %1483 = vrot.lane.b32.xlu1 %v4102_v18, %s4156_s15 }
 0x35a   : > { %1485 = vrot.lane.b32.xlu1 %v4103_v16, %s4156_s15 }
 0x35e   : > { %1341 = vperm.xlu1 %4091, %v1338_v45  }
 0x3c9   : > { %v1499_v50 = vpop.permute.xlu1 %1498 }
 0x3ca   : > { %v1506_v23 = vrot.slane %v1499_v50, %v4379_v55  ;;  %v1516_v29 = vrot.slane %v1499_v50, %v4666_v25 }
 0x3cc   : > { %v1508_v27 = vmul.f32 %v1506_v23, %v4468_v54  ;;  %v1509_v15 = vmul.f32 %v1506_v23, %v4471_v56 }
 0x3cd   : > { %v1466_v51 = vpop.permute.xlu1 %1465 }
 0x3ce   : > { %v1469_v53 = vrot.slane %v1466_v51, 4  ;;  %v1518_v31 = vadd.f32 %v1516_v29, %v1508_v27  ;;  %v1519_v41 = vadd.f32 %v1516_v29, %v1509_v15 }
 0x3d0   : > { %v1471_v19 = vsel %vm1011_vm6, %v1469_v53, %v1466_v51  ;;  %v1570_v37 = vcombine.high %v1518_v31, %v1518_v31  ;;  %v1571_v43 = vcombine.high %v1519_v41, %v1519_v41 }
 0x3d1   : > { %v1468_v14 = vpop.permute.xlu1 %1467  ;;  %v1476_v52 = vmul.f32 %v1471_v19, %v4468_v54 }
 0x3d2   : > { %v1470_v44 = vrot.slane %v1468_v14, 4 }
 0x3d4   : > { %v1472_v60 = vsel %vm968_vm1, %v1469_v53, %v1470_v44 }
 0x3d5   : > { %v1484_v58 = vpop.permute.xlu1 %1483  ;;  %v1473_v6 = vsel %vm1011_vm6, %v1472_v60, %v1468_v14 }
 0x3d6   : > { %v1487_v63 = vrot.slane %v1484_v58, 4  ;;  %v1477_v21 = vmul.f32 %v1473_v6, %v4471_v56 }
 0x3d8   : > { %v1489_v5 = vsel %vm1011_vm6, %v1487_v63, %v1484_v58 }
 0x3d9   : > { %v1494_v17 = vadd.f32 %v1489_v5, %v1476_v52  ;;  %v1486_v8 = vpop.permute.xlu1 %1485 }
 0x3da   : > { %v1488_v1 = vrot.slane %v1486_v8, 4 }
 0x3db   : > { %1539 = vrot.lane.b32.xlu1 %v1494_v17, %s5365_s27  ;;  %v1537_v20 = vcombine.high %v1494_v17, %v1494_v17 }
 0x3dc   : > { %v1490_v59 = vsel %vm968_vm1, %v1487_v63, %v1488_v1 }
 0x3dd   : > { %v1491_v22 = vsel %vm1011_vm6, %v1490_v59, %v1486_v8  ;;  %1541 = vrot.lane.b32.xlu0 %v1537_v20, %s5365_s27  ;;  %v1342_v51 = vpop.permute.xlu1 %1341 }
 0x3de   : > { %v1495_v24 = vadd.f32 %v1491_v22, %v1477_v21 }
 0x3e0   : > { %1543 = vrot.lane.b32.xlu1 %v1495_v24, %s5365_s27  ;;  %v1538_v26 = vcombine.high %v1495_v24, %v1495_v24 }
 0x3e4   : > { %1545 = vrot.lane.b32.xlu1 %v1538_v26, %s5365_s27 }
 0x3e8   : > { %1572 = vrot.lane.b32.xlu1 %v1518_v31, %s5365_s27 }
 0x3ec   : > { %1574 = vrot.lane.b32.xlu1 %v1570_v37, %s5365_s27 }
 0x3f0   : > { %v1390_v3 = vpop.f32.mrb[4].mxu1  ;;  %v1431_v42 = vpop.f32.mrb[8].mxu0  ;;  %1576 = vrot.lane.b32.xlu1 %v1519_v41, %s5365_s27 }
 0x3f1   : > { %v1392_v38 = vpop.f32.mrb[5].mxu1  ;;  %v3992_v33 = vpop.f32.mrb[9].mxu0  ;;  %v1391_v53 = vadd.f32 %v1390_v3, %v1342_v51  ;;  %v1432_v19 = vadd.f32 %v1431_v42, %v1342_v51 }
 0x3f2   : > { %v1394_v18 = vpop.f32.mrb[6].mxu1  ;;  %v1434_v16 = vpop.f32.mrb[10].mxu0  ;;  %v1393_v44 = vadd.f32 %v1392_v38, %v1342_v51 }
 0x3f3   : > { %v1395_v45 = vpop.f32.mrb[7].mxu1  ;;  %v3993_v50 = vpop.f32.mrb[11].mxu0  ;;  %v3911_v14 = vmul.f32 -1.442695, %v1391_v53  ;;  %v3913_v60 = vmul.f32 -1.442695, %v1432_v19 }
 0x3f4   : > { %1578 = vrot.lane.b32.xlu1 %v1571_v43, %s5365_s27  ;;  %v3912_v58 = vmul.f32 -1.442695, %v1393_v44 }
 0x3f5   : > { %4109 = vpow2.f32 %v3911_v14 }
 0x3f6   : > { %4111 = vpow2.f32 %v3912_v58 }
 0x3f7   : > { %4113 = vpow2.f32 %v3913_v60 }
 0x3ff   : > { %v4110_v63 = vpop.eup %4109 }
 0x400   : > { %v1446_v52 = vadd.f32 1.0, %v4110_v63  ;;  %v4112_v47 = vpop.eup %4111 }
 0x401   : > { %v1447_v0 = vadd.f32 1.0, %v4112_v47  ;;  %v4114_v6 = vpop.eup %4113 }
 0x402   : > { %4115 = vrcp.f32 %v1446_v52  ;;  %v1448_v17 = vadd.f32 1.0, %v4114_v6 }
 0x403   : > { %4117 = vrcp.f32 %v1447_v0 }
 0x404   : > { %4119 = vrcp.f32 %v1448_v17 }
 0x40c   : > { %v4116_v20 = vpop.eup %4115 }
 0x40d   : > { %v1520_v21 = vsub.f32 1.0, %v4116_v20  ;;  %v4118_v22 = vpop.eup %4117  ;;  %v1559_v26 = vrot.slane %v4116_v20, %v4267_v7 }
 0x40e   : > { %v1521_v27 = vsub.f32 1.0, %v4118_v22  ;;  %v4120_v31 = vpop.eup %4119  ;;  %v1563_v33 = vrot.slane %v4118_v22, %v4267_v7 }
 0x40f   : > { %v1526_v24 = vrot.slane %v1520_v21, %v4267_v7  ;;  %v1522_v38 = vsub.f32 1.0, %v4120_v31  ;;  %v1567_v19 = vrot.slane %v4120_v31, %v4267_v7 }
 0x410   : > { %v1530_v42 = vrot.slane %v1521_v27, %v4267_v7 }
 0x411   : > { %v1534_v14 = vrot.slane %v1522_v38, %v4267_v7 }
 0x44d   : > { %v1540_v5 = vpop.permute.xlu1 %1539 }
 0x44f   : > { %v1542_v11 = vpop.permute.xlu0 %1541 }
 0x450   : > { %v1547_v23 = vsel %vm568_vm0, %v1540_v5, %v1542_v11 }
 0x451   : > { %v1553_v37 = vmul.f32 %v1547_v23, %v1526_v24 }
 0x452   : > { %v1544_v8 = vpop.permute.xlu1 %1543 }
 0x453   : > { %v1548_v3 = vsel %vm568_vm0, %v1542_v11, %v1544_v8 }
 0x454   : > { %v1554_v45 = vmul.f32 %v1548_v3, %v1530_v42 }
 0x456   : > { %v1546_v1 = vpop.permute.xlu1 %1545 }
 0x457   : > { %v1549_v53 = vsel %vm568_vm0, %v1544_v8, %v1546_v1 }
 0x458   : > { %v1555_v52 = vmul.f32 %v1549_v53, %v1534_v14 }
 0x45a   : > { %v1573_v59 = vpop.permute.xlu1 %1572 }
 0x45e   : > { %v1575_v29 = vpop.permute.xlu1 %1574 }
 0x45f   : > { %v1580_v15 = vsel %vm568_vm0, %v1573_v59, %v1575_v29 }
 0x460   : > { %v1586_v41 = vmul.f32 %v1580_v15, %v1559_v26 }
 0x462   : > { %v1577_v43 = vpop.permute.xlu1 %1576  ;;  %v1589_v18 = vadd.f32 %v1586_v41, %v1553_v37 }
 0x463   : > { %v1581_v16 = vsel %vm568_vm0, %v1575_v29, %v1577_v43 }
 0x464   : > { %v1587_v50 = vmul.f32 %v1581_v16, %v1563_v33  ;;  %v1592_v51 = vmax.f32 %v1589_v18, 0.0 }
 0x466   : > { %v1590_v44 = vadd.f32 %v1587_v50, %v1554_v45  ;;  %v1579_v58 = vpop.permute.xlu1 %1578  ;;  %v1595_v60 = vmul.f32 %v1592_v51, %v4271_v9 }
 0x467   : > { %v1582_v63 = vsel %vm568_vm0, %v1577_v43, %v1579_v58 }
 0x468   : > { %v1593_v47 = vmax.f32 %v1590_v44, 0.0  ;;  %v1588_v0 = vmul.f32 %v1582_v63, %v1567_v19  ;;  %1601 = vrot.lane.b32.xlu0 %v1595_v60, %s4156_s15 }
 0x46a   : > { %v1591_v5 = vadd.f32 %v1588_v0, %v1555_v52  ;;  %v1596_v6 = vmul.f32 %v1593_v47, %v4275_v10 }
 0x46c   : > { %v1594_v17 = vmax.f32 %v1591_v5, 0.0  ;;  %1603 = vrot.lane.b32.xlu1 %v1596_v6, %s4156_s15 }
 0x46e   : > { %v1597_v8 = vmul.f32 %v1594_v17, %v4288_v13 }
 0x470   : > { %1605 = vrot.lane.b32.xlu0 %v1597_v8, %s4156_s15 }
 0x4da   : > { %v1602_v1 = vpop.permute.xlu0 %1601 }
 0x4db   : > { %1613 = vst.msk [vmem:[#allocation2] sm:$0xf] %vm1066_vm15, %v1602_v1 }
 0x4de   : > { %v1604_v20 = vpop.permute.xlu1 %1603 }
 0x4df   : > { %v1607_v11 = vsel %vm1011_vm6, %v1602_v1, %v1604_v20 }
 0x4e0   : > { %1614 = vst [vmem:[#allocation2 + $0x8] sm:$0xf] %v1607_v11 }
 0x4e2   : > { %v1606_v21 = vpop.permute.xlu0 %1605  ;;  %v1617_v38 = vld [vmem:[#allocation2] sm:$0xf] }
 0x4e3   : > { %v1608_v59 = vsel %vm1011_vm6, %v1604_v20, %v1606_v21  ;;  %1616 = vst.msk [vmem:[#allocation2 + $0x18] sm:$0xf] %vm1070_vm10, %v1606_v21  ;;  %v1671_v43 = vld [vmem:[#allocation2] sm:$0xf] }
 0x4e4   : > { %1615 = vst [vmem:[#allocation2 + $0x10] sm:$0xf] %v1608_v59  ;;  %v1642_v16 = vld [vmem:[#allocation2] sm:$0xf] }
 0x4e5   : > { %v1725_v45 = vld [vmem:[#allocation2] sm:$0xf]  ;;  %v1650_v50 = vrot.slane %v1642_v16, 4 }
 0x4e6   : > { %v1696_v51 = vld [vmem:[#allocation2] sm:$0xf] }
 0x4e7   : > { %v1779_v53 = vld [vmem:[#allocation2] sm:$0xf]  ;;  %v1704_v14 = vrot.slane %v1696_v51, 4  ;;  %v1618_v58 = vld [vmem:[#allocation2 + $0x8] sm:$0xf] }
 0x4e8   : > { %v1833_v44 = vld [vmem:[#allocation2] sm:$0xf]  ;;  %v1672_v52 = vld [vmem:[#allocation2 + $0x8] sm:$0xf] }
 0x4e9   : > { %v1750_v63 = vld [vmem:[#allocation2] sm:$0xf]  ;;  %v1726_v5 = vld [vmem:[#allocation2 + $0x8] sm:$0xf] }
 0x4ea   : > { %v1620_v22 = vld [vmem:[#allocation2 + $0x18] sm:$0xf]  ;;  %v1758_v47 = vrot.slane %v1750_v63, 4  ;;  %v1804_v0 = vld [vmem:[#allocation2] sm:$0xf] }
 0x4eb   : > { %v1645_v23 = vld [vmem:[#allocation2 + $0x18] sm:$0xf]  ;;  %1631 = vrot.lane.b32.xlu1 %v1620_v22, %s4157_s16  ;;  %v1619_v33 = vld [vmem:[#allocation2 + $0x10] sm:$0xf]  ;;  %v1812_v6 = vrot.slane %v1804_v0, 4 }
 0x4ec   : > { %v1653_v24 = vrot.slane %v1645_v23, 4  ;;  %v1699_v27 = vld [vmem:[#allocation2 + $0x18] sm:$0xf]  ;;  %v1673_v18 = vld [vmem:[#allocation2 + $0x10] sm:$0xf] }
 0x4ed   : > { %v1674_v26 = vld [vmem:[#allocation2 + $0x18] sm:$0xf]  ;;  %v1707_v29 = vrot.slane %v1699_v27, 4  ;;  %v1727_v19 = vld [vmem:[#allocation2 + $0x10] sm:$0xf] }
 0x4ee   : > { %1660 = vrot.lane.b32.xlu0 %v1653_v24, %s4158_s17  ;;  %v1753_v31 = vld [vmem:[#allocation2 + $0x18] sm:$0xf]  ;;  %v1781_v60 = vld [vmem:[#allocation2 + $0x10] sm:$0xf]  ;;  %v1780_v8 = vld [vmem:[#allocation2 + $0x8] sm:$0xf] }
 0x4ef   : > { %1685 = vrot.lane.b32.xlu1 %v1674_v26, %s4159_s18  ;;  %v1728_v15 = vld [vmem:[#allocation2 + $0x18] sm:$0xf]  ;;  %v1761_v37 = vrot.slane %v1753_v31, 4  ;;  %v1644_v17 = vld [vmem:[#allocation2 + $0x10] sm:$0xf] }
 0x4f0   : > { %v1807_v41 = vld [vmem:[#allocation2 + $0x18] sm:$0xf]  ;;  %v1643_v1 = vld [vmem:[#allocation2 + $0x8] sm:$0xf]  ;;  %v1652_v20 = vrot.slane %v1644_v17, 4 }
 0x4f1   : > { %v1782_v3 = vld [vmem:[#allocation2 + $0x18] sm:$0xf]  ;;  %v1815_v42 = vrot.slane %v1807_v41, 4  ;;  %v1698_v11 = vld [vmem:[#allocation2 + $0x10] sm:$0xf]  ;;  %v1651_v21 = vrot.slane %v1643_v1, 4 }
 0x4f2   : > { %1714 = vrot.lane.b32.xlu0 %v1707_v29, %s5367_s19  ;;  %v1697_v59 = vld [vmem:[#allocation2 + $0x8] sm:$0xf]  ;;  %v1706_v22 = vrot.slane %v1698_v11, 4  ;;  %v1752_v23 = vld [vmem:[#allocation2 + $0x10] sm:$0xf] }
 0x4f3   : > { %1739 = vrot.lane.b32.xlu1 %v1728_v15, %s5365_s27  ;;  %v1705_v24 = vrot.slane %v1697_v59, 4  ;;  %v1751_v27 = vld [vmem:[#allocation2 + $0x8] sm:$0xf]  ;;  %v1760_v26 = vrot.slane %v1752_v23, 4  ;;  %v1806_v29 = vld [vmem:[#allocation2 + $0x10] sm:$0xf] }
 0x4f4   : > { %v1759_v31 = vrot.slane %v1751_v27, 4  ;;  %v1805_v15 = vld [vmem:[#allocation2 + $0x8] sm:$0xf] }
 0x4f5   : > { %v1813_v41 = vrot.slane %v1805_v15, 4 }
 0x4f6   : > { %1768 = vrot.lane.b32.xlu0 %v1761_v37, %s5363_s20  ;;  %v1814_v37 = vrot.slane %v1806_v29, 4 }
 0x4f7   : > { %1793 = vrot.lane.b32.xlu1 %v1782_v3, %s5361_s23  ;;  %v1834_v3 = vld [vmem:[#allocation2 + $0x8] sm:$0xf] }
 0x4fa   : > { %1822 = vrot.lane.b32.xlu0 %v1815_v42, %s5373_s24  ;;  %v1835_v42 = vld [vmem:[#allocation2 + $0x10] sm:$0xf] }
 0x4fb   : > { %1625 = vrot.lane.b32.xlu1 %v1617_v38, %s4157_s16  ;;  %v1836_v38 = vld [vmem:[#allocation2 + $0x18] sm:$0xf] }
 0x4fe   : > { %1629 = vrot.lane.b32.xlu0 %v1619_v33, %s4157_s16  ;;  %v1883_v33 = vld [vmem:[%s5354_s11] sm:$0xff] }
 0x4ff   : > { %1679 = vrot.lane.b32.xlu1 %v1671_v43, %s4159_s18 }
 0x502   : > { %1683 = vrot.lane.b32.xlu0 %v1673_v18, %s4159_s18 }
 0x503   : > { %1733 = vrot.lane.b32.xlu1 %v1725_v45, %s5365_s27 }
 0x506   : > { %1654 = vrot.lane.b32.xlu0 %v1650_v50, %s4158_s17 }
 0x507   : > { %1787 = vrot.lane.b32.xlu1 %v1779_v53, %s5361_s23 }
 0x50a   : > { %1708 = vrot.lane.b32.xlu0 %v1704_v14, %s5367_s19 }
 0x50b   : > { %1841 = vrot.lane.b32.xlu1 %v1833_v44, %s5374_s25 }
 0x50e   : > { %1737 = vrot.lane.b32.xlu0 %v1727_v19, %s5365_s27 }
 0x50f   : > { %1627 = vrot.lane.b32.xlu1 %v1618_v58, %s4157_s16 }
 0x512   : > { %1791 = vrot.lane.b32.xlu0 %v1781_v60, %s5361_s23 }
 0x513   : > { %1681 = vrot.lane.b32.xlu1 %v1672_v52, %s4159_s18 }
 0x516   : > { %1762 = vrot.lane.b32.xlu0 %v1758_v47, %s5363_s20 }
 0x517   : > { %1735 = vrot.lane.b32.xlu1 %v1726_v5, %s5365_s27 }
 0x51a   : > { %1816 = vrot.lane.b32.xlu0 %v1812_v6, %s5373_s24 }
 0x51b   : > { %1789 = vrot.lane.b32.xlu1 %v1780_v8, %s5361_s23 }
 0x51e   : > { %1658 = vrot.lane.b32.xlu0 %v1652_v20, %s4158_s17 }
 0x51f   : > { %1656 = vrot.lane.b32.xlu1 %v1651_v21, %s4158_s17 }
 0x522   : > { %1712 = vrot.lane.b32.xlu0 %v1706_v22, %s5367_s19 }
 0x523   : > { %1710 = vrot.lane.b32.xlu1 %v1705_v24, %s5367_s19 }
 0x526   : > { %1766 = vrot.lane.b32.xlu0 %v1760_v26, %s5363_s20 }
 0x527   : > { %1764 = vrot.lane.b32.xlu1 %v1759_v31, %s5363_s20 }
 0x52a   : > { %1820 = vrot.lane.b32.xlu0 %v1814_v37, %s5373_s24 }
 0x52b   : > { %1818 = vrot.lane.b32.xlu1 %v1813_v41, %s5373_s24 }
 0x52e   : > { %1843 = vrot.lane.b32.xlu0 %v1834_v3, %s5374_s25 }
 0x52f   : > { %1845 = vrot.lane.b32.xlu1 %v1835_v42, %s5374_s25 }
 0x532   : > { %1847 = vrot.lane.b32.xlu0 %v1836_v38, %s5374_s25 }
 0x533   : > { %1886 = vperm.xlu1 %4091, %v1883_v33  }
 0x55d   : > { %v1632_v43 = vpop.permute.xlu1 %1631 }
 0x560   : > { %v1661_v18 = vpop.permute.xlu0 %1660 }
 0x561   : > { %v1686_v16 = vpop.permute.xlu1 %1685 }
 0x564   : > { %v1715_v45 = vpop.permute.xlu0 %1714 }
 0x565   : > { %v1740_v50 = vpop.permute.xlu1 %1739 }
 0x568   : > { %v1769_v51 = vpop.permute.xlu0 %1768 }
 0x569   : > { %v1794_v53 = vpop.permute.xlu1 %1793 }
 0x56c   : > { %v4738_v14 = vpop.permute.xlu0 %1822 }
 0x56d   : > { %v1626_v44 = vpop.permute.xlu1 %1625 }
 0x570   : > { %v1630_v19 = vpop.permute.xlu0 %1629 }
 0x571   : > { %v1635_v58 = vsel %vm472_vm2, %v1630_v19, %v1632_v43  ;;  %v1680_v60 = vpop.permute.xlu1 %1679 }
 0x572   : > { %1641 = vst [vmem:[#allocation3 + $0x10] sm:$0xf] %v1635_v58 }
 0x574   : > { %v1684_v63 = vpop.permute.xlu0 %1683 }
 0x575   : > { %v1689_v52 = vsel %vm520_vm3, %v1684_v63, %v1686_v16  ;;  %v1734_v47 = vpop.permute.xlu1 %1733 }
 0x576   : > { %1695 = vst [vmem:[#allocation3 + $0x28] sm:$0xf] %v1689_v52 }
 0x578   : > { %v1655_v0 = vpop.permute.xlu0 %1654 }
 0x579   : > { %v1788_v5 = vpop.permute.xlu1 %1787 }
 0x57c   : > { %v1709_v6 = vpop.permute.xlu0 %1708 }
 0x57d   : > { %v4742_v17 = vpop.permute.xlu1 %1841 }
 0x580   : > { %v1738_v8 = vpop.permute.xlu0 %1737 }
 0x581   : > { %v1743_v1 = vsel %vm568_vm0, %v1738_v8, %v1740_v50  ;;  %v1628_v20 = vpop.permute.xlu1 %1627 }
 0x582   : > { %1749 = vst [vmem:[#allocation3 + $0x40] sm:$0xf] %v1743_v1  ;;  %v1633_v11 = vsel %vm472_vm2, %v1626_v44, %v1628_v20  ;;  %v1634_v21 = vsel %vm472_vm2, %v1628_v20, %v1630_v19 }
 0x583   : > { %1639 = vst [vmem:[#allocation3] sm:$0xf] %v1633_v11  ;;  %1640 = vst [vmem:[#allocation3 + $0x8] sm:$0xf] %v1634_v21 }
 0x584   : > { %v1792_v59 = vpop.permute.xlu0 %1791 }
 0x585   : > { %v1797_v22 = vsel %vm616_vm8, %v1792_v59, %v1794_v53  ;;  %v1682_v23 = vpop.permute.xlu1 %1681 }
 0x586   : > { %1803 = vst [vmem:[#allocation3 + $0x58] sm:$0xf] %v1797_v22  ;;  %v1687_v24 = vsel %vm520_vm3, %v1680_v60, %v1682_v23  ;;  %v1688_v27 = vsel %vm520_vm3, %v1682_v23, %v1684_v63 }
 0x587   : > { %1693 = vst [vmem:[#allocation3 + $0x18] sm:$0xf] %v1687_v24  ;;  %1694 = vst [vmem:[#allocation3 + $0x20] sm:$0xf] %v1688_v27 }
 0x588   : > { %v1763_v26 = vpop.permute.xlu0 %1762 }
 0x589   : > { %v1736_v29 = vpop.permute.xlu1 %1735 }
 0x58a   : > { %v1741_v31 = vsel %vm568_vm0, %v1734_v47, %v1736_v29  ;;  %v1742_v15 = vsel %vm568_vm0, %v1736_v29, %v1738_v8 }
 0x58b   : > { %1747 = vst [vmem:[#allocation3 + $0x30] sm:$0xf] %v1741_v31  ;;  %1748 = vst [vmem:[#allocation3 + $0x38] sm:$0xf] %v1742_v15 }
 0x58c   : > { %v1817_v37 = vpop.permute.xlu0 %1816 }
 0x58d   : > { %v1790_v41 = vpop.permute.xlu1 %1789 }
 0x58e   : > { %v1795_v3 = vsel %vm616_vm8, %v1788_v5, %v1790_v41  ;;  %v1796_v42 = vsel %vm616_vm8, %v1790_v41, %v1792_v59 }
 0x58f   : > { %1801 = vst [vmem:[#allocation3 + $0x48] sm:$0xf] %v1795_v3  ;;  %1802 = vst [vmem:[#allocation3 + $0x50] sm:$0xf] %v1796_v42 }
 0x590   : > { %v1659_v38 = vpop.permute.xlu0 %1658 }
 0x591   : > { %v1664_v33 = vsel %vm496_vm5, %v1659_v38, %v1661_v18  ;;  %v1657_v43 = vpop.permute.xlu1 %1656 }
 0x592   : > { %1670 = vst [vmem:[#allocation3 + $0x10] sm:$0xf0] %v1664_v33  ;;  %v1662_v16 = vsel %vm496_vm5, %v1655_v0, %v1657_v43  ;;  %v1663_v50 = vsel %vm496_vm5, %v1657_v43, %v1659_v38 }
 0x593   : > { %1668 = vst [vmem:[#allocation3] sm:$0xf0] %v1662_v16  ;;  %1669 = vst [vmem:[#allocation3 + $0x8] sm:$0xf0] %v1663_v50 }
 0x594   : > { %v1713_v53 = vpop.permute.xlu0 %1712 }
 0x595   : > { %v1718_v44 = vsel %vm544_vm4, %v1713_v53, %v1715_v45  ;;  %v1711_v19 = vpop.permute.xlu1 %1710 }
 0x596   : > { %1724 = vst [vmem:[#allocation3 + $0x28] sm:$0xf0] %v1718_v44  ;;  %v1716_v58 = vsel %vm544_vm4, %v1709_v6, %v1711_v19  ;;  %v1717_v60 = vsel %vm544_vm4, %v1711_v19, %v1713_v53 }
 0x597   : > { %1722 = vst [vmem:[#allocation3 + $0x18] sm:$0xf0] %v1716_v58  ;;  %1723 = vst [vmem:[#allocation3 + $0x20] sm:$0xf0] %v1717_v60 }
 0x598   : > { %v1767_v18 = vpop.permute.xlu0 %1766 }
 0x599   : > { %v1772_v63 = vsel %vm5372_vm7, %v1767_v18, %v1769_v51  ;;  %v1765_v52 = vpop.permute.xlu1 %1764  ;;  %v1860_v6 = vld [vmem:[#allocation3 + $0x10] sm:$0xff] }
 0x59a   : > { %1778 = vst [vmem:[#allocation3 + $0x40] sm:$0xf0] %v1772_v63  ;;  %v1770_v47 = vsel %vm5372_vm7, %v1763_v26, %v1765_v52  ;;  %v1771_v0 = vsel %vm5372_vm7, %v1765_v52, %v1767_v18  ;;  %v1859_v11 = vld [vmem:[#allocation3 + $0x8] sm:$0xff]  ;;  %v1858_v22 = vld [vmem:[#allocation3] sm:$0xff] }
 0x59b   : > { %1776 = vst [vmem:[#allocation3 + $0x30] sm:$0xf0] %v1770_v47  ;;  %1777 = vst [vmem:[#allocation3 + $0x38] sm:$0xf0] %v1771_v0  ;;  %v1882_v52 = vld [vmem:[%s5353_s10] sm:$0xf] }
 0x59c   : > { %v1821_v45 = vpop.permute.xlu0 %1820 }
 0x59d   : > { %v1826_v5 = vsel %vm5371_vm9, %v1821_v45, %v4738_v14  ;;  %v1863_v8 = vld [vmem:[#allocation3 + $0x28] sm:$0xff]  ;;  %v1819_v1 = vpop.permute.xlu1 %1818 }
 0x59e   : > { %1832 = vst [vmem:[#allocation3 + $0x58] sm:$0xf0] %v1826_v5  ;;  %v1875_v20 = vpack.c.bf16 %v1863_v8, %v1860_v6  ;;  %v1824_v51 = vsel %vm5371_vm9, %v1817_v37, %v1819_v1  ;;  %v1825_v21 = vsel %vm5371_vm9, %v1819_v1, %v1821_v45  ;;  %v1862_v59 = vld [vmem:[#allocation3 + $0x20] sm:$0xff]  ;;  %v1861_v23 = vld [vmem:[#allocation3 + $0x18] sm:$0xff] }
 0x59f   : > { %1830 = vst [vmem:[#allocation3 + $0x48] sm:$0xf0] %v1824_v51  ;;  %1831 = vst [vmem:[#allocation3 + $0x50] sm:$0xf0] %v1825_v21  ;;  %v1874_v27 = vpack.c.bf16 %v1862_v59, %v1859_v11  ;;  %v1873_v26 = vpack.c.bf16 %v1861_v23, %v1858_v22 }
 0x5a0   : > { %v1844_v24 = vpop.permute.xlu0 %1843  ;;  %3995 = vmatpush3.bf16.msra.mxu0 %v1875_v20 }
 0x5a1   : > { %v1849_v14 = vsel %vm5370_vm12, %v4742_v17, %v1844_v24  ;;  %3996 = vmatprep.subr.bf16.mxu0 %v4166_v34  ;;  %1901 = vmatprep.subr.bf16.mxu1 %v1874_v27  ;;  %v1846_v29 = vpop.permute.xlu1 %1845  ;;  %v1866_v41 = vld [vmem:[#allocation3 + $0x40] sm:$0xff] }
 0x5a2   : > { %1855 = vst [vmem:[#allocation3 + $0x60] sm:$0xf] %v1849_v14  ;;  %v1850_v31 = vsel %vm5370_vm12, %v1844_v24, %v1846_v29  ;;  %1902 = vmatpush1.bf16.msra.mxu1 %v1873_v26  ;;  %v1865_v38 = vld [vmem:[#allocation3 + $0x38] sm:$0xff]  ;;  %v1864_v43 = vld [vmem:[#allocation3 + $0x30] sm:$0xff] }
 0x5a3   : > { %1856 = vst [vmem:[#allocation3 + $0x68] sm:$0xf] %v1850_v31 }
 0x5a4   : > { %v1848_v15 = vpop.permute.xlu0 %1847 }
 0x5a5   : > { %v1851_v37 = vsel %vm5370_vm12, %v1846_v29, %v1848_v15  ;;  %v1869_v3 = vld [vmem:[#allocation3 + $0x58] sm:$0xff] }
 0x5a6   : > { %1857 = vst [vmem:[#allocation3 + $0x70] sm:$0xf] %v1851_v37  ;;  %v1878_v42 = vpack.c.bf16 %v1869_v3, %v1866_v41  ;;  %v1868_v33 = vld [vmem:[#allocation3 + $0x50] sm:$0xff]  ;;  %v1867_v17 = vld [vmem:[#allocation3 + $0x48] sm:$0xff] }
 0x5a7   : > { %v1877_v16 = vpack.c.bf16 %v1868_v33, %v1865_v38  ;;  %v1876_v50 = vpack.c.bf16 %v1867_v17, %v1864_v43 }
 0x5a8   : > { %3997 = vmatpush3.bf16.msra.mxu0 %v1878_v42 }
 0x5a9   : > { %v1870_v53 = vld [vmem:[#allocation3 + $0x60] sm:$0xf]  ;;  %3998 = vmatprep.subr.bf16.mxu0 %v4166_v34  ;;  %1903 = vmatprep.subr.bf16.mxu1 %v1877_v16 }
 0x5aa   : > { %v1879_v44 = vpack.c.bf16 %v1870_v53, %v1870_v53  ;;  %1904 = vmatpush1.bf16.msra.mxu1 %v1876_v50  ;;  %v1871_v19 = vld [vmem:[#allocation3 + $0x68] sm:$0xf] }
 0x5ab   : > { %v1880_v58 = vpack.c.bf16 %v1871_v19, %v1871_v19 }
 0x5ac   : > { %v1893_v18 = vsel %vm5369_vm14, %v1879_v44, 0 }
 0x5ad   : > { %v1872_v60 = vld [vmem:[#allocation3 + $0x70] sm:$0xf]  ;;  %3914 = vmatprep.subr.msk.bf16.mxu1 %vm5369_vm14, %v1880_v58 }
 0x5ae   : > { %v1881_v63 = vpack.c.bf16 %v1872_v60, %v1872_v60  ;;  %1906 = vmatpush1.bf16.msra.mxu1 %v1893_v18 }
 0x5b0   : > { %v1899_v47 = vsel %vm5369_vm14, %v1881_v63, 0  ;;  %vm2314_vm14 = vcmask 588800  }
 0x5b1   : > { %3999 = vmatpush3.bf16.msra.mxu0 %v1899_v47  ;;  %3915 = vmatmul.mubr.msk.bf16.vlgmr.msra.gmra.mrb[8].mxu1 %vm5360_vm13, %v1882_v52 }
 0x5b2   : > { %4004 = vmatprep.subr.bf16.mxu0 %v4166_v34  ;;  %2359 = vmatprep.mubr.bf16.mxu1 %v4167_v39  ;;  %v1887_v0 = vpop.permute.xlu1 %1886 }
 0x5b4   : > { %4001 = vmatmul.mubr.msk.bf16.vlgmr.msra.gmra.mrb[12].mxu0 %vm5360_vm13, %v1882_v52  ;;  %vm2024_vm13 = vcmask 1047808  }
 0x5b5   : > { %4014 = vmatprep.mubr.msk.bf16.mxu0 %vm4168_vm11, %v4166_v34 }
 0x684   : > { %v1935_v45 = vpop.f32.mrb[8].mxu1 }
 0x685   : > { %v1936_v5 = vadd.f32 %v1935_v45, %v1887_v0  ;;  %v1937_v6 = vpop.f32.mrb[9].mxu1 }
 0x686   : > { %v1938_v8 = vadd.f32 %v1937_v6, %v1887_v0  ;;  %v1939_v1 = vpop.f32.mrb[10].mxu1 }
 0x687   : > { %v1976_v20 = vpop.f32.mrb[12].mxu0  ;;  %v1982_v11 = vmul.f32 %v1936_v5, %v4271_v9  ;;  %v1940_v21 = vpop.f32.mrb[11].mxu1  ;;  %v875_v1 = vld [vmem:[%s5349_s6 + $0x40] sm:$0xff] }
 0x688   : > { %v1977_v51 = vadd.f32 %v1976_v20, %v1887_v0  ;;  %v4002_v59 = vpop.f32.mrb[13].mxu0  ;;  %v1983_v22 = vmul.f32 %v1938_v8, %v4275_v10  ;;  %v876_v20 = vld [vmem:[%s5349_s6 + $0x48] sm:$0xff]  ;;  %v877_v21 = vld [vmem:[%s5349_s6 + $0x50] sm:$0xff] }
 0x689   : > { %v1979_v23 = vpop.f32.mrb[14].mxu0  ;;  %v871_v59 = vld [vmem:[%s5349_s6 + $0x20] sm:$0xff] }
 0x68a   : > { %v1984_v24 = vmul.f32 %v1977_v51, %v4288_v13  ;;  %v4003_v27 = vpop.f32.mrb[15].mxu0  ;;  %v1985_v26 = vadd.f32 %v1983_v22, %v1982_v11  ;;  %v913_v51 = vmul.f32 %v4541_v62, %v876_v20  ;;  %v914_v23 = vmul.f32 %v4551_v4, %v877_v21 }
 0x68b   : > { %v908_v27 = vmul.f32 %v4537_v61, %v871_v59 }
 0x68c   : > { %v1986_v14 = vadd.f32 %v1985_v26, %v1984_v24 }
 0x68e   : > { %1987 = vadd.xlane.f32.xlu0 %v1986_v14  ;;  %v878_v14 = vld [vmem:[%s5349_s6 + $0x58] sm:$0xff] }
 0x71b   : > { %v1988_v29 = vpop.xlane.xlu0 %1987 }
 0x71c   : > { %v1989_v31 = vmul.f32 0.00390625, %v1988_v29  ;;  %v873_v29 = vld [vmem:[%s5349_s6 + $0x30] sm:$0xff] }
 0x71e   : > { %v1990_v15 = vsub.f32 %v1982_v11, %v1989_v31  ;;  %v1991_v37 = vsub.f32 %v1983_v22, %v1989_v31  ;;  %v1992_v41 = vsub.f32 %v1984_v24, %v1989_v31  ;;  %v912_v11 = vmul.f32 %v4537_v61, %v875_v1  ;;  %v872_v22 = vld [vmem:[%s5349_s6 + $0x28] sm:$0xff] }
 0x71f   : > { %v909_v26 = vmul.f32 %v4541_v62, %v872_v22  ;;  %v915_v31 = vmul.f32 %v4559_v2, %v878_v14 }
 0x720   : > { %v1993_v3 = vmul.f32 %v1990_v15, %v4271_v9  ;;  %v1994_v42 = vmul.f32 %v1991_v37, %v4275_v10  ;;  %v1995_v38 = vmul.f32 %v1992_v41, %v4288_v13  ;;  %v930_v24 = vadd.f32 %v913_v51, %v912_v11 }
 0x721   : > { %v910_v37 = vmul.f32 %v4551_v4, %v873_v29  ;;  %v925_v41 = vadd.f32 %v909_v26, %v908_v27 }
 0x722   : > { %v1996_v33 = vmul.f32 %v1993_v3, %v1993_v3  ;;  %v1997_v43 = vmul.f32 %v1994_v42, %v1994_v42  ;;  %v1998_v17 = vmul.f32 %v1995_v38, %v1995_v38  ;;  %v931_v15 = vadd.f32 %v930_v24, %v914_v23 }
 0x724   : > { %v1999_v16 = vadd.f32 %v1997_v43, %v1996_v33  ;;  %v926_v33 = vadd.f32 %v925_v41, %v910_v37 }
 0x726   : > { %v2000_v50 = vadd.f32 %v1999_v16, %v1998_v17 }
 0x728   : > { %2001 = vadd.xlane.f32.xlu1 %v2000_v50 }
 0x7b5   : > { %v2002_v53 = vpop.xlane.xlu1 %2001 }
 0x7b6   : > { %v2003_v44 = vmul.f32 0.00390625, %v2002_v53 }
 0x7b8   : > { %v2004_v19 = vadd.f32 1e-05, %v2003_v44  ;;  %v703_v44 = vld [vmem:[%s5348_s5 + $0x8] sm:$0xff] }
 0x7ba   : > { %4121 = vrsqrt.f32 %v2004_v19 }
 0x7c4   : > { %v4122_v58 = vpop.eup %4121 }
 0x7c5   : > { %v4791_v60 = vmul.f32 %v4122_v58, %v1994_v42  ;;  %v4793_v18 = vmul.f32 %v4122_v58, %v1993_v3  ;;  %v4799_v63 = vmul.f32 %v4122_v58, %v1995_v38  ;;  %v874_v3 = vld [vmem:[%s5349_s6 + $0x38] sm:$0xff]  ;;  %v932_v42 = vadd.f32 %v931_v15, %v915_v31 }
 0x7c6   : > { %v911_v38 = vmul.f32 %v4559_v2, %v874_v3 }
 0x7c7   : > { %2014 = vrot.lane.b32.xlu1 %v4791_v60, %s4156_s15  ;;  %2012 = vrot.lane.b32.xlu0 %v4793_v18, %s4156_s15 }
 0x7c8   : > { %v927_v43 = vadd.f32 %v926_v33, %v911_v38 }
 0x7cb   : > { %2016 = vrot.lane.b32.xlu0 %v4799_v63, %s4156_s15 }
 0x839   : > { %v2013_v52 = vpop.permute.xlu0 %2012  ;;  %v2015_v5 = vpop.permute.xlu1 %2014 }
 0x83a   : > { %2025 = vst.msk [vmem:[#allocation2] sm:$0xff] %vm2024_vm13, %v2013_v52  ;;  %v2018_v8 = vsel %vm1011_vm6, %v2013_v52, %v2015_v5  ;;  %v704_v52 = vld [vmem:[%s5348_s5 + $0x10] sm:$0xff] }
 0x83d   : > { %v2017_v47 = vpop.permute.xlu0 %2016 }
 0x83e   : > { %2028 = vst.msk [vmem:[#allocation2 + $0x18] sm:$0xff] %vm1011_vm6, %v2017_v47  ;;  %v2019_v6 = vsel %vm1011_vm6, %v2015_v5, %v2017_v47 }
 0x841   : > { %v2054_v0 = vld [vmem:[#allocation2] sm:$0xff] }
 0x842   : > { %2062 = vrot.lane.b32.xlu0 %v2054_v0, %s4158_s17  ;;  %2037 = vrot.lane.b32.xlu1 %v2054_v0, %s4157_s16 }
 0x845   : > { %v2057_v45 = vld [vmem:[#allocation2 + $0x18] sm:$0xff] }
 0x846   : > { %2068 = vrot.lane.b32.xlu0 %v2057_v45, %s4158_s17  ;;  %2043 = vrot.lane.b32.xlu1 %v2057_v45, %s4157_s16 }
 0x84a   : > { %2112 = vrot.lane.b32.xlu0 %v2054_v0, %s5367_s19  ;;  %2087 = vrot.lane.b32.xlu1 %v2054_v0, %s4159_s18 }
 0x84e   : > { %2118 = vrot.lane.b32.xlu0 %v2057_v45, %s5367_s19  ;;  %2093 = vrot.lane.b32.xlu1 %v2057_v45, %s4159_s18 }
 0x852   : > { %2162 = vrot.lane.b32.xlu0 %v2054_v0, %s5363_s20  ;;  %2137 = vrot.lane.b32.xlu1 %v2054_v0, %s5365_s27 }
 0x856   : > { %2168 = vrot.lane.b32.xlu0 %v2057_v45, %s5363_s20  ;;  %2143 = vrot.lane.b32.xlu1 %v2057_v45, %s5365_s27 }
 0x85a   : > { %2212 = vrot.lane.b32.xlu0 %v2054_v0, %s5373_s24  ;;  %2187 = vrot.lane.b32.xlu1 %v2054_v0, %s5361_s23 }
 0x85e   : > { %2218 = vrot.lane.b32.xlu0 %v2057_v45, %s5373_s24  ;;  %2193 = vrot.lane.b32.xlu1 %v2057_v45, %s5361_s23 }
 0x862   : > { %2237 = vrot.lane.b32.xlu1 %v2054_v0, %s5374_s25  ;;  %2041 = vrot.lane.b32.xlu0 %v2019_v6, %s4157_s16 }
 0x866   : > { %2039 = vrot.lane.b32.xlu1 %v2018_v8, %s4157_s16  ;;  %2066 = vrot.lane.b32.xlu0 %v2019_v6, %s4158_s17 }
 0x86a   : > { %2064 = vrot.lane.b32.xlu1 %v2018_v8, %s4158_s17  ;;  %2091 = vrot.lane.b32.xlu0 %v2019_v6, %s4159_s18 }
 0x86e   : > { %2089 = vrot.lane.b32.xlu1 %v2018_v8, %s4159_s18  ;;  %2116 = vrot.lane.b32.xlu0 %v2019_v6, %s5367_s19 }
 0x872   : > { %2114 = vrot.lane.b32.xlu1 %v2018_v8, %s5367_s19  ;;  %2141 = vrot.lane.b32.xlu0 %v2019_v6, %s5365_s27 }
 0x876   : > { %2139 = vrot.lane.b32.xlu1 %v2018_v8, %s5365_s27  ;;  %2166 = vrot.lane.b32.xlu0 %v2019_v6, %s5363_s20 }
 0x87a   : > { %2164 = vrot.lane.b32.xlu1 %v2018_v8, %s5363_s20  ;;  %2191 = vrot.lane.b32.xlu0 %v2019_v6, %s5361_s23 }
 0x87e   : > { %2189 = vrot.lane.b32.xlu1 %v2018_v8, %s5361_s23  ;;  %2216 = vrot.lane.b32.xlu0 %v2019_v6, %s5373_s24 }
 0x882   : > { %2214 = vrot.lane.b32.xlu1 %v2018_v8, %s5373_s24  ;;  %2239 = vrot.lane.b32.xlu0 %v2018_v8, %s5374_s25 }
 0x886   : > { %2241 = vrot.lane.b32.xlu1 %v2019_v6, %s5374_s25  ;;  %2243 = vrot.lane.b32.xlu0 %v2057_v45, %s5374_s25  ;;  %v2297_v45 = vld [vmem:[%s5352_s9 + $0x1] sm:$0x1] }
 0x8a5   : > { %933 = vadd.xlane.f32.xlu0 %v932_v42 }
 0x8aa   : > { %928 = vadd.xlane.f32.xlu1 %v927_v43 }
 0x8b4   : > { %v2038_v17 = vpop.permute.xlu1 %2037  ;;  %v2063_v16 = vpop.permute.xlu0 %2062 }
 0x8b8   : > { %v2044_v50 = vpop.permute.xlu1 %2043  ;;  %v2069_v53 = vpop.permute.xlu0 %2068 }
 0x8bb   : > { %713 = vperm.xlu1 %4091, %v703_v44   ;;  %2300 = vperm.xlu0 %4092, %v2297_v45  }
 0x8bc   : > { %v2088_v19 = vpop.permute.xlu1 %2087  ;;  %v2113_v58 = vpop.permute.xlu0 %2112 }
 0x8bf   : > { %718 = vperm.xlu1 %4091, %v704_v52  }
 0x8c0   : > { %v2094_v47 = vpop.permute.xlu1 %2093  ;;  %v2119_v0 = vpop.permute.xlu0 %2118 }
 0x8c4   : > { %v2138_v5 = vpop.permute.xlu1 %2137  ;;  %v2163_v6 = vpop.permute.xlu0 %2162 }
 0x8c8   : > { %v2144_v8 = vpop.permute.xlu1 %2143  ;;  %v2169_v1 = vpop.permute.xlu0 %2168 }
 0x8cc   : > { %v4884_v20 = vpop.permute.xlu1 %2187  ;;  %v4886_v11 = vpop.permute.xlu0 %2212 }
 0x8d0   : > { %v2194_v51 = vpop.permute.xlu1 %2193  ;;  %v2219_v21 = vpop.permute.xlu0 %2218 }
 0x8d4   : > { %v4888_v59 = vpop.permute.xlu1 %2237  ;;  %v2042_v22 = vpop.permute.xlu0 %2041 }
 0x8d5   : > { %v2047_v27 = vsel %vm472_vm2, %v2042_v22, %v2044_v50 }
 0x8d8   : > { %v2040_v23 = vpop.permute.xlu1 %2039  ;;  %v2067_v24 = vpop.permute.xlu0 %2066 }
 0x8d9   : > { %v2072_v26 = vsel %vm496_vm5, %v2067_v24, %v2069_v53  ;;  %v2045_v15 = vsel %vm472_vm2, %v2038_v17, %v2040_v23  ;;  %v2046_v37 = vsel %vm472_vm2, %v2040_v23, %v2042_v22 }
 0x8da   : > { %v2283_v14 = vpack.c.bf16 %v2072_v26, %v2047_v27 }
 0x8dc   : > { %v2065_v29 = vpop.permute.xlu1 %2064  ;;  %v2092_v31 = vpop.permute.xlu0 %2091  ;;  %4005 = vmatpush3.bf16.msra.mxu0 %v2283_v14 }
 0x8dd   : > { %v2070_v41 = vsel %vm496_vm5, %v2063_v16, %v2065_v29  ;;  %v2071_v3 = vsel %vm496_vm5, %v2065_v29, %v2067_v24  ;;  %4006 = vmatprep.subr.bf16.mxu0 %v4166_v34  ;;  %v2097_v50 = vsel %vm520_vm3, %v2092_v31, %v2094_v47 }
 0x8de   : > { %v2282_v42 = vpack.c.bf16 %v2071_v3, %v2046_v37  ;;  %v2281_v38 = vpack.c.bf16 %v2070_v41, %v2045_v15 }
 0x8e0   : > { %v2090_v33 = vpop.permute.xlu1 %2089  ;;  %v2117_v43 = vpop.permute.xlu0 %2116  ;;  %2327 = vmatprep.subr.bf16.mxu1 %v2282_v42 }
 0x8e1   : > { %v2122_v53 = vsel %vm544_vm4, %v2117_v43, %v2119_v0  ;;  %2328 = vmatpush1.bf16.msra.mxu1 %v2281_v38  ;;  %v2095_v16 = vsel %vm520_vm3, %v2088_v19, %v2090_v33  ;;  %v2096_v45 = vsel %vm520_vm3, %v2090_v33, %v2092_v31 }
 0x8e2   : > { %v2286_v44 = vpack.c.bf16 %v2122_v53, %v2097_v50 }
 0x8e4   : > { %v2115_v17 = vpop.permute.xlu1 %2114  ;;  %v2142_v52 = vpop.permute.xlu0 %2141  ;;  %4007 = vmatpush3.bf16.msra.mxu0 %v2286_v44 }
 0x8e5   : > { %v2120_v22 = vsel %vm544_vm4, %v2113_v58, %v2115_v17  ;;  %v2121_v23 = vsel %vm544_vm4, %v2115_v17, %v2117_v43  ;;  %4008 = vmatprep.subr.bf16.mxu0 %v4166_v34  ;;  %v2147_v0 = vsel %vm568_vm0, %v2142_v52, %v2144_v8 }
 0x8e6   : > { %v2285_v24 = vpack.c.bf16 %v2121_v23, %v2096_v45  ;;  %v2284_v27 = vpack.c.bf16 %v2120_v22, %v2095_v16 }
 0x8e8   : > { %v2140_v47 = vpop.permute.xlu1 %2139  ;;  %v2167_v26 = vpop.permute.xlu0 %2166  ;;  %2329 = vmatprep.subr.bf16.mxu1 %v2285_v24 }
 0x8e9   : > { %v2172_v14 = vsel %vm5372_vm7, %v2167_v26, %v2169_v1  ;;  %2330 = vmatpush1.bf16.msra.mxu1 %v2284_v27  ;;  %v2145_v58 = vsel %vm568_vm0, %v2138_v5, %v2140_v47  ;;  %v2146_v31 = vsel %vm568_vm0, %v2140_v47, %v2142_v52 }
 0x8ea   : > { %v2289_v29 = vpack.c.bf16 %v2172_v14, %v2147_v0  ;;  %v941_v0 = vld [vmem:[%s5350_s7 + $0x8] sm:$0xff] }
 0x8ec   : > { %v2165_v19 = vpop.permute.xlu1 %2164  ;;  %v2192_v15 = vpop.permute.xlu0 %2191  ;;  %4009 = vmatpush3.bf16.msra.mxu0 %v2289_v29  ;;  %v942_v29 = vld [vmem:[%s5350_s7 + $0x10] sm:$0xff] }
 0x8ed   : > { %v2170_v37 = vsel %vm5372_vm7, %v2163_v6, %v2165_v19  ;;  %v2171_v41 = vsel %vm5372_vm7, %v2165_v19, %v2167_v26  ;;  %4010 = vmatprep.subr.bf16.mxu0 %v4166_v34  ;;  %v2197_v1 = vsel %vm616_vm8, %v2192_v15, %v2194_v51 }
 0x8ee   : > { %v2288_v3 = vpack.c.bf16 %v2171_v41, %v2146_v31  ;;  %v2287_v42 = vpack.c.bf16 %v2170_v37, %v2145_v58 }
 0x8f0   : > { %v2190_v8 = vpop.permute.xlu1 %2189  ;;  %v2217_v38 = vpop.permute.xlu0 %2216  ;;  %2331 = vmatprep.subr.bf16.mxu1 %v2288_v3 }
 0x8f1   : > { %v2222_v33 = vsel %vm5371_vm9, %v2217_v38, %v2219_v21  ;;  %2332 = vmatpush1.bf16.msra.mxu1 %v2287_v42  ;;  %v2195_v5 = vsel %vm616_vm8, %v4884_v20, %v2190_v8  ;;  %v2196_v53 = vsel %vm616_vm8, %v2190_v8, %v2192_v15 }
 0x8f2   : > { %v2292_v43 = vpack.c.bf16 %v2222_v33, %v2197_v1 }
 0x8f4   : > { %v2215_v50 = vpop.permute.xlu1 %2214  ;;  %v2240_v6 = vpop.permute.xlu0 %2239  ;;  %4011 = vmatpush3.bf16.msra.mxu0 %v2292_v43 }
 0x8f5   : > { %v2220_v44 = vsel %vm5371_vm9, %v4886_v11, %v2215_v50  ;;  %v2221_v17 = vsel %vm5371_vm9, %v2215_v50, %v2217_v38  ;;  %v2245_v51 = vsel %vm5370_vm12, %v4888_v59, %v2240_v6  ;;  %4012 = vmatprep.subr.bf16.mxu0 %v4166_v34  ;;  %v3917_v11 = vld.sshfl [vmem:[%s5351_s8] sm:$0x1 pattern:$0x76325410] }
 0x8f6   : > { %v2291_v21 = vpack.c.bf16 %v2221_v17, %v2196_v53  ;;  %v2290_v52 = vpack.c.bf16 %v2220_v44, %v2195_v5  ;;  %v2293_v20 = vpack.c.bf16 %v2245_v51, %v2245_v51  ;;  %v2312_v26 = vshrl.u32 %v3917_v11, 16 }
 0x8f8   : > { %v2242_v16 = vpop.permute.xlu1 %2241  ;;  %v2244_v45 = vpop.permute.xlu0 %2243  ;;  %2333 = vmatprep.subr.bf16.mxu1 %v2291_v21  ;;  %v2319_v59 = vsel %vm968_vm1, %v2293_v20, 0 }
 0x8f9   : > { %v2246_v22 = vsel %vm5370_vm12, %v2240_v6, %v2242_v16  ;;  %v2247_v23 = vsel %vm5370_vm12, %v2242_v16, %v2244_v45  ;;  %2334 = vmatpush1.bf16.msra.mxu1 %v2290_v52 }
 0x8fa   : > { %v2294_v24 = vpack.c.bf16 %v2246_v22, %v2246_v22  ;;  %v2295_v27 = vpack.c.bf16 %v2247_v23, %v2247_v23 }
 0x8fc   : > { %3918 = vmatprep.subr.msk.bf16.mxu1 %vm968_vm1, %v2294_v24  ;;  %v2325_v47 = vsel %vm968_vm1, %v2295_v27, 0 }
 0x8fd   : > { %2336 = vmatpush1.bf16.msra.mxu1 %v2319_v59  ;;  %4013 = vmatpush3.bf16.msra.mxu0 %v2325_v47 }
 0x8fe   : > { %4018 = vmatprep.subr.bf16.mxu0 %v4166_v34 }
 0x900   : > { %3919 = vmatmul.mubr.msk.bf16.vlgmr.msra.gmra.mrb[12].mxu1 %vm2314_vm14, %v2312_v26  ;;  %4015 = vmatmul.mubr.msk.bf16.vlgmr.msra.gmra.mrb[16].mxu0 %vm2314_vm14, %v2312_v26 }
 0x901   : > { %4028 = vmatprep.mubr.msk.bf16.mxu0 %vm4168_vm11, %v4166_v34  ;;  %2833 = vmatprep.mubr.bf16.mxu1 %v4167_v39 }
 0x932   : > { %v934_v19 = vpop.xlane.xlu0 %933 }
 0x933   : > { %v946_v58 = vadd.f32 %v942_v29, %v934_v19 }
 0x937   : > { %v929_v14 = vpop.xlane.xlu1 %928 }
 0x938   : > { %v945_v15 = vadd.f32 %v941_v0, %v929_v14 }
 0x93a   : > { %2440 = vperm.xlu1 %4091, %v945_v15  }
 0x93b   : > { %v714_v31 = vpop.permute.xlu1 %713 }
 0x93c   : > { %v792_v37 = vadd.f32 %v4632_v30, %v714_v31  ;;  %v794_v41 = vadd.f32 %v4634_v40, %v714_v31  ;;  %v844_v3 = vadd.f32 %v4572_v35, %v714_v31  ;;  %v2301_v40 = vpop.permute.xlu0 %2300 }
 0x93e   : > { %2448 = vperm.xlu1 %4091, %v946_v58   ;;  %v2434_v8 = vmul.f32 %v4799_v63, %v844_v3  ;;  %v2432_v38 = vmul.f32 %v4793_v18, %v792_v37  ;;  %v2433_v5 = vmul.f32 %v4791_v60, %v794_v41 }
 0x93f   : > { %v719_v42 = vpop.permute.xlu1 %718 }
 0x940   : > { %v798_v1 = vadd.f32 %v4646_v36, %v719_v42  ;;  %v800_v33 = vadd.f32 %v4648_v46, %v719_v42  ;;  %v849_v43 = vadd.f32 %v4566_v28, %v719_v42 }
 0x942   : > { %v2437_v50 = vadd.f32 %v2434_v8, %v849_v43  ;;  %v2435_v30 = vadd.f32 %v2432_v38, %v798_v1  ;;  %v2436_v6 = vadd.f32 %v2433_v5, %v800_v33 }
 0x9b9   : > { %v2441_v26 = vpop.permute.xlu1 %2440 }
 0x9ba   : > { %v2443_v19 = vmul.f32 %v2441_v26, %v4793_v18  ;;  %v2444_v37 = vmul.f32 %v2441_v26, %v4791_v60  ;;  %v2445_v41 = vmul.f32 %v2441_v26, %v4799_v63 }
 0x9bd   : > { %v2449_v14 = vpop.permute.xlu1 %2448 }
 0x9be   : > { %v2451_v8 = vadd.f32 %v2449_v14, %v2443_v19  ;;  %v2453_v43 = vadd.f32 %v2449_v14, %v2445_v41  ;;  %v2452_v5 = vadd.f32 %v2449_v14, %v2444_v37 }
 0x9d3   : > { %v2361_v53 = vpop.f32.mrb[12].mxu1  ;;  %v2402_v35 = vpop.f32.mrb[16].mxu0 }
 0x9d4   : > { %v2362_v44 = vadd.f32 %v2361_v53, %v2301_v40  ;;  %v2403_v17 = vadd.f32 %v2402_v35, %v2301_v40  ;;  %v2363_v51 = vpop.f32.mrb[13].mxu1  ;;  %v4016_v21 = vpop.f32.mrb[17].mxu0 }
 0x9d5   : > { %v2364_v52 = vadd.f32 %v2363_v51, %v2301_v40  ;;  %v2405_v16 = vpop.f32.mrb[18].mxu0  ;;  %v2365_v45 = vpop.f32.mrb[14].mxu1 }
 0x9d6   : > { %v3921_v36 = vmul.f32 -1.442695, %v2362_v44  ;;  %v3923_v20 = vmul.f32 -1.442695, %v2403_v17  ;;  %v4017_v46 = vpop.f32.mrb[19].mxu0  ;;  %v2366_v22 = vpop.f32.mrb[15].mxu1 }
 0x9d7   : > { %v3922_v28 = vmul.f32 -1.442695, %v2364_v52 }
 0x9d8   : > { %4123 = vpow2.f32 %v3921_v36 }
 0x9d9   : > { %4125 = vpow2.f32 %v3923_v20 }
 0x9da   : > { %4127 = vpow2.f32 %v3922_v28 }
 0x9e2   : > { %v4124_v23 = vpop.eup %4123 }
 0x9e3   : > { %v4126_v11 = vpop.eup %4125  ;;  %v2417_v24 = vadd.f32 1.0, %v4124_v23 }
 0x9e4   : > { %v4128_v27 = vpop.eup %4127  ;;  %v2419_v59 = vadd.f32 1.0, %v4126_v11 }
 0x9e5   : > { %4129 = vrcp.f32 %v2417_v24  ;;  %v2418_v47 = vadd.f32 1.0, %v4128_v27 }
 0x9e6   : > { %4131 = vrcp.f32 %v2419_v59 }
 0x9e7   : > { %4133 = vrcp.f32 %v2418_v47 }
 0x9ef   : > { %v4130_v0 = vpop.eup %4129 }
 0x9f0   : > { %v4132_v29 = vpop.eup %4131  ;;  %v2454_v15 = vsub.f32 1.0, %v4130_v0  ;;  %v2475_v58 = vrot.slane %v4130_v0, %v4267_v7 }
 0x9f1   : > { %v4134_v31 = vpop.eup %4133  ;;  %v2456_v3 = vsub.f32 1.0, %v4132_v29  ;;  %v2483_v42 = vrot.slane %v4132_v29, %v4267_v7 }
 0x9f2   : > { %v2455_v38 = vsub.f32 1.0, %v4134_v31  ;;  %v2460_v1 = vrot.slane %v2454_v15, %v4267_v7  ;;  %v2479_v33 = vrot.slane %v4134_v31, %v4267_v7  ;;  %v2484_v53 = vmul.f32 %v2475_v58, %v2451_v8 }
 0x9f3   : > { %v2468_v18 = vrot.slane %v2456_v3, %v4267_v7  ;;  %v2486_v44 = vmul.f32 %v2483_v42, %v2453_v43 }
 0x9f4   : > { %v2469_v40 = vmul.f32 %v2460_v1, %v2435_v30  ;;  %v2464_v35 = vrot.slane %v2455_v38, %v4267_v7  ;;  %v2485_v51 = vmul.f32 %v2479_v33, %v2452_v5 }
 0x9f5   : > { %v2471_v60 = vmul.f32 %v2468_v18, %v2437_v50 }
 0x9f6   : > { %v2487_v63 = vadd.f32 %v2484_v53, %v2469_v40  ;;  %v2470_v17 = vmul.f32 %v2464_v35, %v2436_v6 }
 0x9f7   : > { %v2489_v21 = vadd.f32 %v2486_v44, %v2471_v60 }
 0x9f8   : > { %v2488_v52 = vadd.f32 %v2485_v51, %v2470_v17  ;;  %v2490_v36 = vmax.f32 %v2487_v63, 0.0 }
 0x9f9   : > { %v2492_v16 = vmax.f32 %v2489_v21, 0.0 }
 0x9fa   : > { %v2493_v20 = vmul.f32 %v2490_v36, %v4271_v9  ;;  %v2491_v46 = vmax.f32 %v2488_v52, 0.0 }
 0x9fb   : > { %v2495_v45 = vmul.f32 %v2492_v16, %v4288_v13 }
 0x9fc   : > { %v2494_v30 = vmul.f32 %v2491_v46, %v4275_v10 }
 0x9fd   : > { %2503 = vrot.lane.b32.xlu1 %v2495_v45, %s4156_s15 }
 0xa01   : > { %2499 = vrot.lane.b32.xlu1 %v2493_v20, %s4156_s15 }
 0xa05   : > { %2501 = vrot.lane.b32.xlu1 %v2494_v30, %s4156_s15 }
 0xa6f   : > { %v2504_v50 = vpop.permute.xlu1 %2503 }
 0xa70   : > { %2514 = vst.msk [vmem:[#allocation2 + $0x18] sm:$0xff] %vm1011_vm6, %v2504_v50 }
 0xa73   : > { %v2500_v6 = vpop.permute.xlu1 %2499 }
 0xa74   : > { %2511 = vst.msk [vmem:[#allocation2] sm:$0xff] %vm2024_vm13, %v2500_v6  ;;  %vm5379_vm13 = vcmask 1041408  }
 0xa77   : > { %v2502_v22 = vpop.permute.xlu1 %2501  ;;  %v2518_v28 = vld [vmem:[#allocation2 + $0x18] sm:$0xff] }
 0xa78   : > { %v2505_v23 = vsel %vm1011_vm6, %v2500_v6, %v2502_v22  ;;  %v2506_v11 = vsel %vm1011_vm6, %v2502_v22, %v2504_v50  ;;  %2529 = vrot.lane.b32.xlu0 %v2518_v28, %s4157_s16  ;;  %2554 = vrot.lane.b32.xlu1 %v2518_v28, %s4158_s17  ;;  %2885 = vst.msk [vmem:[#allocation2 + $0x18] sm:$0xf] %vm1070_vm10, %v4484_v12 }
 0xa79   : > { %2512 = vst [vmem:[#allocation2 + $0x8] sm:$0xff] %v2505_v23  ;;  %2513 = vst [vmem:[#allocation2 + $0x10] sm:$0xff] %v2506_v11 }
 0xa7a   : > { %2883 = vst [vmem:[#allocation2 + $0x8] sm:$0xf] %v4479_v57  ;;  %2884 = vst [vmem:[#allocation2 + $0x10] sm:$0xf] %v4471_v56 }
 0xa7b   : > { %v2515_v24 = vld [vmem:[#allocation2] sm:$0xff] }
 0xa7c   : > { %2579 = vrot.lane.b32.xlu0 %v2518_v28, %s4159_s18  ;;  %2604 = vrot.lane.b32.xlu1 %v2518_v28, %s5375_s13  ;;  %2882 = vst.msk [vmem:[#allocation2] sm:$0xf] %vm1066_vm15, %v4468_v54 }
 0xa7f   : > { %v2914_v57 = vld [vmem:[#allocation2 + $0x18] sm:$0xf] }
 0xa80   : > { %2629 = vrot.lane.b32.xlu0 %v2518_v28, %s5376_s14  ;;  %2654 = vrot.lane.b32.xlu1 %v2518_v28, %s5377_s26  ;;  %v2922_v12 = vrot.slane %v2914_v57, 4  ;;  %v2889_v27 = vld [vmem:[#allocation2 + $0x18] sm:$0xf] }
 0xa81   : > { %v2968_v59 = vld [vmem:[#allocation2 + $0x18] sm:$0xf]  ;;  %v2888_v31 = vld [vmem:[#allocation2 + $0x10] sm:$0xf]  ;;  %v2887_v53 = vld [vmem:[#allocation2 + $0x8] sm:$0xf] }
 0xa82   : > { %v2976_v47 = vrot.slane %v2968_v59, 4  ;;  %v2943_v26 = vld [vmem:[#allocation2 + $0x18] sm:$0xf]  ;;  %v2942_v41 = vld [vmem:[#allocation2 + $0x10] sm:$0xf] }
 0xa83   : > { %v3022_v0 = vld [vmem:[#allocation2 + $0x18] sm:$0xf]  ;;  %v2886_v37 = vld [vmem:[#allocation2] sm:$0xf]  ;;  %v2996_v18 = vld [vmem:[#allocation2 + $0x10] sm:$0xf] }
 0xa84   : > { %2679 = vrot.lane.b32.xlu0 %v2518_v28, %s5378_s28  ;;  %2704 = vrot.lane.b32.xlu1 %v2518_v28, %s5373_s24  ;;  %v3030_v14 = vrot.slane %v3022_v0, 4  ;;  %v2997_v29 = vld [vmem:[#allocation2 + $0x18] sm:$0xf]  ;;  %v2940_v3 = vld [vmem:[#allocation2] sm:$0xf] }
 0xa85   : > { %v3076_v19 = vld [vmem:[#allocation2 + $0x18] sm:$0xf]  ;;  %v2911_v42 = vld [vmem:[#allocation2] sm:$0xf]  ;;  %v3050_v40 = vld [vmem:[#allocation2 + $0x10] sm:$0xf] }
 0xa86   : > { %v3084_v15 = vrot.slane %v3076_v19, 4  ;;  %v3051_v58 = vld [vmem:[#allocation2 + $0x18] sm:$0xf]  ;;  %v2919_v8 = vrot.slane %v2911_v42, 4  ;;  %v2994_v38 = vld [vmem:[#allocation2] sm:$0xf] }
 0xa87   : > { %v2965_v1 = vld [vmem:[#allocation2] sm:$0xf]  ;;  %v2941_v44 = vld [vmem:[#allocation2 + $0x8] sm:$0xf]  ;;  %v2913_v16 = vld [vmem:[#allocation2 + $0x10] sm:$0xf] }
 0xa88   : > { %2729 = vrot.lane.b32.xlu1 %v2518_v28, %s5374_s25  ;;  %2523 = vrot.lane.b32.xlu0 %v2515_v24, %s4157_s16  ;;  %v2973_v33 = vrot.slane %v2965_v1, 4  ;;  %v3048_v43 = vld [vmem:[#allocation2] sm:$0xf]  ;;  %v2995_v52 = vld [vmem:[#allocation2 + $0x8] sm:$0xf]  ;;  %v2921_v20 = vrot.slane %v2913_v16, 4 }
 0xa89   : > { %v3102_v5 = vld [vmem:[#allocation2] sm:$0xf]  ;;  %v3049_v46 = vld [vmem:[#allocation2 + $0x8] sm:$0xf]  ;;  %v2967_v30 = vld [vmem:[#allocation2 + $0x10] sm:$0xf] }
 0xa8a   : > { %v3019_v35 = vld [vmem:[#allocation2] sm:$0xf]  ;;  %v2912_v50 = vld [vmem:[#allocation2 + $0x8] sm:$0xf]  ;;  %v2975_v28 = vrot.slane %v2967_v30, 4  ;;  %v705_v1 = vld [vmem:[%s5348_s5 + $0x18] sm:$0xff] }
 0xa8b   : > { %v3027_v60 = vrot.slane %v3019_v35, 4  ;;  %v3073_v63 = vld [vmem:[#allocation2] sm:$0xf] }
 0xa8c   : > { %2548 = vrot.lane.b32.xlu1 %v2515_v24, %s4158_s17  ;;  %2573 = vrot.lane.b32.xlu0 %v2515_v24, %s4159_s18  ;;  %v3081_v21 = vrot.slane %v3073_v63, 4  ;;  %v879_v63 = vld [vmem:[%s5349_s6 + $0x60] sm:$0xff] }
 0xa90   : > { %2598 = vrot.lane.b32.xlu1 %v2515_v24, %s5375_s13  ;;  %2623 = vrot.lane.b32.xlu0 %v2515_v24, %s5376_s14 }
 0xa94   : > { %2648 = vrot.lane.b32.xlu1 %v2515_v24, %s5377_s26  ;;  %2673 = vrot.lane.b32.xlu0 %v2515_v24, %s5378_s28 }
 0xa98   : > { %2698 = vrot.lane.b32.xlu1 %v2515_v24, %s5373_s24  ;;  %2723 = vrot.lane.b32.xlu0 %v2515_v24, %s5374_s25  ;;  %v2966_v24 = vld [vmem:[#allocation2 + $0x8] sm:$0xf] }
 0xa99   : > { %v2974_v59 = vrot.slane %v2966_v24, 4 }
 0xa9c   : > { %2527 = vrot.lane.b32.xlu1 %v2506_v11, %s4157_s16  ;;  %2525 = vrot.lane.b32.xlu0 %v2505_v23, %s4157_s16 }
 0xaa0   : > { %2552 = vrot.lane.b32.xlu1 %v2506_v11, %s4158_s17  ;;  %2550 = vrot.lane.b32.xlu0 %v2505_v23, %s4158_s17 }
 0xaa4   : > { %2577 = vrot.lane.b32.xlu1 %v2506_v11, %s4159_s18  ;;  %2575 = vrot.lane.b32.xlu0 %v2505_v23, %s4159_s18 }
 0xaa8   : > { %2602 = vrot.lane.b32.xlu1 %v2506_v11, %s5375_s13  ;;  %2600 = vrot.lane.b32.xlu0 %v2505_v23, %s5375_s13 }
 0xaac   : > { %2627 = vrot.lane.b32.xlu1 %v2506_v11, %s5376_s14  ;;  %2625 = vrot.lane.b32.xlu0 %v2505_v23, %s5376_s14 }
 0xab0   : > { %2652 = vrot.lane.b32.xlu1 %v2506_v11, %s5377_s26  ;;  %2650 = vrot.lane.b32.xlu0 %v2505_v23, %s5377_s26 }
 0xab4   : > { %2677 = vrot.lane.b32.xlu1 %v2506_v11, %s5378_s28  ;;  %2675 = vrot.lane.b32.xlu0 %v2505_v23, %s5378_s28 }
 0xab8   : > { %2702 = vrot.lane.b32.xlu1 %v2506_v11, %s5373_s24  ;;  %2700 = vrot.lane.b32.xlu0 %v2505_v23, %s5373_s24 }
 0xabc   : > { %2725 = vrot.lane.b32.xlu1 %v2505_v23, %s5374_s25  ;;  %2727 = vrot.lane.b32.xlu0 %v2506_v11, %s5374_s25  ;;  %v2920_v23 = vrot.slane %v2912_v50, 4  ;;  %v3021_v11 = vld [vmem:[#allocation2 + $0x10] sm:$0xf] }
 0xac0   : > { %2929 = vrot.lane.b32.xlu1 %v2922_v12, %s4158_s17  ;;  %2900 = vrot.lane.b32.xlu0 %v2889_v27, %s4157_s16  ;;  %v3029_v27 = vrot.slane %v3021_v11, 4 }
 0xac4   : > { %2983 = vrot.lane.b32.xlu1 %v2976_v47, %s5375_s13  ;;  %2954 = vrot.lane.b32.xlu0 %v2943_v26, %s4159_s18  ;;  %v3075_v47 = vld [vmem:[#allocation2 + $0x10] sm:$0xf]  ;;  %v3020_v26 = vld [vmem:[#allocation2 + $0x8] sm:$0xf] }
 0xac5   : > { %v3028_v19 = vrot.slane %v3020_v26, 4 }
 0xac8   : > { %3037 = vrot.lane.b32.xlu1 %v3030_v14, %s5377_s26  ;;  %3008 = vrot.lane.b32.xlu0 %v2997_v29, %s5376_s14  ;;  %v3083_v29 = vrot.slane %v3075_v47, 4 }
 0xacc   : > { %3091 = vrot.lane.b32.xlu1 %v3084_v15, %s5373_s24  ;;  %3062 = vrot.lane.b32.xlu0 %v3051_v58, %s5378_s28  ;;  %v3074_v15 = vld [vmem:[#allocation2 + $0x8] sm:$0xf] }
 0xad0   : > { %2898 = vrot.lane.b32.xlu1 %v2888_v31, %s4157_s16  ;;  %2894 = vrot.lane.b32.xlu0 %v2886_v37, %s4157_s16  ;;  %v3082_v37 = vrot.slane %v3074_v15, 4 }
 0xad4   : > { %2952 = vrot.lane.b32.xlu1 %v2942_v41, %s4159_s18  ;;  %2948 = vrot.lane.b32.xlu0 %v2940_v3, %s4159_s18  ;;  %v3103_v41 = vld [vmem:[#allocation2 + $0x8] sm:$0xf] }
 0xad8   : > { %2923 = vrot.lane.b32.xlu1 %v2919_v8, %s4158_s17  ;;  %3002 = vrot.lane.b32.xlu0 %v2994_v38, %s5376_s14  ;;  %v3105_v8 = vld [vmem:[#allocation2 + $0x18] sm:$0xf]  ;;  %v3104_v38 = vld [vmem:[#allocation2 + $0x10] sm:$0xf] }
 0xadc   : > { %2977 = vrot.lane.b32.xlu1 %v2973_v33, %s5375_s13  ;;  %3056 = vrot.lane.b32.xlu0 %v3048_v43, %s5378_s28 }
 0xae0   : > { %3006 = vrot.lane.b32.xlu1 %v2996_v18, %s5376_s14  ;;  %3110 = vrot.lane.b32.xlu0 %v3102_v5, %s5374_s25 }
 0xae4   : > { %3060 = vrot.lane.b32.xlu1 %v3050_v40, %s5378_s28  ;;  %2896 = vrot.lane.b32.xlu0 %v2887_v53, %s4157_s16 }
 0xae8   : > { %3031 = vrot.lane.b32.xlu1 %v3027_v60, %s5377_s26  ;;  %2950 = vrot.lane.b32.xlu0 %v2941_v44, %s4159_s18 }
 0xaea   : > { %v2530_v17 = vpop.permute.xlu0 %2529  ;;  %v5034_v51 = vpop.permute.xlu1 %2554 }
 0xaec   : > { %3085 = vrot.lane.b32.xlu1 %v3081_v21, %s5373_s24  ;;  %3004 = vrot.lane.b32.xlu0 %v2995_v52, %s5376_s14  ;;  %v880_v21 = vld [vmem:[%s5349_s6 + $0x68] sm:$0xff] }
 0xaee   : > { %v5038_v45 = vpop.permute.xlu0 %2579  ;;  %v5040_v36 = vpop.permute.xlu1 %2604 }
 0xaf0   : > { %2927 = vrot.lane.b32.xlu1 %v2921_v20, %s4158_s17  ;;  %3058 = vrot.lane.b32.xlu0 %v3049_v46, %s5378_s28  ;;  %v916_v20 = vmul.f32 %v4537_v61, %v879_v63  ;;  %v917_v46 = vmul.f32 %v4541_v62, %v880_v21 }
 0xaf2   : > { %v5044_v6 = vpop.permute.xlu0 %2629  ;;  %v5046_v22 = vpop.permute.xlu1 %2654 }
 0xaf4   : > { %2981 = vrot.lane.b32.xlu1 %v2975_v28, %s5375_s13  ;;  %2925 = vrot.lane.b32.xlu0 %v2920_v23, %s4158_s17  ;;  %v881_v28 = vld [vmem:[%s5349_s6 + $0x70] sm:$0xff] }
 0xaf5   : > { %v918_v62 = vmul.f32 %v4551_v4, %v881_v28 }
 0xaf6   : > { %v5050_v57 = vpop.permute.xlu0 %2679  ;;  %v5052_v12 = vpop.permute.xlu1 %2704 }
 0xaf8   : > { %3035 = vrot.lane.b32.xlu1 %v3029_v27, %s5377_s26  ;;  %2979 = vrot.lane.b32.xlu0 %v2974_v59, %s5375_s13  ;;  %v935_v59 = vadd.f32 %v917_v46, %v916_v20 }
 0xafa   : > { %v2524_v0 = vpop.permute.xlu0 %2523  ;;  %v5056_v14 = vpop.permute.xlu1 %2729  ;;  %v936_v15 = vadd.f32 %v935_v59, %v918_v62 }
 0xafc   : > { %3089 = vrot.lane.b32.xlu1 %v3083_v29, %s5373_s24  ;;  %3033 = vrot.lane.b32.xlu0 %v3028_v19, %s5377_s26 }
 0xafe   : > { %v2574_v58 = vpop.permute.xlu0 %2573  ;;  %v2549_v31 = vpop.permute.xlu1 %2548 }
 0xb00   : > { %3112 = vrot.lane.b32.xlu1 %v3103_v41, %s5374_s25  ;;  %3087 = vrot.lane.b32.xlu0 %v3082_v37, %s5373_s24 }
 0xb02   : > { %v5062_v3 = vpop.permute.xlu0 %2623  ;;  %v2599_v42 = vpop.permute.xlu1 %2598 }
 0xb04   : > { %3116 = vrot.lane.b32.xlu1 %v3105_v8, %s5374_s25  ;;  %3114 = vrot.lane.b32.xlu0 %v3104_v38, %s5374_s25 }
 0xb06   : > { %v5069_v33 = vpop.permute.xlu0 %2673  ;;  %v5071_v43 = vpop.permute.xlu1 %2648 }
 0xb08   : > { %723 = vperm.xlu1 %4091, %v705_v1  }
 0xb0a   : > { %v5073_v18 = vpop.permute.xlu0 %2723  ;;  %v5075_v5 = vpop.permute.xlu1 %2698 }
 0xb0e   : > { %v2526_v40 = vpop.permute.xlu0 %2525  ;;  %v2528_v53 = vpop.permute.xlu1 %2527 }
 0xb0f   : > { %v2531_v35 = vsel %vm472_vm2, %v2524_v0, %v2526_v40  ;;  %v2532_v60 = vsel %vm472_vm2, %v2526_v40, %v2528_v53  ;;  %v2533_v44 = vsel %vm472_vm2, %v2528_v53, %v2530_v17  ;;  %v882_v0 = vld [vmem:[%s5349_s6 + $0x78] sm:$0xff] }
 0xb10   : > { %2537 = vst [vmem:[#allocation3] sm:$0xff] %v2531_v35  ;;  %2538 = vst [vmem:[#allocation3 + $0x8] sm:$0xff] %v2532_v60  ;;  %v919_v19 = vmul.f32 %v4559_v2, %v882_v0 }
 0xb11   : > { %2539 = vst [vmem:[#allocation3 + $0x10] sm:$0xff] %v2533_v44 }
 0xb12   : > { %v2551_v52 = vpop.permute.xlu0 %2550  ;;  %v2553_v16 = vpop.permute.xlu1 %2552  ;;  %v937_v40 = vadd.f32 %v936_v15, %v919_v19 }
 0xb13   : > { %v2556_v30 = vsel %vm496_vm5, %v2549_v31, %v2551_v52  ;;  %v2557_v17 = vsel %vm496_vm5, %v2551_v52, %v2553_v16  ;;  %v2558_v50 = vsel %vm496_vm5, %v2553_v16, %v5034_v51 }
 0xb14   : > { %2562 = vst [vmem:[#allocation3 + $0x18] sm:$0xff] %v2556_v30  ;;  %2563 = vst [vmem:[#allocation3 + $0x20] sm:$0xff] %v2557_v17  ;;  %v2768_v23 = vpack.c.bf16 %v2557_v17, %v2532_v60  ;;  %v2769_v11 = vpack.c.bf16 %v2558_v50, %v2533_v44  ;;  %v2767_v24 = vpack.c.bf16 %v2556_v30, %v2531_v35 }
 0xb15   : > { %2564 = vst [vmem:[#allocation3 + $0x28] sm:$0xff] %v2558_v50 }
 0xb16   : > { %v2576_v61 = vpop.permute.xlu0 %2575  ;;  %v2578_v27 = vpop.permute.xlu1 %2577  ;;  %2801 = vmatprep.subr.bf16.mxu1 %v2768_v23  ;;  %4019 = vmatpush3.bf16.msra.mxu0 %v2769_v11 }
 0xb17   : > { %v2581_v47 = vsel %vm520_vm3, %v2574_v58, %v2576_v61  ;;  %v2582_v51 = vsel %vm520_vm3, %v2576_v61, %v2578_v27  ;;  %v2583_v26 = vsel %vm520_vm3, %v2578_v27, %v5038_v45  ;;  %2802 = vmatpush1.bf16.msra.mxu1 %v2767_v24  ;;  %4020 = vmatprep.subr.bf16.mxu0 %v4166_v34 }
 0xb18   : > { %2587 = vst [vmem:[#allocation3 + $0x30] sm:$0xff] %v2581_v47  ;;  %2588 = vst [vmem:[#allocation3 + $0x38] sm:$0xff] %v2582_v51 }
 0xb19   : > { %2589 = vst [vmem:[#allocation3 + $0x40] sm:$0xff] %v2583_v26 }
 0xb1a   : > { %v2601_v29 = vpop.permute.xlu0 %2600  ;;  %v2603_v4 = vpop.permute.xlu1 %2602 }
 0xb1b   : > { %v2606_v58 = vsel %vm544_vm4, %v2599_v42, %v2601_v29  ;;  %v2607_v31 = vsel %vm544_vm4, %v2601_v29, %v2603_v4  ;;  %v2608_v45 = vsel %vm544_vm4, %v2603_v4, %v5040_v36 }
 0xb1c   : > { %2612 = vst [vmem:[#allocation3 + $0x48] sm:$0xff] %v2606_v58  ;;  %2613 = vst [vmem:[#allocation3 + $0x50] sm:$0xff] %v2607_v31  ;;  %v2771_v37 = vpack.c.bf16 %v2607_v31, %v2582_v51  ;;  %v2772_v41 = vpack.c.bf16 %v2608_v45, %v2583_v26  ;;  %v2770_v8 = vpack.c.bf16 %v2606_v58, %v2581_v47 }
 0xb1d   : > { %2614 = vst [vmem:[#allocation3 + $0x58] sm:$0xff] %v2608_v45 }
 0xb1e   : > { %v2626_v38 = vpop.permute.xlu0 %2625  ;;  %v2628_v1 = vpop.permute.xlu1 %2627  ;;  %2803 = vmatprep.subr.bf16.mxu1 %v2771_v37  ;;  %4021 = vmatpush3.bf16.msra.mxu0 %v2772_v41 }
 0xb1f   : > { %v2631_v2 = vsel %vm568_vm0, %v5062_v3, %v2626_v38  ;;  %v2632_v42 = vsel %vm568_vm0, %v2626_v38, %v2628_v1  ;;  %v2633_v53 = vsel %vm568_vm0, %v2628_v1, %v5044_v6  ;;  %2804 = vmatpush1.bf16.msra.mxu1 %v2770_v8  ;;  %4022 = vmatprep.subr.bf16.mxu0 %v4166_v34 }
 0xb20   : > { %2637 = vst [vmem:[#allocation3 + $0x60] sm:$0xff] %v2631_v2  ;;  %2638 = vst [vmem:[#allocation3 + $0x68] sm:$0xff] %v2632_v42 }
 0xb21   : > { %2639 = vst [vmem:[#allocation3 + $0x70] sm:$0xff] %v2633_v53 }
 0xb22   : > { %v2651_v36 = vpop.permute.xlu0 %2650  ;;  %v2653_v35 = vpop.permute.xlu1 %2652 }
 0xb23   : > { %v2656_v60 = vsel %vm5372_vm7, %v5071_v43, %v2651_v36  ;;  %v2657_v44 = vsel %vm5372_vm7, %v2651_v36, %v2653_v35  ;;  %v2658_v3 = vsel %vm5372_vm7, %v2653_v35, %v5046_v22  ;;  %938 = vadd.xlane.f32.xlu0 %v937_v40 }
 0xb24   : > { %v2774_v63 = vpack.c.bf16 %v2657_v44, %v2632_v42  ;;  %v2775_v21 = vpack.c.bf16 %v2658_v3, %v2633_v53  ;;  %v2773_v6 = vpack.c.bf16 %v2656_v60, %v2631_v2 }
 0xb26   : > { %v2676_v52 = vpop.permute.xlu0 %2675  ;;  %v2678_v16 = vpop.permute.xlu1 %2677  ;;  %2805 = vmatprep.subr.bf16.mxu1 %v2774_v63  ;;  %4023 = vmatpush3.bf16.msra.mxu0 %v2775_v21 }
 0xb27   : > { %v2681_v20 = vsel %vm616_vm8, %v5069_v33, %v2676_v52  ;;  %v2682_v46 = vsel %vm616_vm8, %v2676_v52, %v2678_v16  ;;  %v2683_v43 = vsel %vm616_vm8, %v2678_v16, %v5050_v57  ;;  %2806 = vmatpush1.bf16.msra.mxu1 %v2773_v6  ;;  %4024 = vmatprep.subr.bf16.mxu0 %v4166_v34 }
 0xb2a   : > { %v2701_v22 = vpop.permute.xlu0 %2700  ;;  %v2703_v30 = vpop.permute.xlu1 %2702 }
 0xb2b   : > { %v2706_v17 = vsel %vm5371_vm9, %v5075_v5, %v2701_v22  ;;  %v2707_v50 = vsel %vm5371_vm9, %v2701_v22, %v2703_v30  ;;  %v2708_v28 = vsel %vm5371_vm9, %v2703_v30, %v5052_v12 }
 0xb2c   : > { %v2777_v23 = vpack.c.bf16 %v2707_v50, %v2682_v46  ;;  %v2778_v33 = vpack.c.bf16 %v2708_v28, %v2683_v43  ;;  %v2776_v11 = vpack.c.bf16 %v2706_v17, %v2681_v20 }
 0xb2e   : > { %v2728_v24 = vpop.permute.xlu0 %2727  ;;  %v2726_v61 = vpop.permute.xlu1 %2725  ;;  %2807 = vmatprep.subr.bf16.mxu1 %v2777_v23  ;;  %4025 = vmatpush3.bf16.msra.mxu0 %v2778_v33 }
 0xb2f   : > { %v2733_v57 = vsel %vm5370_vm12, %v2728_v24, %v5056_v14  ;;  %v2731_v27 = vsel %vm5370_vm12, %v5073_v18, %v2726_v61  ;;  %v2732_v5 = vsel %vm5370_vm12, %v2726_v61, %v2728_v24  ;;  %2808 = vmatpush1.bf16.msra.mxu1 %v2776_v11  ;;  %4026 = vmatprep.subr.bf16.mxu0 %v4166_v34  ;;  %v2782_v14 = vld [vmem:[%s5353_s10 + $0x4] sm:$0xf] }
 0xb30   : > { %v2780_v62 = vpack.c.bf16 %v2732_v5, %v2732_v5  ;;  %v2779_v12 = vpack.c.bf16 %v2731_v27, %v2731_v27  ;;  %v2781_v59 = vpack.c.bf16 %v2733_v57, %v2733_v57 }
 0xb32   : > { %v2901_v47 = vpop.permute.xlu0 %2900  ;;  %v2930_v51 = vpop.permute.xlu1 %2929  ;;  %3924 = vmatprep.subr.msk.bf16.mxu1 %vm968_vm1, %v2780_v62  ;;  %v2793_v26 = vsel %vm968_vm1, %v2779_v12, 0  ;;  %v2799_v0 = vsel %vm968_vm1, %v2781_v59, 0 }
 0xb33   : > { %2810 = vmatpush1.bf16.msra.mxu1 %v2793_v26  ;;  %4027 = vmatpush3.bf16.msra.mxu0 %v2799_v0 }
 0xb34   : > { %4032 = vmatprep.subr.bf16.mxu0 %v4166_v34 }
 0xb36   : > { %v2955_v18 = vpop.permute.xlu0 %2954  ;;  %v2984_v29 = vpop.permute.xlu1 %2983  ;;  %4029 = vmatmul.mubr.msk.bf16.vlgmr.msra.gmra.mrb[20].mxu0 %vm2314_vm14, %v2782_v14  ;;  %3925 = vmatmul.mubr.msk.bf16.vlgmr.msra.gmra.mrb[16].mxu1 %vm2314_vm14, %v2782_v14  ;;  %vm5380_vm14 = vmmov %vm5379_vm13 }
 0xb37   : > { %3211 = vmatprep.mubr.bf16.mxu1 %v4167_v39  ;;  %4038 = vmatprep.mubr.msk.bf16.mxu0 %vm4168_vm11, %v4166_v34 }
 0xb3a   : > { %v3009_v4 = vpop.permute.xlu0 %3008  ;;  %v3038_v19 = vpop.permute.xlu1 %3037 }
 0xb3e   : > { %v3063_v15 = vpop.permute.xlu0 %3062  ;;  %v5149_v58 = vpop.permute.xlu1 %3091 }
 0xb42   : > { %v2895_v31 = vpop.permute.xlu0 %2894  ;;  %v2899_v45 = vpop.permute.xlu1 %2898 }
 0xb43   : > { %v2904_v37 = vsel %vm472_vm2, %v2899_v45, %v2901_v47 }
 0xb44   : > { %2910 = vst [vmem:[#allocation3 + $0x10] sm:$0xf] %v2904_v37 }
 0xb46   : > { %v2949_v41 = vpop.permute.xlu0 %2948  ;;  %v2953_v8 = vpop.permute.xlu1 %2952 }
 0xb47   : > { %v2958_v38 = vsel %vm520_vm3, %v2953_v8, %v2955_v18 }
 0xb48   : > { %2964 = vst [vmem:[#allocation3 + $0x28] sm:$0xf] %v2958_v38 }
 0xb4a   : > { %v3003_v1 = vpop.permute.xlu0 %3002  ;;  %v2924_v40 = vpop.permute.xlu1 %2923 }
 0xb4e   : > { %v3057_v2 = vpop.permute.xlu0 %3056  ;;  %v2978_v42 = vpop.permute.xlu1 %2977 }
 0xb52   : > { %v5153_v53 = vpop.permute.xlu0 %3110  ;;  %v3007_v36 = vpop.permute.xlu1 %3006 }
 0xb53   : > { %v3012_v35 = vsel %vm568_vm0, %v3007_v36, %v3009_v4 }
 0xb54   : > { %3018 = vst [vmem:[#allocation3 + $0x40] sm:$0xf] %v3012_v35 }
 0xb56   : > { %v2897_v60 = vpop.permute.xlu0 %2896  ;;  %v3061_v44 = vpop.permute.xlu1 %3060 }
 0xb57   : > { %v2902_v3 = vsel %vm472_vm2, %v2895_v31, %v2897_v60  ;;  %v2903_v63 = vsel %vm472_vm2, %v2897_v60, %v2899_v45  ;;  %v3066_v21 = vsel %vm616_vm8, %v3061_v44, %v3063_v15 }
 0xb58   : > { %2908 = vst [vmem:[#allocation3] sm:$0xf] %v2902_v3  ;;  %2909 = vst [vmem:[#allocation3 + $0x8] sm:$0xf] %v2903_v63 }
 0xb59   : > { %3072 = vst [vmem:[#allocation3 + $0x58] sm:$0xf] %v3066_v21 }
 0xb5a   : > { %v2951_v6 = vpop.permute.xlu0 %2950  ;;  %v3032_v52 = vpop.permute.xlu1 %3031 }
 0xb5b   : > { %v2956_v16 = vsel %vm520_vm3, %v2949_v41, %v2951_v6  ;;  %v2957_v20 = vsel %vm520_vm3, %v2951_v6, %v2953_v8 }
 0xb5c   : > { %2962 = vst [vmem:[#allocation3 + $0x18] sm:$0xf] %v2956_v16  ;;  %2963 = vst [vmem:[#allocation3 + $0x20] sm:$0xf] %v2957_v20 }
 0xb5e   : > { %v3005_v46 = vpop.permute.xlu0 %3004  ;;  %v3086_v43 = vpop.permute.xlu1 %3085 }
 0xb5f   : > { %v3010_v22 = vsel %vm568_vm0, %v3003_v1, %v3005_v46  ;;  %v3011_v30 = vsel %vm568_vm0, %v3005_v46, %v3007_v36 }
 0xb60   : > { %3016 = vst [vmem:[#allocation3 + $0x30] sm:$0xf] %v3010_v22  ;;  %3017 = vst [vmem:[#allocation3 + $0x38] sm:$0xf] %v3011_v30 }
 0xb61   : > { %v3927_v22 = vld.sshfl [vmem:[%s5351_s8] sm:$0x2 pattern:$0x76325410] }
 0xb62   : > { %v3059_v17 = vpop.permute.xlu0 %3058  ;;  %v2928_v50 = vpop.permute.xlu1 %2927 }
 0xb63   : > { %v3064_v28 = vsel %vm616_vm8, %v3057_v2, %v3059_v17  ;;  %v3065_v23 = vsel %vm616_vm8, %v3059_v17, %v3061_v44  ;;  %v2933_v33 = vsel %vm496_vm5, %v2928_v50, %v2930_v51 }
 0xb64   : > { %3070 = vst [vmem:[#allocation3 + $0x48] sm:$0xf] %v3064_v28  ;;  %3071 = vst [vmem:[#allocation3 + $0x50] sm:$0xf] %v3065_v23 }
 0xb65   : > { %2939 = vst [vmem:[#allocation3 + $0x10] sm:$0xf0] %v2933_v33 }
 0xb66   : > { %v2926_v11 = vpop.permute.xlu0 %2925  ;;  %v2982_v24 = vpop.permute.xlu1 %2981 }
 0xb67   : > { %v2931_v61 = vsel %vm496_vm5, %v2924_v40, %v2926_v11  ;;  %v2932_v57 = vsel %vm496_vm5, %v2926_v11, %v2928_v50  ;;  %v2987_v27 = vsel %vm544_vm4, %v2982_v24, %v2984_v29  ;;  %v3166_v11 = vrot.slane %v3927_v22, 1 }
 0xb68   : > { %2937 = vst [vmem:[#allocation3] sm:$0xf0] %v2931_v61  ;;  %2938 = vst [vmem:[#allocation3 + $0x8] sm:$0xf0] %v2932_v57 }
 0xb69   : > { %2993 = vst [vmem:[#allocation3 + $0x28] sm:$0xf0] %v2987_v27 }
 0xb6a   : > { %v2980_v5 = vpop.permute.xlu0 %2979  ;;  %v3036_v62 = vpop.permute.xlu1 %3035 }
 0xb6b   : > { %v2985_v12 = vsel %vm544_vm4, %v2978_v42, %v2980_v5  ;;  %v2986_v59 = vsel %vm544_vm4, %v2980_v5, %v2982_v24  ;;  %v3041_v47 = vsel %vm5372_vm7, %v3036_v62, %v3038_v19  ;;  %v943_v5 = vld [vmem:[%s5350_s7 + $0x18] sm:$0xff] }
 0xb6c   : > { %2991 = vst [vmem:[#allocation3 + $0x18] sm:$0xf0] %v2985_v12  ;;  %2992 = vst [vmem:[#allocation3 + $0x20] sm:$0xf0] %v2986_v59  ;;  %v3129_v29 = vld [vmem:[#allocation3 + $0x10] sm:$0xff] }
 0xb6d   : > { %3047 = vst [vmem:[#allocation3 + $0x40] sm:$0xf0] %v3041_v47 }
 0xb6e   : > { %v3034_v51 = vpop.permute.xlu0 %3033  ;;  %v3090_v26 = vpop.permute.xlu1 %3089 }
 0xb6f   : > { %v3039_v0 = vsel %vm5372_vm7, %v3032_v52, %v3034_v51  ;;  %v3040_v14 = vsel %vm5372_vm7, %v3034_v51, %v3036_v62  ;;  %v3095_v18 = vsel %vm5371_vm9, %v3090_v26, %v5149_v58  ;;  %v3128_v45 = vld [vmem:[#allocation3 + $0x8] sm:$0xff]  ;;  %v3127_v1 = vld [vmem:[#allocation3] sm:$0xff] }
 0xb70   : > { %v3132_v4 = vld [vmem:[#allocation3 + $0x28] sm:$0xff]  ;;  %3045 = vst [vmem:[#allocation3 + $0x30] sm:$0xf0] %v3039_v0  ;;  %3046 = vst [vmem:[#allocation3 + $0x38] sm:$0xf0] %v3040_v14 }
 0xb71   : > { %3101 = vst [vmem:[#allocation3 + $0x58] sm:$0xf0] %v3095_v18  ;;  %v3144_v15 = vpack.c.bf16 %v3132_v4, %v3129_v29 }
 0xb72   : > { %v3088_v31 = vpop.permute.xlu0 %3087  ;;  %v3113_v19 = vpop.permute.xlu1 %3112 }
 0xb73   : > { %4033 = vmatpush3.bf16.msra.mxu0 %v3144_v15  ;;  %v3093_v37 = vsel %vm5371_vm9, %v3086_v43, %v3088_v31  ;;  %v3094_v41 = vsel %vm5371_vm9, %v3088_v31, %v3090_v26  ;;  %v3118_v8 = vsel %vm5370_vm12, %v5153_v53, %v3113_v19  ;;  %v3131_v38 = vld [vmem:[#allocation3 + $0x20] sm:$0xff]  ;;  %v3130_v58 = vld [vmem:[#allocation3 + $0x18] sm:$0xff]  ;;  %vm5382_vm9 = vcmask 293888  }
 0xb74   : > { %4034 = vmatprep.subr.bf16.mxu0 %v4166_v34  ;;  %3099 = vst [vmem:[#allocation3 + $0x48] sm:$0xf0] %v3093_v37  ;;  %3100 = vst [vmem:[#allocation3 + $0x50] sm:$0xf0] %v3094_v41  ;;  %v3143_v40 = vpack.c.bf16 %v3131_v38, %v3128_v45  ;;  %v3142_v2 = vpack.c.bf16 %v3130_v58, %v3127_v1  ;;  %v3135_v44 = vld [vmem:[#allocation3 + $0x40] sm:$0xff] }
 0xb75   : > { %3124 = vst [vmem:[#allocation3 + $0x60] sm:$0xf] %v3118_v8  ;;  %vm5383_vm7 = vmmov %vm5382_vm9 }
 0xb76   : > { %v3115_v42 = vpop.permute.xlu0 %3114  ;;  %3179 = vmatprep.subr.bf16.mxu1 %v3143_v40  ;;  %v3117_v36 = vpop.permute.xlu1 %3116 }
 0xb77   : > { %v3119_v35 = vsel %vm5370_vm12, %v3113_v19, %v3115_v42  ;;  %v3120_v60 = vsel %vm5370_vm12, %v3115_v42, %v3117_v36  ;;  %3180 = vmatpush1.bf16.msra.mxu1 %v3142_v2  ;;  %v3134_v63 = vld [vmem:[#allocation3 + $0x38] sm:$0xff]  ;;  %v3133_v21 = vld [vmem:[#allocation3 + $0x30] sm:$0xff]  ;;  %vm5381_vm12 = vmmov %vm5379_vm13 }
 0xb78   : > { %v3138_v53 = vld [vmem:[#allocation3 + $0x58] sm:$0xff]  ;;  %3125 = vst [vmem:[#allocation3 + $0x68] sm:$0xf] %v3119_v35  ;;  %3126 = vst [vmem:[#allocation3 + $0x70] sm:$0xf] %v3120_v60 }
 0xb79   : > { %v3147_v3 = vpack.c.bf16 %v3138_v53, %v3135_v44 }
 0xb7b   : > { %4035 = vmatpush3.bf16.msra.mxu0 %v3147_v3  ;;  %v3137_v6 = vld [vmem:[#allocation3 + $0x50] sm:$0xff]  ;;  %v3136_v52 = vld [vmem:[#allocation3 + $0x48] sm:$0xff] }
 0xb7c   : > { %4036 = vmatprep.subr.bf16.mxu0 %v4166_v34  ;;  %v3139_v16 = vld [vmem:[#allocation3 + $0x60] sm:$0xf]  ;;  %v3146_v20 = vpack.c.bf16 %v3137_v6, %v3134_v63  ;;  %v3145_v46 = vpack.c.bf16 %v3136_v52, %v3133_v21 }
 0xb7d   : > { %v3148_v43 = vpack.c.bf16 %v3139_v16, %v3139_v16 }
 0xb7e   : > { %3181 = vmatprep.subr.bf16.mxu1 %v3146_v20 }
 0xb7f   : > { %3182 = vmatpush1.bf16.msra.mxu1 %v3145_v46  ;;  %v3140_v30 = vld [vmem:[#allocation3 + $0x68] sm:$0xf]  ;;  %v3141_v17 = vld [vmem:[#allocation3 + $0x70] sm:$0xf]  ;;  %v3171_v23 = vsel %vm5380_vm14, %v3148_v43, 0 }
 0xb80   : > { %v3149_v50 = vpack.c.bf16 %v3140_v30, %v3140_v30  ;;  %v3150_v28 = vpack.c.bf16 %v3141_v17, %v3141_v17 }
 0xb82   : > { %3928 = vmatprep.subr.msk.bf16.mxu1 %vm5379_vm13, %v3149_v50  ;;  %v3177_v33 = vsel %vm5381_vm12, %v3150_v28, 0 }
 0xb83   : > { %3184 = vmatpush1.bf16.msra.mxu1 %v3171_v23  ;;  %4037 = vmatpush3.bf16.msra.mxu0 %v3177_v33 }
 0xb84   : > { %4042 = vmatprep.subr.bf16.mxu0 %v4166_v34 }
 0xb86   : > { %3929 = vmatmul.mubr.msk.bf16.vlgmr.msra.gmra.mrb[20].mxu1 %vm5382_vm9, %v3166_v11  ;;  %4039 = vmatmul.mubr.msk.bf16.vlgmr.msra.gmra.mrb[24].mxu0 %vm5383_vm7, %v3166_v11  ;;  %vm5393_vm9 = vmmov %vm5381_vm12 }
 0xb87   : > { %v724_v24 = vpop.permute.xlu1 %723  ;;  %3756 = vmatprep.mubr.bf16.mxu1 %v4167_v39  ;;  %4048 = vmatprep.mubr.msk.bf16.mxu0 %vm4168_vm11, %v4166_v34  ;;  %vm5394_vm12 = vmmov %vm5393_vm9 }
 0xb88   : > { %v802_v61 = vadd.f32 %v4650_v48, %v724_v24  ;;  %v804_v57 = vadd.f32 %v4652_v49, %v724_v24  ;;  %v852_v27 = vadd.f32 %v4570_v32, %v724_v24  ;;  %v3152_v49 = vld [vmem:[%s5352_s9 + $0x2] sm:$0x1] }
 0xb8a   : > { %864 = vst [vmem:[#allocation4 + $0x48] sm:$0xff] %v802_v61  ;;  %865 = vst [vmem:[#allocation4 + $0x50] sm:$0xff] %v804_v57 }
 0xb8b   : > { %866 = vst [vmem:[#allocation4 + $0x58] sm:$0xff] %v852_v27 }
 0xb91   : > { %v4104_v39 = vld [vmem:[#allocation4 + $0x48] ss:$8 sps:$4 sm:$0xff]   ;;  %v4105_v48 = vld [vmem:[#allocation4 + $0x4c] ss:$8 sps:$4 sm:$0xff]  }
 0xb92   : > { %v3280_v59 = vld [vmem:[#allocation4 + $0x58] sm:$0xf]  ;;  %v4106_v32 = vld [vmem:[#allocation4 + $0x5c] ss:$0 sps:$4 sm:$0xff]  }
 0xbb0   : > { %v939_v62 = vpop.xlane.xlu0 %938 }
 0xbb1   : > { %v947_v12 = vadd.f32 %v943_v5, %v939_v62 }
 0xbb3   : > { %3321 = vperm.xlu1 %4091, %v947_v12  }
 0xbb7   : > { %3288 = vrot.lane.b32.xlu1 %v4104_v39, %s4156_s15 }
 0xbbb   : > { %3290 = vrot.lane.b32.xlu1 %v3280_v59, %s4156_s15 }
 0xbbf   : > { %3306 = vrot.lane.b32.xlu1 %v4105_v48, %s4156_s15 }
 0xbc3   : > { %3308 = vrot.lane.b32.xlu1 %v4106_v32, %s4156_s15 }
 0xbc7   : > { %3155 = vperm.xlu1 %4091, %v3152_v49  }
 0xc32   : > { %v3322_v47 = vpop.permute.xlu1 %3321 }
 0xc33   : > { %v3329_v18 = vrot.slane %v3322_v47, %v4379_v55  ;;  %v3339_v41 = vrot.slane %v3322_v47, %v4666_v25 }
 0xc35   : > { %v3332_v19 = vmul.f32 %v3329_v18, %v4471_v56  ;;  %v3331_v25 = vmul.f32 %v3329_v18, %v4468_v54 }
 0xc36   : > { %v3289_v51 = vpop.permute.xlu1 %3288 }
 0xc37   : > { %v3292_v26 = vrot.slane %v3289_v51, 4  ;;  %v3342_v55 = vadd.f32 %v3339_v41, %v3332_v19  ;;  %v3341_v53 = vadd.f32 %v3339_v41, %v3331_v25 }
 0xc39   : > { %v3294_v29 = vsel %vm1011_vm6, %v3292_v26, %v3289_v51  ;;  %v3394_v60 = vcombine.high %v3342_v55, %v3342_v55 }
 0xc3a   : > { %v3291_v0 = vpop.permute.xlu1 %3290  ;;  %v3299_v45 = vmul.f32 %v3294_v29, %v4468_v54 }
 0xc3b   : > { %v3293_v14 = vrot.slane %v3291_v0, 4 }
 0xc3d   : > { %v3295_v15 = vsel %vm968_vm1, %v3292_v26, %v3293_v14 }
 0xc3e   : > { %v3307_v4 = vpop.permute.xlu1 %3306  ;;  %v3296_v8 = vsel %vm1011_vm6, %v3295_v15, %v3291_v0 }
 0xc3f   : > { %v3310_v31 = vrot.slane %v3307_v4, 4  ;;  %v3300_v2 = vmul.f32 %v3296_v8, %v4471_v56  ;;  %v3393_v56 = vcombine.high %v3341_v53, %v3341_v53 }
 0xc41   : > { %v3312_v37 = vsel %vm1011_vm6, %v3310_v31, %v3307_v4 }
 0xc42   : > { %v3317_v38 = vadd.f32 %v3312_v37, %v3299_v45  ;;  %v3309_v1 = vpop.permute.xlu1 %3308 }
 0xc43   : > { %v3311_v58 = vrot.slane %v3309_v1, 4 }
 0xc44   : > { %v3360_v40 = vcombine.high %v3317_v38, %v3317_v38  ;;  %3362 = vrot.lane.b32.xlu1 %v3317_v38, %s5376_s14 }
 0xc45   : > { %v3313_v42 = vsel %vm968_vm1, %v3310_v31, %v3311_v58 }
 0xc46   : > { %v3314_v36 = vsel %vm1011_vm6, %v3313_v42, %v3309_v1  ;;  %3364 = vrot.lane.b32.xlu0 %v3360_v40, %s5376_s14  ;;  %v3156_v54 = vpop.permute.xlu1 %3155 }
 0xc47   : > { %v3318_v35 = vadd.f32 %v3314_v36, %v3300_v2 }
 0xc49   : > { %3366 = vrot.lane.b32.xlu1 %v3318_v35, %s5376_s14  ;;  %v3361_v44 = vcombine.high %v3318_v35, %v3318_v35 }
 0xc4a   : > { %3401 = vrot.lane.b32.xlu0 %v3394_v60, %s5376_s14 }
 0xc4d   : > { %3368 = vrot.lane.b32.xlu1 %v3361_v44, %s5376_s14 }
 0xc51   : > { %3395 = vrot.lane.b32.xlu1 %v3341_v53, %s5376_s14 }
 0xc55   : > { %3397 = vrot.lane.b32.xlu1 %v3393_v56, %s5376_s14 }
 0xc59   : > { %v3213_v3 = vpop.f32.mrb[20].mxu1  ;;  %v3254_v63 = vpop.f32.mrb[24].mxu0  ;;  %3399 = vrot.lane.b32.xlu1 %v3342_v55, %s5376_s14 }
 0xc5a   : > { %v3215_v21 = vpop.f32.mrb[21].mxu1  ;;  %v4040_v6 = vpop.f32.mrb[25].mxu0  ;;  %v3214_v43 = vadd.f32 %v3213_v3, %v3156_v54  ;;  %v3255_v17 = vadd.f32 %v3254_v63, %v3156_v54 }
 0xc5b   : > { %v3217_v52 = vpop.f32.mrb[22].mxu1  ;;  %v3257_v16 = vpop.f32.mrb[26].mxu0  ;;  %v3216_v22 = vadd.f32 %v3215_v21, %v3156_v54 }
 0xc5c   : > { %v3218_v20 = vpop.f32.mrb[23].mxu1  ;;  %v4041_v46 = vpop.f32.mrb[27].mxu0  ;;  %v3931_v30 = vmul.f32 -1.442695, %v3214_v43  ;;  %v3933_v28 = vmul.f32 -1.442695, %v3255_v17 }
 0xc5d   : > { %v3932_v50 = vmul.f32 -1.442695, %v3216_v22 }
 0xc5e   : > { %4135 = vpow2.f32 %v3931_v30 }
 0xc5f   : > { %4137 = vpow2.f32 %v3932_v50 }
 0xc60   : > { %4139 = vpow2.f32 %v3933_v28 }
 0xc68   : > { %v4136_v23 = vpop.eup %4135 }
 0xc69   : > { %v4138_v33 = vpop.eup %4137  ;;  %v3269_v11 = vadd.f32 1.0, %v4136_v23 }
 0xc6a   : > { %v4140_v24 = vpop.eup %4139  ;;  %v3270_v61 = vadd.f32 1.0, %v4138_v33 }
 0xc6b   : > { %4141 = vrcp.f32 %v3269_v11  ;;  %v3271_v57 = vadd.f32 1.0, %v4140_v24 }
 0xc6c   : > { %4143 = vrcp.f32 %v3270_v61 }
 0xc6d   : > { %4145 = vrcp.f32 %v3271_v57 }
 0xc75   : > { %v4142_v12 = vpop.eup %4141 }
 0xc76   : > { %v4144_v39 = vpop.eup %4143  ;;  %v3343_v48 = vsub.f32 1.0, %v4142_v12  ;;  %v3382_v14 = vrot.slane %v4142_v12, %v4267_v7 }
 0xc77   : > { %v4146_v49 = vpop.eup %4145  ;;  %v3344_v51 = vsub.f32 1.0, %v4144_v39  ;;  %v3386_v38 = vrot.slane %v4144_v39, %v4267_v7 }
 0xc78   : > { %v3349_v26 = vrot.slane %v3343_v48, %v4267_v7  ;;  %v3345_v0 = vsub.f32 1.0, %v4146_v49  ;;  %v3390_v1 = vrot.slane %v4146_v49, %v4267_v7 }
 0xc79   : > { %v3353_v19 = vrot.slane %v3344_v51, %v4267_v7 }
 0xc7a   : > { %v3357_v41 = vrot.slane %v3345_v0, %v4267_v7 }
 0xcb6   : > { %v3363_v27 = vpop.permute.xlu1 %3362 }
 0xcb8   : > { %v3365_v59 = vpop.permute.xlu0 %3364 }
 0xcb9   : > { %v3370_v47 = vsel %vm568_vm0, %v3363_v27, %v3365_v59 }
 0xcba   : > { %v3376_v4 = vmul.f32 %v3370_v47, %v3349_v26 }
 0xcbb   : > { %v3367_v5 = vpop.permute.xlu1 %3366 }
 0xcbc   : > { %v3371_v15 = vsel %vm568_vm0, %v3365_v59, %v3367_v5  ;;  %v3402_v37 = vpop.permute.xlu0 %3401 }
 0xcbd   : > { %v3377_v55 = vmul.f32 %v3371_v15, %v3353_v19 }
 0xcbf   : > { %v3369_v62 = vpop.permute.xlu1 %3368 }
 0xcc0   : > { %v3372_v45 = vsel %vm568_vm0, %v3367_v5, %v3369_v62 }
 0xcc1   : > { %v3378_v42 = vmul.f32 %v3372_v45, %v3357_v41 }
 0xcc3   : > { %v3396_v32 = vpop.permute.xlu1 %3395 }
 0xcc7   : > { %v3398_v18 = vpop.permute.xlu1 %3397 }
 0xcc8   : > { %v3403_v29 = vsel %vm568_vm0, %v3396_v32, %v3398_v18 }
 0xcc9   : > { %v3409_v31 = vmul.f32 %v3403_v29, %v3382_v14 }
 0xccb   : > { %v3412_v8 = vadd.f32 %v3409_v31, %v3376_v4  ;;  %v3400_v58 = vpop.permute.xlu1 %3399 }
 0xccc   : > { %v3404_v40 = vsel %vm568_vm0, %v3398_v18, %v3400_v58  ;;  %v3405_v2 = vsel %vm568_vm0, %v3400_v58, %v3402_v37 }
 0xccd   : > { %v3415_v36 = vmax.f32 %v3412_v8, 0.0  ;;  %v3410_v35 = vmul.f32 %v3404_v40, %v3386_v38  ;;  %v3411_v60 = vmul.f32 %v3405_v2, %v3390_v1 }
 0xccf   : > { %v3418_v25 = vmul.f32 %v3415_v36, %v4271_v9  ;;  %v3413_v44 = vadd.f32 %v3410_v35, %v3377_v55  ;;  %v3414_v53 = vadd.f32 %v3411_v60, %v3378_v42 }
 0xcd1   : > { %v3416_v56 = vmax.f32 %v3413_v44, 0.0  ;;  %v3417_v3 = vmax.f32 %v3414_v53, 0.0  ;;  %3424 = vrot.lane.b32.xlu1 %v3418_v25, %s4156_s15  ;;  %v2783_v44 = vld [vmem:[%s5354_s11 + $0x8] sm:$0xff]  ;;  %v3706_v53 = vld [vmem:[%s5354_s11 + $0x10] sm:$0xff] }
 0xcd3   : > { %v3419_v7 = vmul.f32 %v3416_v56, %v4275_v10  ;;  %v3420_v63 = vmul.f32 %v3417_v3, %v4288_v13 }
 0xcd5   : > { %3428 = vrot.lane.b32.xlu1 %v3420_v63, %s4156_s15  ;;  %3426 = vrot.lane.b32.xlu0 %v3419_v7, %s4156_s15 }
 0xd43   : > { %v3425_v21 = vpop.permute.xlu1 %3424 }
 0xd44   : > { %3436 = vst.msk [vmem:[#allocation2] sm:$0xf] %vm1066_vm15, %v3425_v21  ;;  %vm5395_vm15 = vmmov %vm5393_vm9 }
 0xd47   : > { %v3427_v6 = vpop.permute.xlu0 %3426  ;;  %v3429_v52 = vpop.permute.xlu1 %3428 }
 0xd48   : > { %v3430_v9 = vsel %vm1011_vm6, %v3425_v21, %v3427_v6  ;;  %v3431_v16 = vsel %vm1011_vm6, %v3427_v6, %v3429_v52  ;;  %3439 = vst.msk [vmem:[#allocation2 + $0x18] sm:$0xf] %vm1070_vm10, %v3429_v52  ;;  %vm5390_vm6 = vcmask 629760   ;;  %vm5396_vm10 = vcmask 293888  }
 0xd49   : > { %3437 = vst [vmem:[#allocation2 + $0x8] sm:$0xf] %v3430_v9  ;;  %3438 = vst [vmem:[#allocation2 + $0x10] sm:$0xf] %v3431_v16 }
 0xd4a   : > { %vm5391_vm7 = vmmov %vm5390_vm6 }
 0xd4b   : > { %v3440_v33 = vld [vmem:[#allocation2] sm:$0xf]  ;;  %vm5397_vm11 = vmmov %vm5396_vm10 }
 0xd4c   : > { %v3494_v24 = vld [vmem:[#allocation2] sm:$0xf] }
 0xd4d   : > { %v3465_v57 = vld [vmem:[#allocation2] sm:$0xf] }
 0xd4e   : > { %v3548_v27 = vld [vmem:[#allocation2] sm:$0xf]  ;;  %v3473_v5 = vrot.slane %v3465_v57, 4 }
 0xd4f   : > { %v3443_v10 = vld [vmem:[#allocation2 + $0x18] sm:$0xf]  ;;  %v3519_v62 = vld [vmem:[#allocation2] sm:$0xf] }
 0xd50   : > { %v3468_v20 = vld [vmem:[#allocation2 + $0x18] sm:$0xf]  ;;  %3454 = vrot.lane.b32.xlu0 %v3443_v10, %s4157_s16  ;;  %v3442_v11 = vld [vmem:[#allocation2 + $0x10] sm:$0xf]  ;;  %v3602_v12 = vld [vmem:[#allocation2] sm:$0xf] }
 0xd51   : > { %v3476_v13 = vrot.slane %v3468_v20, 4  ;;  %v3522_v46 = vld [vmem:[#allocation2 + $0x18] sm:$0xf]  ;;  %v3496_v61 = vld [vmem:[#allocation2 + $0x10] sm:$0xf]  ;;  %v3527_v39 = vrot.slane %v3519_v62, 4 }
 0xd52   : > { %v3497_v54 = vld [vmem:[#allocation2 + $0x18] sm:$0xf]  ;;  %v3530_v43 = vrot.slane %v3522_v46, 4  ;;  %v3656_v59 = vld [vmem:[#allocation2] sm:$0xf] }
 0xd53   : > { %3483 = vrot.lane.b32.xlu1 %v3476_v13, %s4158_s17  ;;  %v3576_v22 = vld [vmem:[#allocation2 + $0x18] sm:$0xf]  ;;  %v3550_v48 = vld [vmem:[#allocation2 + $0x10] sm:$0xf]  ;;  %v3441_v32 = vld [vmem:[#allocation2 + $0x8] sm:$0xf] }
 0xd54   : > { %3508 = vrot.lane.b32.xlu0 %v3497_v54, %s4159_s18  ;;  %v3551_v30 = vld [vmem:[#allocation2 + $0x18] sm:$0xf]  ;;  %v3584_v17 = vrot.slane %v3576_v22, 4  ;;  %v3604_v49 = vld [vmem:[#allocation2 + $0x10] sm:$0xf] }
 0xd55   : > { %v3630_v50 = vld [vmem:[#allocation2 + $0x18] sm:$0xf]  ;;  %v3573_v47 = vld [vmem:[#allocation2] sm:$0xf]  ;;  %v3495_v51 = vld [vmem:[#allocation2 + $0x8] sm:$0xf] }
 0xd56   : > { %v3605_v28 = vld [vmem:[#allocation2 + $0x18] sm:$0xf]  ;;  %v3638_v23 = vrot.slane %v3630_v50, 4  ;;  %v3581_v26 = vrot.slane %v3573_v47, 4  ;;  %v3627_v0 = vld [vmem:[#allocation2] sm:$0xf] }
 0xd57   : > { %3537 = vrot.lane.b32.xlu1 %v3530_v43, %s5375_s13  ;;  %v3549_v14 = vld [vmem:[#allocation2 + $0x8] sm:$0xf]  ;;  %v3635_v18 = vrot.slane %v3627_v0, 4  ;;  %v3467_v29 = vld [vmem:[#allocation2 + $0x10] sm:$0xf] }
 0xd58   : > { %3562 = vrot.lane.b32.xlu0 %v3551_v30, %s5376_s14  ;;  %v3603_v4 = vld [vmem:[#allocation2 + $0x8] sm:$0xf]  ;;  %v3475_v31 = vrot.slane %v3467_v29, 4  ;;  %v3521_v19 = vld [vmem:[#allocation2 + $0x10] sm:$0xf] }
 0xd59   : > { %v3466_v15 = vld [vmem:[#allocation2 + $0x8] sm:$0xf]  ;;  %v3529_v41 = vrot.slane %v3521_v19, 4  ;;  %v3575_v8 = vld [vmem:[#allocation2 + $0x10] sm:$0xf] }
 0xd5a   : > { %v3474_v45 = vrot.slane %v3466_v15, 4  ;;  %v3520_v37 = vld [vmem:[#allocation2 + $0x8] sm:$0xf]  ;;  %v3583_v58 = vrot.slane %v3575_v8, 4  ;;  %v3629_v55 = vld [vmem:[#allocation2 + $0x10] sm:$0xf] }
 0xd5b   : > { %3591 = vrot.lane.b32.xlu1 %v3584_v17, %s5377_s26  ;;  %v3528_v38 = vrot.slane %v3520_v37, 4  ;;  %v3574_v1 = vld [vmem:[#allocation2 + $0x8] sm:$0xf]  ;;  %v3637_v42 = vrot.slane %v3629_v55, 4  ;;  %v3658_v60 = vld [vmem:[#allocation2 + $0x10] sm:$0xf] }
 0xd5c   : > { %3616 = vrot.lane.b32.xlu0 %v3605_v28, %s5378_s28  ;;  %v3582_v40 = vrot.slane %v3574_v1, 4  ;;  %v3628_v2 = vld [vmem:[#allocation2 + $0x8] sm:$0xf]  ;;  %v3659_v25 = vld [vmem:[#allocation2 + $0x18] sm:$0xf] }
 0xd5d   : > { %v3636_v36 = vrot.slane %v3628_v2, 4  ;;  %v3657_v35 = vld [vmem:[#allocation2 + $0x8] sm:$0xf] }
 0xd5f   : > { %3645 = vrot.lane.b32.xlu1 %v3638_v23, %s5373_s24 }
 0xd60   : > { %3448 = vrot.lane.b32.xlu0 %v3440_v33, %s4157_s16 }
 0xd63   : > { %3452 = vrot.lane.b32.xlu1 %v3442_v11, %s4157_s16 }
 0xd64   : > { %3502 = vrot.lane.b32.xlu0 %v3494_v24, %s4159_s18 }
 0xd67   : > { %3506 = vrot.lane.b32.xlu1 %v3496_v61, %s4159_s18 }
 0xd68   : > { %3556 = vrot.lane.b32.xlu0 %v3548_v27, %s5376_s14 }
 0xd6b   : > { %3477 = vrot.lane.b32.xlu1 %v3473_v5, %s4158_s17 }
 0xd6c   : > { %3610 = vrot.lane.b32.xlu0 %v3602_v12, %s5378_s28 }
 0xd6f   : > { %3531 = vrot.lane.b32.xlu1 %v3527_v39, %s5375_s13 }
 0xd70   : > { %3664 = vrot.lane.b32.xlu0 %v3656_v59, %s5374_s25 }
 0xd73   : > { %3560 = vrot.lane.b32.xlu1 %v3550_v48, %s5376_s14 }
 0xd74   : > { %3450 = vrot.lane.b32.xlu0 %v3441_v32, %s4157_s16 }
 0xd77   : > { %3614 = vrot.lane.b32.xlu1 %v3604_v49, %s5378_s28 }
 0xd78   : > { %3504 = vrot.lane.b32.xlu0 %v3495_v51, %s4159_s18 }
 0xd7b   : > { %3585 = vrot.lane.b32.xlu1 %v3581_v26, %s5377_s26 }
 0xd7c   : > { %3558 = vrot.lane.b32.xlu0 %v3549_v14, %s5376_s14 }
 0xd7f   : > { %3639 = vrot.lane.b32.xlu1 %v3635_v18, %s5373_s24 }
 0xd80   : > { %3612 = vrot.lane.b32.xlu0 %v3603_v4, %s5378_s28 }
 0xd83   : > { %3481 = vrot.lane.b32.xlu1 %v3475_v31, %s4158_s17 }
 0xd84   : > { %3479 = vrot.lane.b32.xlu0 %v3474_v45, %s4158_s17 }
 0xd87   : > { %3535 = vrot.lane.b32.xlu1 %v3529_v41, %s5375_s13 }
 0xd88   : > { %3533 = vrot.lane.b32.xlu0 %v3528_v38, %s5375_s13  ;;  %s4067_s13 = smul.u32 24, %s5399_s22 }
 0xd8a   : > { %s450_s28 = scalar_lea.vmem %s5355_s12, %s4067_s13 }
 0xd8b   : > { %3589 = vrot.lane.b32.xlu1 %v3583_v58, %s5377_s26 }
 0xd8c   : > { %3587 = vrot.lane.b32.xlu0 %v3582_v40, %s5377_s26 }
 0xd8f   : > { %3643 = vrot.lane.b32.xlu1 %v3637_v42, %s5373_s24 }
 0xd90   : > { %3641 = vrot.lane.b32.xlu0 %v3636_v36, %s5373_s24 }
 0xd93   : > { %3666 = vrot.lane.b32.xlu1 %v3657_v35, %s5374_s25 }
 0xd94   : > { %3668 = vrot.lane.b32.xlu0 %v3658_v60, %s5374_s25 }
 0xd97   : > { %3670 = vrot.lane.b32.xlu1 %v3659_v25, %s5374_s25 }
 0xd98   : > { %2786 = vperm.xlu0 %4092, %v2783_v44  }
 0xd9b   : > { %3709 = vperm.xlu1 %4091, %v3706_v53  }
 0xdc2   : > { %v3455_v56 = vpop.permute.xlu0 %3454 }
 0xdc5   : > { %v3484_v3 = vpop.permute.xlu1 %3483 }
 0xdc6   : > { %v3509_v7 = vpop.permute.xlu0 %3508 }
 0xdc9   : > { %v3538_v63 = vpop.permute.xlu1 %3537 }
 0xdca   : > { %v3563_v21 = vpop.permute.xlu0 %3562 }
 0xdcd   : > { %v3592_v6 = vpop.permute.xlu1 %3591 }
 0xdce   : > { %v3617_v52 = vpop.permute.xlu0 %3616 }
 0xdd1   : > { %v5293_v9 = vpop.permute.xlu1 %3645 }
 0xdd2   : > { %v3449_v16 = vpop.permute.xlu0 %3448 }
 0xdd5   : > { %v3453_v10 = vpop.permute.xlu1 %3452 }
 0xdd6   : > { %v3458_v20 = vsel %vm472_vm2, %v3453_v10, %v3455_v56  ;;  %v3503_v13 = vpop.permute.xlu0 %3502 }
 0xdd7   : > { %3464 = vst [vmem:[#allocation3 + $0x10] sm:$0xf] %v3458_v20 }
 0xdd9   : > { %v3507_v46 = vpop.permute.xlu1 %3506 }
 0xdda   : > { %v3512_v54 = vsel %vm520_vm3, %v3507_v46, %v3509_v7  ;;  %v3557_v43 = vpop.permute.xlu0 %3556 }
 0xddb   : > { %3518 = vst [vmem:[#allocation3 + $0x28] sm:$0xf] %v3512_v54 }
 0xddd   : > { %v3478_v22 = vpop.permute.xlu1 %3477 }
 0xdde   : > { %v3611_v30 = vpop.permute.xlu0 %3610 }
 0xde1   : > { %v3532_v17 = vpop.permute.xlu1 %3531 }
 0xde2   : > { %v5297_v50 = vpop.permute.xlu0 %3664 }
 0xde5   : > { %v3561_v28 = vpop.permute.xlu1 %3560 }
 0xde6   : > { %v3566_v23 = vsel %vm568_vm0, %v3561_v28, %v3563_v21  ;;  %v3451_v33 = vpop.permute.xlu0 %3450 }
 0xde7   : > { %3572 = vst [vmem:[#allocation3 + $0x40] sm:$0xf] %v3566_v23  ;;  %v3456_v11 = vsel %vm472_vm2, %v3449_v16, %v3451_v33  ;;  %v3457_v24 = vsel %vm472_vm2, %v3451_v33, %v3453_v10 }
 0xde8   : > { %3462 = vst [vmem:[#allocation3] sm:$0xf] %v3456_v11  ;;  %3463 = vst [vmem:[#allocation3 + $0x8] sm:$0xf] %v3457_v24 }
 0xde9   : > { %v3615_v61 = vpop.permute.xlu1 %3614 }
 0xdea   : > { %v3620_v57 = vsel %vm616_vm8, %v3615_v61, %v3617_v52  ;;  %v3505_v27 = vpop.permute.xlu0 %3504 }
 0xdeb   : > { %3626 = vst [vmem:[#allocation3 + $0x58] sm:$0xf] %v3620_v57  ;;  %v3510_v5 = vsel %vm520_vm3, %v3503_v13, %v3505_v27  ;;  %v3511_v62 = vsel %vm520_vm3, %v3505_v27, %v3507_v46  ;;  %vm5387_vm3 = vcmask 637952   ;;  %v3705_v57 = vld [vmem:[%s5353_s10 + $0x8] sm:$0xf] }
 0xdec   : > { %3516 = vst [vmem:[#allocation3 + $0x18] sm:$0xf] %v3510_v5  ;;  %3517 = vst [vmem:[#allocation3 + $0x20] sm:$0xf] %v3511_v62 }
 0xded   : > { %v3586_v12 = vpop.permute.xlu1 %3585 }
 0xdee   : > { %v3559_v39 = vpop.permute.xlu0 %3558 }
 0xdef   : > { %v3564_v59 = vsel %vm568_vm0, %v3557_v43, %v3559_v39  ;;  %v3565_v48 = vsel %vm568_vm0, %v3559_v39, %v3561_v28  ;;  %vm5384_vm0 = vcmask 777216  }
 0xdf0   : > { %3570 = vst [vmem:[#allocation3 + $0x30] sm:$0xf] %v3564_v59  ;;  %3571 = vst [vmem:[#allocation3 + $0x38] sm:$0xf] %v3565_v48 }
 0xdf1   : > { %v3640_v32 = vpop.permute.xlu1 %3639  ;;  %vm5385_vm1 = vmmov %vm5384_vm0 }
 0xdf2   : > { %v3613_v49 = vpop.permute.xlu0 %3612  ;;  %vm5386_vm2 = vmmov %vm5384_vm0 }
 0xdf3   : > { %v3618_v47 = vsel %vm616_vm8, %v3611_v30, %v3613_v49  ;;  %v3619_v51 = vsel %vm616_vm8, %v3613_v49, %v3615_v61  ;;  %vm5392_vm8 = vmmov %vm5390_vm6 }
 0xdf4   : > { %3624 = vst [vmem:[#allocation3 + $0x48] sm:$0xf] %v3618_v47  ;;  %3625 = vst [vmem:[#allocation3 + $0x50] sm:$0xf] %v3619_v51 }
 0xdf5   : > { %v3482_v26 = vpop.permute.xlu1 %3481 }
 0xdf6   : > { %v3487_v0 = vsel %vm496_vm5, %v3482_v26, %v3484_v3  ;;  %v3480_v14 = vpop.permute.xlu0 %3479 }
 0xdf7   : > { %3493 = vst [vmem:[#allocation3 + $0x10] sm:$0xf0] %v3487_v0  ;;  %v3485_v18 = vsel %vm496_vm5, %v3478_v22, %v3480_v14  ;;  %v3486_v29 = vsel %vm496_vm5, %v3480_v14, %v3482_v26  ;;  %vm5389_vm5 = vmmov %vm5387_vm3 }
 0xdf8   : > { %3491 = vst [vmem:[#allocation3] sm:$0xf0] %v3485_v18  ;;  %3492 = vst [vmem:[#allocation3 + $0x8] sm:$0xf0] %v3486_v29 }
 0xdf9   : > { %v3536_v4 = vpop.permute.xlu1 %3535 }
 0xdfa   : > { %v3541_v15 = vsel %vm544_vm4, %v3536_v4, %v3538_v63  ;;  %v3534_v31 = vpop.permute.xlu0 %3533 }
 0xdfb   : > { %3547 = vst [vmem:[#allocation3 + $0x28] sm:$0xf0] %v3541_v15  ;;  %v3539_v19 = vsel %vm544_vm4, %v3532_v17, %v3534_v31  ;;  %v3540_v45 = vsel %vm544_vm4, %v3534_v31, %v3536_v4  ;;  %vm5388_vm4 = vmmov %vm5387_vm3 }
 0xdfc   : > { %3545 = vst [vmem:[#allocation3 + $0x18] sm:$0xf0] %v3539_v19  ;;  %3546 = vst [vmem:[#allocation3 + $0x20] sm:$0xf0] %v3540_v45 }
 0xdfd   : > { %v3590_v37 = vpop.permute.xlu1 %3589 }
 0xdfe   : > { %v3595_v41 = vsel %vm5384_vm0, %v3590_v37, %v3592_v6  ;;  %v3588_v8 = vpop.permute.xlu0 %3587  ;;  %v3683_v40 = vld [vmem:[#allocation3 + $0x10] sm:$0xff] }
 0xdff   : > { %3601 = vst [vmem:[#allocation3 + $0x40] sm:$0xf0] %v3595_v41  ;;  %v3593_v38 = vsel %vm5385_vm1, %v3586_v12, %v3588_v8  ;;  %v3594_v1 = vsel %vm5386_vm2, %v3588_v8, %v3590_v37  ;;  %v3682_v35 = vld [vmem:[#allocation3 + $0x8] sm:$0xff]  ;;  %v3681_v53 = vld [vmem:[#allocation3] sm:$0xff] }
 0xe00   : > { %3599 = vst [vmem:[#allocation3 + $0x30] sm:$0xf0] %v3593_v38  ;;  %3600 = vst [vmem:[#allocation3 + $0x38] sm:$0xf0] %v3594_v1 }
 0xe01   : > { %v3644_v58 = vpop.permute.xlu1 %3643 }
 0xe02   : > { %v3649_v55 = vsel %vm5387_vm3, %v3644_v58, %v5293_v9  ;;  %v3686_v2 = vld [vmem:[#allocation3 + $0x28] sm:$0xff]  ;;  %v3642_v42 = vpop.permute.xlu0 %3641 }
 0xe03   : > { %3655 = vst [vmem:[#allocation3 + $0x58] sm:$0xf0] %v3649_v55  ;;  %v3698_v36 = vpack.c.bf16 %v3686_v2, %v3683_v40  ;;  %v3647_v60 = vsel %vm5388_vm4, %v3640_v32, %v3642_v42  ;;  %v3648_v25 = vsel %vm5389_vm5, %v3642_v42, %v3644_v58  ;;  %v3685_v44 = vld [vmem:[#allocation3 + $0x20] sm:$0xff]  ;;  %v3684_v56 = vld [vmem:[#allocation3 + $0x18] sm:$0xff] }
 0xe04   : > { %3653 = vst [vmem:[#allocation3 + $0x48] sm:$0xf0] %v3647_v60  ;;  %3654 = vst [vmem:[#allocation3 + $0x50] sm:$0xf0] %v3648_v25  ;;  %v3697_v7 = vpack.c.bf16 %v3685_v44, %v3682_v35  ;;  %v3696_v63 = vpack.c.bf16 %v3684_v56, %v3681_v53 }
 0xe05   : > { %4043 = vmatpush3.bf16.msra.mxu0 %v3698_v36  ;;  %v3667_v3 = vpop.permute.xlu1 %3666 }
 0xe06   : > { %v3672_v21 = vsel %vm5390_vm6, %v5297_v50, %v3667_v3  ;;  %4044 = vmatprep.subr.bf16.mxu0 %v4166_v34  ;;  %v3669_v6 = vpop.permute.xlu0 %3668  ;;  %3724 = vmatprep.subr.bf16.mxu1 %v3697_v7  ;;  %v3689_v10 = vld [vmem:[#allocation3 + $0x40] sm:$0xff] }
 0xe07   : > { %3678 = vst [vmem:[#allocation3 + $0x60] sm:$0xf] %v3672_v21  ;;  %v3673_v52 = vsel %vm5391_vm7, %v3667_v3, %v3669_v6  ;;  %3725 = vmatpush1.bf16.msra.mxu1 %v3696_v63  ;;  %v3688_v46 = vld [vmem:[#allocation3 + $0x38] sm:$0xff]  ;;  %v3687_v43 = vld [vmem:[#allocation3 + $0x30] sm:$0xff] }
 0xe08   : > { %3679 = vst [vmem:[#allocation3 + $0x68] sm:$0xf] %v3673_v52 }
 0xe09   : > { %v3671_v9 = vpop.permute.xlu1 %3670 }
 0xe0a   : > { %v3674_v16 = vsel %vm5392_vm8, %v3669_v6, %v3671_v9  ;;  %v3692_v20 = vld [vmem:[#allocation3 + $0x58] sm:$0xff] }
 0xe0b   : > { %3680 = vst [vmem:[#allocation3 + $0x70] sm:$0xf] %v3674_v16  ;;  %v3701_v13 = vpack.c.bf16 %v3692_v20, %v3689_v10  ;;  %v3691_v54 = vld [vmem:[#allocation3 + $0x50] sm:$0xff]  ;;  %v3690_v22 = vld [vmem:[#allocation3 + $0x48] sm:$0xff] }
 0xe0c   : > { %v3700_v30 = vpack.c.bf16 %v3691_v54, %v3688_v46  ;;  %v3699_v17 = vpack.c.bf16 %v3690_v22, %v3687_v43 }
 0xe0d   : > { %4045 = vmatpush3.bf16.msra.mxu0 %v3701_v13 }
 0xe0e   : > { %v3693_v50 = vld [vmem:[#allocation3 + $0x60] sm:$0xf]  ;;  %4046 = vmatprep.subr.bf16.mxu0 %v4166_v34  ;;  %3726 = vmatprep.subr.bf16.mxu1 %v3700_v30 }
 0xe0f   : > { %v3702_v28 = vpack.c.bf16 %v3693_v50, %v3693_v50  ;;  %3727 = vmatpush1.bf16.msra.mxu1 %v3699_v17  ;;  %v3694_v23 = vld [vmem:[#allocation3 + $0x68] sm:$0xf] }
 0xe10   : > { %v3703_v33 = vpack.c.bf16 %v3694_v23, %v3694_v23 }
 0xe11   : > { %v3716_v24 = vsel %vm5394_vm12, %v3702_v28, 0 }
 0xe12   : > { %v3695_v11 = vld [vmem:[#allocation3 + $0x70] sm:$0xf]  ;;  %3934 = vmatprep.subr.msk.bf16.mxu1 %vm5393_vm9, %v3703_v33 }
 0xe13   : > { %v3704_v61 = vpack.c.bf16 %v3695_v11, %v3695_v11  ;;  %3729 = vmatpush1.bf16.msra.mxu1 %v3716_v24 }
 0xe15   : > { %v3722_v27 = vsel %vm5395_vm15, %v3704_v61, 0 }
 0xe16   : > { %4047 = vmatpush3.bf16.msra.mxu0 %v3722_v27  ;;  %3935 = vmatmul.mubr.msk.bf16.vlgmr.msra.gmra.mrb[16].mxu1 %vm5396_vm10, %v3705_v57 }
 0xe17   : > { %v2787_v5 = vpop.permute.xlu0 %2786 }
 0xe19   : > { %4049 = vmatmul.mubr.msk.bf16.vlgmr.msra.gmra.mrb[20].mxu0 %vm5397_vm11, %v3705_v57 }
 0xe1a   : > { %v3710_v34 = vpop.permute.xlu1 %3709 }
 0xe1b   : > { %v4052_v62 = vadd.f32 %v3710_v34, %v2787_v5 }
 0xee9   : > { %v3758_v12 = vpop.f32.mrb[16].mxu1 }
 0xeea   : > { %v4053_v39 = vadd.f32 %v4052_v62, %v3758_v12  ;;  %v3760_v59 = vpop.f32.mrb[17].mxu1 }
 0xeeb   : > { %v4055_v48 = vadd.f32 %v4052_v62, %v3760_v59  ;;  %v3762_v32 = vpop.f32.mrb[18].mxu1 }
 0xeec   : > { %v3799_v49 = vpop.f32.mrb[20].mxu0  ;;  %3808 = vst [vmem:[%s450_s28] sm:$0xff] %v4053_v39  ;;  %v3763_v51 = vpop.f32.mrb[19].mxu1 }
 0xeed   : > { %v4057_v47 = vadd.f32 %v4052_v62, %v3799_v49  ;;  %v4050_v26 = vpop.f32.mrb[21].mxu0  ;;  %3809 = vst [vmem:[%s450_s28 + $0x8] sm:$0xff] %v4055_v48 }
 0xeee   : > { %v3802_v0 = vpop.f32.mrb[22].mxu0 }
 0xeef   : > { %3810 = vst [vmem:[%s450_s28 + $0x10] sm:$0xff] %v4057_v47  ;;  %v4051_v14 = vpop.f32.mrb[23].mxu0 }
 0xef0 PF: > { %s22_s21 = sadd.s32 1, %s4153_s21  }
 0xef1   : > { %p19_p4 = scmp.ge.s32.totalorder %s22_s21, 4  }
 0xef3   :  { %21 = sbr.rel (!%p19_p4) target bundleno = 1 (0x1), region = 104 }

</bundles_post_ra>
